<compile_context>
chip_gen: v7x
topology: tpu7x:2x2x1
jax: 0.10.0
libtpu: 0.0.40
codegen_flags: <defaults>
</compile_context>

<pallas_src>
import functools

import jax
import jax.numpy as jnp
import numpy as np
from jax.experimental import pallas as pl
from jax.experimental.pallas import tpu as pltpu


# ------------------------------ Pallas kernel -------------------------------
def tcn_kernel(x_ref,          # (1, T, C_pad)  bf16   network input (one batch elem)
               w1_ref,         # (L, K, C_pad, C_pad) bf16   conv1 weights (per tap)
               b1_ref,         # (L, 1, C_pad)  f32
               w2_ref,         # (L, K, C_pad, C_pad) bf16   conv2 weights (per tap)
               b2_ref,         # (L, 1, C_pad)  f32
               wd_ref,         # (L, C_pad, C_pad) bf16      1x1 downsample weights
               bd_ref,         # (L, 1, C_pad)  f32
               o_ref,          # (1, T, C_pad)  f32   last block's output
               a_ref,          # scratch (pad + T, C_pad) f32, zero causal head
               *, dilations, has_downsample, ksize, pad):
    T = x_ref.shape[1]
    C = x_ref.shape[2]
    num_levels = len(dilations)

    # Zero the causal-history head once (it stays zero for every level / conv),
    # then drop the input into the value region of the padded scratch.
    a_ref[0:pad, :] = jnp.zeros((pad, C), jnp.float32)
    cur = x_ref[0].astype(jnp.float32)          # (T, C) current activation (f32)
    a_ref[pad:, :] = cur

    def dilated_causal_conv(tap0_bf, w_ref, lvl, bias, d):
        # y[t] = sum_k  act[t - (ksize-1-k)*d] @ W[lvl, k]  + bias
        acc = bias                               # (1, C) f32, broadcasts over T
        for k in range(ksize):
            s = (ksize - 1 - k) * d
            if s == 0:
                tap = tap0_bf                    # unshifted tap: reuse live value
            else:
                # shifted tap: static sub-slice of the zero-headed scratch
                tap = a_ref[pad - s: pad - s + T, :].astype(jnp.bfloat16)
            acc = acc + jnp.dot(tap, w_ref[lvl, k],
                                preferred_element_type=jnp.float32)
        return acc

    # NOTE: per-level channel counts / dilations are static, so the level loop
    # is unrolled (short fixed trip-count -> LLO scheduler visibility).  For
    # very deep TCNs, switch to lax.fori_loop with pl.ds tap offsets to bound
    # live ranges.
    for i in range(num_levels):
        d = dilations[i]
        cur_bf = cur.astype(jnp.bfloat16)        # cast once per level

        # Residual branch: 1x1 conv when channel counts differ, else identity.
        # Computed from the live value before the scratch is overwritten.
        if has_downsample[i]:
            res = jnp.dot(cur_bf, wd_ref[i],
                          preferred_element_type=jnp.float32) + bd_ref[i]
        else:
            res = cur

        # conv1 -> chomp -> ReLU  (Dropout = identity in eval mode)
        h = jnp.maximum(dilated_causal_conv(cur_bf, w1_ref, i, b1_ref[i], d), 0.0)
        a_ref[pad:, :] = h                       # conv2 reads shifted taps of h
        # conv2 -> chomp -> ReLU
        g = jnp.maximum(
            dilated_causal_conv(h.astype(jnp.bfloat16), w2_ref, i, b2_ref[i], d),
            0.0)

        out = jnp.maximum(g + res, 0.0)          # TemporalBlock: relu(net(x) + res)
        if i + 1 < num_levels:
            a_ref[pad:, :] = out                 # becomes the next block's input
            cur = out
        else:
            o_ref[0] = out                       # lane-dense (T, 128) f32 store


# ------------------------------ host wrapper --------------------------------
def pack_params(raw, kernel_size, c_pad):
    """Zero-pad per-level weights to (c_pad, c_pad) and stack over levels."""
    L = len(raw)
    w1 = np.zeros((L, kernel_size, c_pad, c_pad), np.float32)
    b1 = np.zeros((L, 1, c_pad), np.float32)
    w2 = np.zeros((L, kernel_size, c_pad, c_pad), np.float32)
    b2 = np.zeros((L, 1, c_pad), np.float32)
    wd = np.zeros((L, c_pad, c_pad), np.float32)
    bd = np.zeros((L, 1, c_pad), np.float32)
    has_ds = []
    for i, (W1, bb1, W2, bb2, Wd, bbd) in enumerate(raw):
        cout, cin, K = W1.shape
        for k in range(K):
            # transpose to (C_in, C_out) for right-multiplication: y = tap @ W
            w1[i, k, :cin, :cout] = np.asarray(W1[:, :, k]).T
            w2[i, k, :cout, :cout] = np.asarray(W2[:, :, k]).T
        b1[i, 0, :cout] = np.asarray(bb1)
        b2[i, 0, :cout] = np.asarray(bb2)
        if Wd is not None:
            wd[i, :cin, :cout] = np.asarray(Wd).T
            bd[i, 0, :cout] = np.asarray(bbd)
            has_ds.append(True)
        else:
            has_ds.append(False)
    return (jnp.asarray(w1, jnp.bfloat16), jnp.asarray(b1, jnp.float32),
            jnp.asarray(w2, jnp.bfloat16), jnp.asarray(b2, jnp.float32),
            jnp.asarray(wd, jnp.bfloat16), jnp.asarray(bd, jnp.float32),
            tuple(has_ds))


def temporal_conv_net(x, raw_params, kernel_size=2):
    """TemporalConvNet.forward: x (B, C_in, T) -> (B, num_channels[-1], T)."""
    B, c_in, T = x.shape
    L = len(raw_params)
    channel_counts = [c_in] + [int(p[0].shape[0]) for p in raw_params]
    c_pad = max(128, -(-max(channel_counts) // 128) * 128)   # lane-dense channel pad
    dilations = tuple(2 ** i for i in range(L))
    pad = (kernel_size - 1) * dilations[-1]
    pad = max(8, -(-pad // 8) * 8)                           # sublane-aligned writes

    w1, b1, w2, b2, wd, bd, has_ds = pack_params(raw_params, kernel_size, c_pad)

    # Layout plumbing in the wrapper: (B, C, T) f32 -> lane-dense (B, T, C_pad) bf16.
    xt = jnp.transpose(x, (0, 2, 1)).astype(jnp.bfloat16)
    xt = jnp.pad(xt, ((0, 0), (0, 0), (0, c_pad - c_in)))

    kernel = functools.partial(tcn_kernel, dilations=dilations,
                               has_downsample=has_ds, ksize=kernel_size, pad=pad)

    def const_spec(a):  # whole-array block, same index every step -> stays resident
        return pl.BlockSpec(a.shape, lambda b, _n=a.ndim: (0,) * _n)

    # Advisory cost hint for XLA's scheduler around the custom call.
    matmuls_per_level = [2 * kernel_size + (1 if ds else 0) for ds in has_ds]
    flops = int(B * sum(m * 2 * T * c_pad * c_pad for m in matmuls_per_level))
    bytes_accessed = int(B * T * c_pad * (2 + 4)            # bf16 in + f32 out
                         + w1.size * 2 + w2.size * 2 + wd.size * 2
                         + (b1.size + b2.size + bd.size) * 4)
    cost = pl.CostEstimate(flops=flops, transcendentals=0,
                           bytes_accessed=bytes_accessed)

    out_pad = pl.pallas_call(
        kernel,
        out_shape=jax.ShapeDtypeStruct((B, T, c_pad), jnp.float32),
        grid=(B,),
        in_specs=[pl.BlockSpec((1, T, c_pad), lambda b: (b, 0, 0)),
                  const_spec(w1), const_spec(b1),
                  const_spec(w2), const_spec(b2),
                  const_spec(wd), const_spec(bd)],
        out_specs=pl.BlockSpec((1, T, c_pad), lambda b: (b, 0, 0)),
        scratch_shapes=[pltpu.VMEM((pad + T, c_pad), jnp.float32)],
        compiler_params=pltpu.CompilerParams(
            dimension_semantics=("parallel",),      # v7x: shard batch over 2 TCs
            vmem_limit_bytes=32 * 1024 * 1024),
        cost_estimate=cost,
    )(xt, w1, b1, w2, b2, wd, bd)

    c_out = channel_counts[-1]
    return jnp.transpose(out_pad[:, :, :c_out], (0, 2, 1))


# ------------------ pure-JAX reference (same bf16 boundaries) ----------------
def _ref_dilated_causal_conv(h, W_pt, b, d):
    """h (B, C_in, T) f32; W_pt (C_out, C_in, K).  Conv1d + Chomp1d."""
    K = W_pt.shape[2]
    T = h.shape[2]
    p = (K - 1) * d
    hp = jnp.pad(h, ((0, 0), (0, 0), (p, 0)))
    y = b[None, :, None]
    for k in range(K):
        tap = hp[:, :, k * d: k * d + T]          # = h[..., t - (K-1-k)*d]
        y = y + jnp.einsum("oc,bct->bot",
                           W_pt[:, :, k].astype(jnp.bfloat16),
                           tap.astype(jnp.bfloat16),
                           preferred_element_type=jnp.float32)
    return y


def ref_temporal_conv_net(x, raw_params):
    h = x.astype(jnp.bfloat16).astype(jnp.float32)    # kernel input is bf16
    for i, (W1, b1, W2, b2, Wd, bd) in enumerate(raw_params):
        d = 2 ** i
        out = jnp.maximum(_ref_dilated_causal_conv(h, W1, b1, d), 0.0)
        out = jnp.maximum(_ref_dilated_causal_conv(out, W2, b2, d), 0.0)
        if Wd is not None:
            res = jnp.einsum("oc,bct->bot", Wd.astype(jnp.bfloat16),
                             h.astype(jnp.bfloat16),
                             preferred_element_type=jnp.float32) + bd[None, :, None]
        else:
            res = h
        h = jnp.maximum(out + res, 0.0)
    return h


# ------------------- deterministic parameter construction -------------------
def init_tcn_params(key, num_inputs, num_channels, kernel_size=2):
    """Effective (weight_norm-folded) per-level TemporalBlock weights."""
    L = len(num_channels)
    level_keys = jax.random.split(key, L)
    raw = []
    for i in range(L):
        cin = num_inputs if i == 0 else num_channels[i - 1]
        cout = num_channels[i]
        k = jax.random.split(level_keys[i], 6)
        W1 = jax.random.normal(k[0], (cout, cin, kernel_size), jnp.float32) / np.sqrt(cin * kernel_size)
        b1 = 0.05 * jax.random.normal(k[1], (cout,), jnp.float32)
        W2 = jax.random.normal(k[2], (cout, cout, kernel_size), jnp.float32) / np.sqrt(cout * kernel_size)
        b2 = 0.05 * jax.random.normal(k[3], (cout,), jnp.float32)
        if cin != cout:
            Wd = jax.random.normal(k[4], (cout, cin), jnp.float32) / np.sqrt(cin)
            bd = 0.05 * jax.random.normal(k[5], (cout,), jnp.float32)
        else:
            Wd, bd = None, None                   # identity residual
        raw.append((W1, b1, W2, b2, Wd, bd))
    return raw


if __name__ == "__main__":
    # Small shapes consistent with TemporalConvNet(num_inputs, num_channels, kernel_size=2)
    B, T = 2, 128
    num_inputs = 16
    num_channels = [32, 32, 24, 32]   # level 1 exercises the identity-residual path
    kernel_size = 2

    root = jax.random.PRNGKey(0)
    k_x, k_p = jax.random.split(root)
    x = jax.random.normal(k_x, (B, num_inputs, T), jnp.float32)   # PyTorch (N, C, T)
    params = init_tcn_params(k_p, num_inputs, num_channels, kernel_size)

    out = temporal_conv_net(x, params, kernel_size)
    out = jax.block_until_ready(out)
    assert out.shape == (B, num_channels[-1], T), out.shape

    ref = ref_temporal_conv_net(x, params)
    np.testing.assert_allclose(np.asarray(out), np.asarray(ref), rtol=1e-2, atol=1e-2)

    print("KERNEL_OK")
</pallas_src>

<mosaic_0001>
module attributes {stable_mosaic.version = 11 : i64} {
  func.func @tcn_kernel(%arg0: i32, %arg1: memref<1x128x128xbf16, #tpu.memory_space<vmem>>, %arg2: memref<4x2x128x128xbf16, #tpu.memory_space<vmem>>, %arg3: memref<4x1x128xf32, #tpu.memory_space<vmem>>, %arg4: memref<4x2x128x128xbf16, #tpu.memory_space<vmem>>, %arg5: memref<4x1x128xf32, #tpu.memory_space<vmem>>, %arg6: memref<4x128x128xbf16, #tpu.memory_space<vmem>>, %arg7: memref<4x1x128xf32, #tpu.memory_space<vmem>>, %arg8: memref<1x128x128xf32, #tpu.memory_space<vmem>>, %arg9: memref<136x128xf32, #tpu.memory_space<vmem>>) attributes {dimension_semantics = [#tpu.dimension_semantics<parallel>], iteration_bounds = array<i64: 2>, scalar_prefetch = 0 : i64, scratch_operands = 1 : i64, tpu.core_type = #tpu.core_type<tc>, window_params = [{transform_indices = @transform_0, window_bounds = array<i64: 1, 128, 128>}, {pipeline_mode = #tpu.pipeline_mode<synchronous>, transform_indices = @transform_1, window_bounds = array<i64: 4, 2, 128, 128>}, {pipeline_mode = #tpu.pipeline_mode<synchronous>, transform_indices = @transform_2, window_bounds = array<i64: 4, 1, 128>}, {pipeline_mode = #tpu.pipeline_mode<synchronous>, transform_indices = @transform_3, window_bounds = array<i64: 4, 2, 128, 128>}, {pipeline_mode = #tpu.pipeline_mode<synchronous>, transform_indices = @transform_4, window_bounds = array<i64: 4, 1, 128>}, {pipeline_mode = #tpu.pipeline_mode<synchronous>, transform_indices = @transform_5, window_bounds = array<i64: 4, 128, 128>}, {pipeline_mode = #tpu.pipeline_mode<synchronous>, transform_indices = @transform_6, window_bounds = array<i64: 4, 1, 128>}, {transform_indices = @transform_7, window_bounds = array<i64: 1, 128, 128>}]} {
    %cst = arith.constant 0.000000e+00 : f32
    %0 = vector.broadcast %cst : f32 to vector<8x128xf32>
    %c0 = arith.constant 0 : index
    %c0_0 = arith.constant 0 : index
    %1 = vector.load %arg9[%c0, %c0_0] : memref<136x128xf32, #tpu.memory_space<vmem>>, vector<8x128xf32>
    tpu.vector_store %arg9[%c0, %c0_0], %0 {strides = array<i32>} : memref<136x128xf32, #tpu.memory_space<vmem>>, vector<8x128xf32>,
    %c0_1 = arith.constant 0 : index
    %c0_2 = arith.constant 0 : index
    %c0_3 = arith.constant 0 : index
    %2 = vector.load %arg1[%c0_1, %c0_2, %c0_3] : memref<1x128x128xbf16, #tpu.memory_space<vmem>>, vector<1x128x128xbf16>
    %3 = vector.shape_cast %2 : vector<1x128x128xbf16> to vector<128x128xbf16>
    %4 = arith.extf %3 : vector<128x128xbf16> to vector<128x128xf32>
    %c8 = arith.constant 8 : index
    %c0_4 = arith.constant 0 : index
    %5 = vector.load %arg9[%c8, %c0_4] : memref<136x128xf32, #tpu.memory_space<vmem>>, vector<128x128xf32>
    tpu.vector_store %arg9[%c8, %c0_4], %4 {strides = array<i32>} : memref<136x128xf32, #tpu.memory_space<vmem>>, vector<128x128xf32>,
    %6 = arith.truncf %4 : vector<128x128xf32> to vector<128x128xbf16>
    %c0_5 = arith.constant 0 : index
    %c0_6 = arith.constant 0 : index
    %c0_7 = arith.constant 0 : index
    %7 = vector.load %arg6[%c0_5, %c0_6, %c0_7] : memref<4x128x128xbf16, #tpu.memory_space<vmem>>, vector<1x128x128xbf16>
    %8 = vector.shape_cast %7 : vector<1x128x128xbf16> to vector<128x128xbf16>
    %cst_8 = arith.constant dense<0.000000e+00> : vector<128x128xf32>
    %9 = tpu.matmul %6, %8, %cst_8 {dimension_numbers = #tpu.dot_dimension_numbers<[1], [0], [0], [1], [0, 0, 1, 1], [], []>} : vector<128x128xbf16>, vector<128x128xbf16>, vector<128x128xf32> -> vector<128x128xf32>
    %c0_9 = arith.constant 0 : index
    %c0_10 = arith.constant 0 : index
    %c0_11 = arith.constant 0 : index
    %10 = vector.load %arg7[%c0_9, %c0_10, %c0_11] : memref<4x1x128xf32, #tpu.memory_space<vmem>>, vector<1x1x128xf32>
    %11 = vector.shape_cast %10 : vector<1x1x128xf32> to vector<1x128xf32>
    %12 = vector.broadcast %11 : vector<1x128xf32> to vector<128x128xf32>
    %13 = arith.addf %9, %12 : vector<128x128xf32>
    %c0_12 = arith.constant 0 : index
    %c0_13 = arith.constant 0 : index
    %c0_14 = arith.constant 0 : index
    %14 = vector.load %arg3[%c0_12, %c0_13, %c0_14] : memref<4x1x128xf32, #tpu.memory_space<vmem>>, vector<1x1x128xf32>
    %15 = vector.shape_cast %14 : vector<1x1x128xf32> to vector<1x128xf32>
    %c7 = arith.constant 7 : index
    %c0_15 = arith.constant 0 : index
    %16 = vector.load %arg9[%c7, %c0_15] : memref<136x128xf32, #tpu.memory_space<vmem>>, vector<128x128xf32>
    %17 = arith.truncf %16 : vector<128x128xf32> to vector<128x128xbf16>
    %c0_16 = arith.constant 0 : index
    %c0_17 = arith.constant 0 : index
    %c0_18 = arith.constant 0 : index
    %c0_19 = arith.constant 0 : index
    %18 = vector.load %arg2[%c0_16, %c0_17, %c0_18, %c0_19] : memref<4x2x128x128xbf16, #tpu.memory_space<vmem>>, vector<1x1x128x128xbf16>
    %19 = vector.shape_cast %18 : vector<1x1x128x128xbf16> to vector<128x128xbf16>
    %cst_20 = arith.constant dense<0.000000e+00> : vector<128x128xf32>
    %20 = tpu.matmul %17, %19, %cst_20 {dimension_numbers = #tpu.dot_dimension_numbers<[1], [0], [0], [1], [0, 0, 1, 1], [], []>} : vector<128x128xbf16>, vector<128x128xbf16>, vector<128x128xf32> -> vector<128x128xf32>
    %21 = vector.broadcast %15 : vector<1x128xf32> to vector<128x128xf32>
    %22 = arith.addf %21, %20 : vector<128x128xf32>
    %c0_21 = arith.constant 0 : index
    %c1 = arith.constant 1 : index
    %c0_22 = arith.constant 0 : index
    %c0_23 = arith.constant 0 : index
    %23 = vector.load %arg2[%c0_21, %c1, %c0_22, %c0_23] : memref<4x2x128x128xbf16, #tpu.memory_space<vmem>>, vector<1x1x128x128xbf16>
    %24 = vector.shape_cast %23 : vector<1x1x128x128xbf16> to vector<128x128xbf16>
    %cst_24 = arith.constant dense<0.000000e+00> : vector<128x128xf32>
    %25 = tpu.matmul %6, %24, %cst_24 {dimension_numbers = #tpu.dot_dimension_numbers<[1], [0], [0], [1], [0, 0, 1, 1], [], []>} : vector<128x128xbf16>, vector<128x128xbf16>, vector<128x128xf32> -> vector<128x128xf32>
    %26 = arith.addf %22, %25 : vector<128x128xf32>
    %cst_25 = arith.constant 0.000000e+00 : f32
    %27 = vector.broadcast %cst_25 : f32 to vector<128x128xf32>
    %28 = arith.maximumf %26, %27 : vector<128x128xf32>
    %c8_26 = arith.constant 8 : index
    %c0_27 = arith.constant 0 : index
    %29 = vector.load %arg9[%c8_26, %c0_27] : memref<136x128xf32, #tpu.memory_space<vmem>>, vector<128x128xf32>
    tpu.vector_store %arg9[%c8_26, %c0_27], %28 {strides = array<i32>} : memref<136x128xf32, #tpu.memory_space<vmem>>, vector<128x128xf32>,
    %30 = arith.truncf %28 : vector<128x128xf32> to vector<128x128xbf16>
    %c0_28 = arith.constant 0 : index
    %c0_29 = arith.constant 0 : index
    %c0_30 = arith.constant 0 : index
    %31 = vector.load %arg5[%c0_28, %c0_29, %c0_30] : memref<4x1x128xf32, #tpu.memory_space<vmem>>, vector<1x1x128xf32>
    %32 = vector.shape_cast %31 : vector<1x1x128xf32> to vector<1x128xf32>
    %c7_31 = arith.constant 7 : index
    %c0_32 = arith.constant 0 : index
    %33 = vector.load %arg9[%c7_31, %c0_32] : memref<136x128xf32, #tpu.memory_space<vmem>>, vector<128x128xf32>
    %34 = arith.truncf %33 : vector<128x128xf32> to vector<128x128xbf16>
    %c0_33 = arith.constant 0 : index
    %c0_34 = arith.constant 0 : index
    %c0_35 = arith.constant 0 : index
    %c0_36 = arith.constant 0 : index
    %35 = vector.load %arg4[%c0_33, %c0_34, %c0_35, %c0_36] : memref<4x2x128x128xbf16, #tpu.memory_space<vmem>>, vector<1x1x128x128xbf16>
    %36 = vector.shape_cast %35 : vector<1x1x128x128xbf16> to vector<128x128xbf16>
    %cst_37 = arith.constant dense<0.000000e+00> : vector<128x128xf32>
    %37 = tpu.matmul %34, %36, %cst_37 {dimension_numbers = #tpu.dot_dimension_numbers<[1], [0], [0], [1], [0, 0, 1, 1], [], []>} : vector<128x128xbf16>, vector<128x128xbf16>, vector<128x128xf32> -> vector<128x128xf32>
    %38 = vector.broadcast %32 : vector<1x128xf32> to vector<128x128xf32>
    %39 = arith.addf %38, %37 : vector<128x128xf32>
    %c0_38 = arith.constant 0 : index
    %c1_39 = arith.constant 1 : index
    %c0_40 = arith.constant 0 : index
    %c0_41 = arith.constant 0 : index
    %40 = vector.load %arg4[%c0_38, %c1_39, %c0_40, %c0_41] : memref<4x2x128x128xbf16, #tpu.memory_space<vmem>>, vector<1x1x128x128xbf16>
    %41 = vector.shape_cast %40 : vector<1x1x128x128xbf16> to vector<128x128xbf16>
    %cst_42 = arith.constant dense<0.000000e+00> : vector<128x128xf32>
    %42 = tpu.matmul %30, %41, %cst_42 {dimension_numbers = #tpu.dot_dimension_numbers<[1], [0], [0], [1], [0, 0, 1, 1], [], []>} : vector<128x128xbf16>, vector<128x128xbf16>, vector<128x128xf32> -> vector<128x128xf32>
    %43 = arith.addf %39, %42 : vector<128x128xf32>
    %cst_43 = arith.constant 0.000000e+00 : f32
    %44 = vector.broadcast %cst_43 : f32 to vector<128x128xf32>
    %45 = arith.maximumf %43, %44 : vector<128x128xf32>
    %46 = arith.addf %45, %13 : vector<128x128xf32>
    %cst_44 = arith.constant 0.000000e+00 : f32
    %47 = vector.broadcast %cst_44 : f32 to vector<128x128xf32>
    %48 = arith.maximumf %46, %47 : vector<128x128xf32>
    %c8_45 = arith.constant 8 : index
    %c0_46 = arith.constant 0 : index
    %49 = vector.load %arg9[%c8_45, %c0_46] : memref<136x128xf32, #tpu.memory_space<vmem>>, vector<128x128xf32>
    tpu.vector_store %arg9[%c8_45, %c0_46], %48 {strides = array<i32>} : memref<136x128xf32, #tpu.memory_space<vmem>>, vector<128x128xf32>,
    %50 = arith.truncf %48 : vector<128x128xf32> to vector<128x128xbf16>
    %c1_47 = arith.constant 1 : index
    %c0_48 = arith.constant 0 : index
    %c0_49 = arith.constant 0 : index
    %51 = vector.load %arg3[%c1_47, %c0_48, %c0_49] : memref<4x1x128xf32, #tpu.memory_space<vmem>>, vector<1x1x128xf32>
    %52 = vector.shape_cast %51 : vector<1x1x128xf32> to vector<1x128xf32>
    %c6 = arith.constant 6 : index
    %c0_50 = arith.constant 0 : index
    %53 = vector.load %arg9[%c6, %c0_50] : memref<136x128xf32, #tpu.memory_space<vmem>>, vector<128x128xf32>
    %54 = arith.truncf %53 : vector<128x128xf32> to vector<128x128xbf16>
    %c1_51 = arith.constant 1 : index
    %c0_52 = arith.constant 0 : index
    %c0_53 = arith.constant 0 : index
    %c0_54 = arith.constant 0 : index
    %55 = vector.load %arg2[%c1_51, %c0_52, %c0_53, %c0_54] : memref<4x2x128x128xbf16, #tpu.memory_space<vmem>>, vector<1x1x128x128xbf16>
    %56 = vector.shape_cast %55 : vector<1x1x128x128xbf16> to vector<128x128xbf16>
    %cst_55 = arith.constant dense<0.000000e+00> : vector<128x128xf32>
    %57 = tpu.matmul %54, %56, %cst_55 {dimension_numbers = #tpu.dot_dimension_numbers<[1], [0], [0], [1], [0, 0, 1, 1], [], []>} : vector<128x128xbf16>, vector<128x128xbf16>, vector<128x128xf32> -> vector<128x128xf32>
    %58 = vector.broadcast %52 : vector<1x128xf32> to vector<128x128xf32>
    %59 = arith.addf %58, %57 : vector<128x128xf32>
    %c1_56 = arith.constant 1 : index
    %c1_57 = arith.constant 1 : index
    %c0_58 = arith.constant 0 : index
    %c0_59 = arith.constant 0 : index
    %60 = vector.load %arg2[%c1_56, %c1_57, %c0_58, %c0_59] : memref<4x2x128x128xbf16, #tpu.memory_space<vmem>>, vector<1x1x128x128xbf16>
    %61 = vector.shape_cast %60 : vector<1x1x128x128xbf16> to vector<128x128xbf16>
    %cst_60 = arith.constant dense<0.000000e+00> : vector<128x128xf32>
    %62 = tpu.matmul %50, %61, %cst_60 {dimension_numbers = #tpu.dot_dimension_numbers<[1], [0], [0], [1], [0, 0, 1, 1], [], []>} : vector<128x128xbf16>, vector<128x128xbf16>, vector<128x128xf32> -> vector<128x128xf32>
    %63 = arith.addf %59, %62 : vector<128x128xf32>
    %cst_61 = arith.constant 0.000000e+00 : f32
    %64 = vector.broadcast %cst_61 : f32 to vector<128x128xf32>
    %65 = arith.maximumf %63, %64 : vector<128x128xf32>
    %c8_62 = arith.constant 8 : index
    %c0_63 = arith.constant 0 : index
    %66 = vector.load %arg9[%c8_62, %c0_63] : memref<136x128xf32, #tpu.memory_space<vmem>>, vector<128x128xf32>
    tpu.vector_store %arg9[%c8_62, %c0_63], %65 {strides = array<i32>} : memref<136x128xf32, #tpu.memory_space<vmem>>, vector<128x128xf32>,
    %67 = arith.truncf %65 : vector<128x128xf32> to vector<128x128xbf16>
    %c1_64 = arith.constant 1 : index
    %c0_65 = arith.constant 0 : index
    %c0_66 = arith.constant 0 : index
    %68 = vector.load %arg5[%c1_64, %c0_65, %c0_66] : memref<4x1x128xf32, #tpu.memory_space<vmem>>, vector<1x1x128xf32>
    %69 = vector.shape_cast %68 : vector<1x1x128xf32> to vector<1x128xf32>
    %c6_67 = arith.constant 6 : index
    %c0_68 = arith.constant 0 : index
    %70 = vector.load %arg9[%c6_67, %c0_68] : memref<136x128xf32, #tpu.memory_space<vmem>>, vector<128x128xf32>
    %71 = arith.truncf %70 : vector<128x128xf32> to vector<128x128xbf16>
    %c1_69 = arith.constant 1 : index
    %c0_70 = arith.constant 0 : index
    %c0_71 = arith.constant 0 : index
    %c0_72 = arith.constant 0 : index
    %72 = vector.load %arg4[%c1_69, %c0_70, %c0_71, %c0_72] : memref<4x2x128x128xbf16, #tpu.memory_space<vmem>>, vector<1x1x128x128xbf16>
    %73 = vector.shape_cast %72 : vector<1x1x128x128xbf16> to vector<128x128xbf16>
    %cst_73 = arith.constant dense<0.000000e+00> : vector<128x128xf32>
    %74 = tpu.matmul %71, %73, %cst_73 {dimension_numbers = #tpu.dot_dimension_numbers<[1], [0], [0], [1], [0, 0, 1, 1], [], []>} : vector<128x128xbf16>, vector<128x128xbf16>, vector<128x128xf32> -> vector<128x128xf32>
    %75 = vector.broadcast %69 : vector<1x128xf32> to vector<128x128xf32>
    %76 = arith.addf %75, %74 : vector<128x128xf32>
    %c1_74 = arith.constant 1 : index
    %c1_75 = arith.constant 1 : index
    %c0_76 = arith.constant 0 : index
    %c0_77 = arith.constant 0 : index
    %77 = vector.load %arg4[%c1_74, %c1_75, %c0_76, %c0_77] : memref<4x2x128x128xbf16, #tpu.memory_space<vmem>>, vector<1x1x128x128xbf16>
    %78 = vector.shape_cast %77 : vector<1x1x128x128xbf16> to vector<128x128xbf16>
    %cst_78 = arith.constant dense<0.000000e+00> : vector<128x128xf32>
    %79 = tpu.matmul %67, %78, %cst_78 {dimension_numbers = #tpu.dot_dimension_numbers<[1], [0], [0], [1], [0, 0, 1, 1], [], []>} : vector<128x128xbf16>, vector<128x128xbf16>, vector<128x128xf32> -> vector<128x128xf32>
    %80 = arith.addf %76, %79 : vector<128x128xf32>
    %cst_79 = arith.constant 0.000000e+00 : f32
    %81 = vector.broadcast %cst_79 : f32 to vector<128x128xf32>
    %82 = arith.maximumf %80, %81 : vector<128x128xf32>
    %83 = arith.addf %82, %48 : vector<128x128xf32>
    %cst_80 = arith.constant 0.000000e+00 : f32
    %84 = vector.broadcast %cst_80 : f32 to vector<128x128xf32>
    %85 = arith.maximumf %83, %84 : vector<128x128xf32>
    %c8_81 = arith.constant 8 : index
    %c0_82 = arith.constant 0 : index
    %86 = vector.load %arg9[%c8_81, %c0_82] : memref<136x128xf32, #tpu.memory_space<vmem>>, vector<128x128xf32>
    tpu.vector_store %arg9[%c8_81, %c0_82], %85 {strides = array<i32>} : memref<136x128xf32, #tpu.memory_space<vmem>>, vector<128x128xf32>,
    %87 = arith.truncf %85 : vector<128x128xf32> to vector<128x128xbf16>
    %c2 = arith.constant 2 : index
    %c0_83 = arith.constant 0 : index
    %c0_84 = arith.constant 0 : index
    %88 = vector.load %arg6[%c2, %c0_83, %c0_84] : memref<4x128x128xbf16, #tpu.memory_space<vmem>>, vector<1x128x128xbf16>
    %89 = vector.shape_cast %88 : vector<1x128x128xbf16> to vector<128x128xbf16>
    %cst_85 = arith.constant dense<0.000000e+00> : vector<128x128xf32>
    %90 = tpu.matmul %87, %89, %cst_85 {dimension_numbers = #tpu.dot_dimension_numbers<[1], [0], [0], [1], [0, 0, 1, 1], [], []>} : vector<128x128xbf16>, vector<128x128xbf16>, vector<128x128xf32> -> vector<128x128xf32>
    %c2_86 = arith.constant 2 : index
    %c0_87 = arith.constant 0 : index
    %c0_88 = arith.constant 0 : index
    %91 = vector.load %arg7[%c2_86, %c0_87, %c0_88] : memref<4x1x128xf32, #tpu.memory_space<vmem>>, vector<1x1x128xf32>
    %92 = vector.shape_cast %91 : vector<1x1x128xf32> to vector<1x128xf32>
    %93 = vector.broadcast %92 : vector<1x128xf32> to vector<128x128xf32>
    %94 = arith.addf %90, %93 : vector<128x128xf32>
    %c2_89 = arith.constant 2 : index
    %c0_90 = arith.constant 0 : index
    %c0_91 = arith.constant 0 : index
    %95 = vector.load %arg3[%c2_89, %c0_90, %c0_91] : memref<4x1x128xf32, #tpu.memory_space<vmem>>, vector<1x1x128xf32>
    %96 = vector.shape_cast %95 : vector<1x1x128xf32> to vector<1x128xf32>
    %c4 = arith.constant 4 : index
    %c0_92 = arith.constant 0 : index
    %97 = vector.load %arg9[%c4, %c0_92] : memref<136x128xf32, #tpu.memory_space<vmem>>, vector<128x128xf32>
    %98 = arith.truncf %97 : vector<128x128xf32> to vector<128x128xbf16>
    %c2_93 = arith.constant 2 : index
    %c0_94 = arith.constant 0 : index
    %c0_95 = arith.constant 0 : index
    %c0_96 = arith.constant 0 : index
    %99 = vector.load %arg2[%c2_93, %c0_94, %c0_95, %c0_96] : memref<4x2x128x128xbf16, #tpu.memory_space<vmem>>, vector<1x1x128x128xbf16>
    %100 = vector.shape_cast %99 : vector<1x1x128x128xbf16> to vector<128x128xbf16>
    %cst_97 = arith.constant dense<0.000000e+00> : vector<128x128xf32>
    %101 = tpu.matmul %98, %100, %cst_97 {dimension_numbers = #tpu.dot_dimension_numbers<[1], [0], [0], [1], [0, 0, 1, 1], [], []>} : vector<128x128xbf16>, vector<128x128xbf16>, vector<128x128xf32> -> vector<128x128xf32>
    %102 = vector.broadcast %96 : vector<1x128xf32> to vector<128x128xf32>
    %103 = arith.addf %102, %101 : vector<128x128xf32>
    %c2_98 = arith.constant 2 : index
    %c1_99 = arith.constant 1 : index
    %c0_100 = arith.constant 0 : index
    %c0_101 = arith.constant 0 : index
    %104 = vector.load %arg2[%c2_98, %c1_99, %c0_100, %c0_101] : memref<4x2x128x128xbf16, #tpu.memory_space<vmem>>, vector<1x1x128x128xbf16>
    %105 = vector.shape_cast %104 : vector<1x1x128x128xbf16> to vector<128x128xbf16>
    %cst_102 = arith.constant dense<0.000000e+00> : vector<128x128xf32>
    %106 = tpu.matmul %87, %105, %cst_102 {dimension_numbers = #tpu.dot_dimension_numbers<[1], [0], [0], [1], [0, 0, 1, 1], [], []>} : vector<128x128xbf16>, vector<128x128xbf16>, vector<128x128xf32> -> vector<128x128xf32>
    %107 = arith.addf %103, %106 : vector<128x128xf32>
    %cst_103 = arith.constant 0.000000e+00 : f32
    %108 = vector.broadcast %cst_103 : f32 to vector<128x128xf32>
    %109 = arith.maximumf %107, %108 : vector<128x128xf32>
    %c8_104 = arith.constant 8 : index
    %c0_105 = arith.constant 0 : index
    %110 = vector.load %arg9[%c8_104, %c0_105] : memref<136x128xf32, #tpu.memory_space<vmem>>, vector<128x128xf32>
    tpu.vector_store %arg9[%c8_104, %c0_105], %109 {strides = array<i32>} : memref<136x128xf32, #tpu.memory_space<vmem>>, vector<128x128xf32>,
    %111 = arith.truncf %109 : vector<128x128xf32> to vector<128x128xbf16>
    %c2_106 = arith.constant 2 : index
    %c0_107 = arith.constant 0 : index
    %c0_108 = arith.constant 0 : index
    %112 = vector.load %arg5[%c2_106, %c0_107, %c0_108] : memref<4x1x128xf32, #tpu.memory_space<vmem>>, vector<1x1x128xf32>
    %113 = vector.shape_cast %112 : vector<1x1x128xf32> to vector<1x128xf32>
    %c4_109 = arith.constant 4 : index
    %c0_110 = arith.constant 0 : index
    %114 = vector.load %arg9[%c4_109, %c0_110] : memref<136x128xf32, #tpu.memory_space<vmem>>, vector<128x128xf32>
    %115 = arith.truncf %114 : vector<128x128xf32> to vector<128x128xbf16>
    %c2_111 = arith.constant 2 : index
    %c0_112 = arith.constant 0 : index
    %c0_113 = arith.constant 0 : index
    %c0_114 = arith.constant 0 : index
    %116 = vector.load %arg4[%c2_111, %c0_112, %c0_113, %c0_114] : memref<4x2x128x128xbf16, #tpu.memory_space<vmem>>, vector<1x1x128x128xbf16>
    %117 = vector.shape_cast %116 : vector<1x1x128x128xbf16> to vector<128x128xbf16>
    %cst_115 = arith.constant dense<0.000000e+00> : vector<128x128xf32>
    %118 = tpu.matmul %115, %117, %cst_115 {dimension_numbers = #tpu.dot_dimension_numbers<[1], [0], [0], [1], [0, 0, 1, 1], [], []>} : vector<128x128xbf16>, vector<128x128xbf16>, vector<128x128xf32> -> vector<128x128xf32>
    %119 = vector.broadcast %113 : vector<1x128xf32> to vector<128x128xf32>
    %120 = arith.addf %119, %118 : vector<128x128xf32>
    %c2_116 = arith.constant 2 : index
    %c1_117 = arith.constant 1 : index
    %c0_118 = arith.constant 0 : index
    %c0_119 = arith.constant 0 : index
    %121 = vector.load %arg4[%c2_116, %c1_117, %c0_118, %c0_119] : memref<4x2x128x128xbf16, #tpu.memory_space<vmem>>, vector<1x1x128x128xbf16>
    %122 = vector.shape_cast %121 : vector<1x1x128x128xbf16> to vector<128x128xbf16>
    %cst_120 = arith.constant dense<0.000000e+00> : vector<128x128xf32>
    %123 = tpu.matmul %111, %122, %cst_120 {dimension_numbers = #tpu.dot_dimension_numbers<[1], [0], [0], [1], [0, 0, 1, 1], [], []>} : vector<128x128xbf16>, vector<128x128xbf16>, vector<128x128xf32> -> vector<128x128xf32>
    %124 = arith.addf %120, %123 : vector<128x128xf32>
    %cst_121 = arith.constant 0.000000e+00 : f32
    %125 = vector.broadcast %cst_121 : f32 to vector<128x128xf32>
    %126 = arith.maximumf %124, %125 : vector<128x128xf32>
    %127 = arith.addf %126, %94 : vector<128x128xf32>
    %cst_122 = arith.constant 0.000000e+00 : f32
    %128 = vector.broadcast %cst_122 : f32 to vector<128x128xf32>
    %129 = arith.maximumf %127, %128 : vector<128x128xf32>
    %c8_123 = arith.constant 8 : index
    %c0_124 = arith.constant 0 : index
    %130 = vector.load %arg9[%c8_123, %c0_124] : memref<136x128xf32, #tpu.memory_space<vmem>>, vector<128x128xf32>
    tpu.vector_store %arg9[%c8_123, %c0_124], %129 {strides = array<i32>} : memref<136x128xf32, #tpu.memory_space<vmem>>, vector<128x128xf32>,
    %131 = arith.truncf %129 : vector<128x128xf32> to vector<128x128xbf16>
    %c3 = arith.constant 3 : index
    %c0_125 = arith.constant 0 : index
    %c0_126 = arith.constant 0 : index
    %132 = vector.load %arg6[%c3, %c0_125, %c0_126] : memref<4x128x128xbf16, #tpu.memory_space<vmem>>, vector<1x128x128xbf16>
    %133 = vector.shape_cast %132 : vector<1x128x128xbf16> to vector<128x128xbf16>
    %cst_127 = arith.constant dense<0.000000e+00> : vector<128x128xf32>
    %134 = tpu.matmul %131, %133, %cst_127 {dimension_numbers = #tpu.dot_dimension_numbers<[1], [0], [0], [1], [0, 0, 1, 1], [], []>} : vector<128x128xbf16>, vector<128x128xbf16>, vector<128x128xf32> -> vector<128x128xf32>
    %c3_128 = arith.constant 3 : index
    %c0_129 = arith.constant 0 : index
    %c0_130 = arith.constant 0 : index
    %135 = vector.load %arg7[%c3_128, %c0_129, %c0_130] : memref<4x1x128xf32, #tpu.memory_space<vmem>>, vector<1x1x128xf32>
    %136 = vector.shape_cast %135 : vector<1x1x128xf32> to vector<1x128xf32>
    %137 = vector.broadcast %136 : vector<1x128xf32> to vector<128x128xf32>
    %138 = arith.addf %134, %137 : vector<128x128xf32>
    %c3_131 = arith.constant 3 : index
    %c0_132 = arith.constant 0 : index
    %c0_133 = arith.constant 0 : index
    %139 = vector.load %arg3[%c3_131, %c0_132, %c0_133] : memref<4x1x128xf32, #tpu.memory_space<vmem>>, vector<1x1x128xf32>
    %140 = vector.shape_cast %139 : vector<1x1x128xf32> to vector<1x128xf32>
    %c0_134 = arith.constant 0 : index
    %c0_135 = arith.constant 0 : index
    %141 = vector.load %arg9[%c0_134, %c0_135] : memref<136x128xf32, #tpu.memory_space<vmem>>, vector<128x128xf32>
    %142 = arith.truncf %141 : vector<128x128xf32> to vector<128x128xbf16>
    %c3_136 = arith.constant 3 : index
    %c0_137 = arith.constant 0 : index
    %c0_138 = arith.constant 0 : index
    %c0_139 = arith.constant 0 : index
    %143 = vector.load %arg2[%c3_136, %c0_137, %c0_138, %c0_139] : memref<4x2x128x128xbf16, #tpu.memory_space<vmem>>, vector<1x1x128x128xbf16>
    %144 = vector.shape_cast %143 : vector<1x1x128x128xbf16> to vector<128x128xbf16>
    %cst_140 = arith.constant dense<0.000000e+00> : vector<128x128xf32>
    %145 = tpu.matmul %142, %144, %cst_140 {dimension_numbers = #tpu.dot_dimension_numbers<[1], [0], [0], [1], [0, 0, 1, 1], [], []>} : vector<128x128xbf16>, vector<128x128xbf16>, vector<128x128xf32> -> vector<128x128xf32>
    %146 = vector.broadcast %140 : vector<1x128xf32> to vector<128x128xf32>
    %147 = arith.addf %146, %145 : vector<128x128xf32>
    %c3_141 = arith.constant 3 : index
    %c1_142 = arith.constant 1 : index
    %c0_143 = arith.constant 0 : index
    %c0_144 = arith.constant 0 : index
    %148 = vector.load %arg2[%c3_141, %c1_142, %c0_143, %c0_144] : memref<4x2x128x128xbf16, #tpu.memory_space<vmem>>, vector<1x1x128x128xbf16>
    %149 = vector.shape_cast %148 : vector<1x1x128x128xbf16> to vector<128x128xbf16>
    %cst_145 = arith.constant dense<0.000000e+00> : vector<128x128xf32>
    %150 = tpu.matmul %131, %149, %cst_145 {dimension_numbers = #tpu.dot_dimension_numbers<[1], [0], [0], [1], [0, 0, 1, 1], [], []>} : vector<128x128xbf16>, vector<128x128xbf16>, vector<128x128xf32> -> vector<128x128xf32>
    %151 = arith.addf %147, %150 : vector<128x128xf32>
    %cst_146 = arith.constant 0.000000e+00 : f32
    %152 = vector.broadcast %cst_146 : f32 to vector<128x128xf32>
    %153 = arith.maximumf %151, %152 : vector<128x128xf32>
    %c8_147 = arith.constant 8 : index
    %c0_148 = arith.constant 0 : index
    %154 = vector.load %arg9[%c8_147, %c0_148] : memref<136x128xf32, #tpu.memory_space<vmem>>, vector<128x128xf32>
    tpu.vector_store %arg9[%c8_147, %c0_148], %153 {strides = array<i32>} : memref<136x128xf32, #tpu.memory_space<vmem>>, vector<128x128xf32>,
    %155 = arith.truncf %153 : vector<128x128xf32> to vector<128x128xbf16>
    %c3_149 = arith.constant 3 : index
    %c0_150 = arith.constant 0 : index
    %c0_151 = arith.constant 0 : index
    %156 = vector.load %arg5[%c3_149, %c0_150, %c0_151] : memref<4x1x128xf32, #tpu.memory_space<vmem>>, vector<1x1x128xf32>
    %157 = vector.shape_cast %156 : vector<1x1x128xf32> to vector<1x128xf32>
    %c0_152 = arith.constant 0 : index
    %c0_153 = arith.constant 0 : index
    %158 = vector.load %arg9[%c0_152, %c0_153] : memref<136x128xf32, #tpu.memory_space<vmem>>, vector<128x128xf32>
    %159 = arith.truncf %158 : vector<128x128xf32> to vector<128x128xbf16>
    %c3_154 = arith.constant 3 : index
    %c0_155 = arith.constant 0 : index
    %c0_156 = arith.constant 0 : index
    %c0_157 = arith.constant 0 : index
    %160 = vector.load %arg4[%c3_154, %c0_155, %c0_156, %c0_157] : memref<4x2x128x128xbf16, #tpu.memory_space<vmem>>, vector<1x1x128x128xbf16>
    %161 = vector.shape_cast %160 : vector<1x1x128x128xbf16> to vector<128x128xbf16>
    %cst_158 = arith.constant dense<0.000000e+00> : vector<128x128xf32>
    %162 = tpu.matmul %159, %161, %cst_158 {dimension_numbers = #tpu.dot_dimension_numbers<[1], [0], [0], [1], [0, 0, 1, 1], [], []>} : vector<128x128xbf16>, vector<128x128xbf16>, vector<128x128xf32> -> vector<128x128xf32>
    %163 = vector.broadcast %157 : vector<1x128xf32> to vector<128x128xf32>
    %164 = arith.addf %163, %162 : vector<128x128xf32>
    %c3_159 = arith.constant 3 : index
    %c1_160 = arith.constant 1 : index
    %c0_161 = arith.constant 0 : index
    %c0_162 = arith.constant 0 : index
    %165 = vector.load %arg4[%c3_159, %c1_160, %c0_161, %c0_162] : memref<4x2x128x128xbf16, #tpu.memory_space<vmem>>, vector<1x1x128x128xbf16>
    %166 = vector.shape_cast %165 : vector<1x1x128x128xbf16> to vector<128x128xbf16>
    %cst_163 = arith.constant dense<0.000000e+00> : vector<128x128xf32>
    %167 = tpu.matmul %155, %166, %cst_163 {dimension_numbers = #tpu.dot_dimension_numbers<[1], [0], [0], [1], [0, 0, 1, 1], [], []>} : vector<128x128xbf16>, vector<128x128xbf16>, vector<128x128xf32> -> vector<128x128xf32>
    %168 = arith.addf %164, %167 : vector<128x128xf32>
    %cst_164 = arith.constant 0.000000e+00 : f32
    %169 = vector.broadcast %cst_164 : f32 to vector<128x128xf32>
    %170 = arith.maximumf %168, %169 : vector<128x128xf32>
    %171 = arith.addf %170, %138 : vector<128x128xf32>
    %cst_165 = arith.constant 0.000000e+00 : f32
    %172 = vector.broadcast %cst_165 : f32 to vector<128x128xf32>
    %173 = arith.maximumf %171, %172 : vector<128x128xf32>
    %c0_166 = arith.constant 0 : index
    %c0_167 = arith.constant 0 : index
    %c0_168 = arith.constant 0 : index
    %174 = vector.load %arg8[%c0_166, %c0_167, %c0_168] : memref<1x128x128xf32, #tpu.memory_space<vmem>>, vector<1x128x128xf32>
    %175 = vector.shape_cast %174 : vector<1x128x128xf32> to vector<128x128xf32>
    %176 = vector.shape_cast %173 : vector<128x128xf32> to vector<1x128x128xf32>
    tpu.vector_store %arg8[%c0_166, %c0_167, %c0_168], %176 {strides = array<i32>} : memref<1x128x128xf32, #tpu.memory_space<vmem>>, vector<1x128x128xf32>,
    return
  }
  func.func @transform_0(%arg0: i32) -> (i32, i32, i32) {
    %c0_i32 = arith.constant 0 : i32
    %c0_i32_0 = arith.constant 0 : i32
    %c0_i32_1 = arith.constant 0 : i32
    return %arg0, %c0_i32, %c0_i32_0 : i32, i32, i32
  }
  func.func @transform_1(%arg0: i32) -> (i32, i32, i32, i32) {
    %c0_i32 = arith.constant 0 : i32
    %c0_i32_0 = arith.constant 0 : i32
    %c0_i32_1 = arith.constant 0 : i32
    %c0_i32_2 = arith.constant 0 : i32
    %c0_i32_3 = arith.constant 0 : i32
    return %c0_i32, %c0_i32_0, %c0_i32_1, %c0_i32_2 : i32, i32, i32, i32
  }
  func.func @transform_2(%arg0: i32) -> (i32, i32, i32) {
    %c0_i32 = arith.constant 0 : i32
    %c0_i32_0 = arith.constant 0 : i32
    %c0_i32_1 = arith.constant 0 : i32
    %c0_i32_2 = arith.constant 0 : i32
    return %c0_i32, %c0_i32_0, %c0_i32_1 : i32, i32, i32
  }
  func.func @transform_3(%arg0: i32) -> (i32, i32, i32, i32) {
    %c0_i32 = arith.constant 0 : i32
    %c0_i32_0 = arith.constant 0 : i32
    %c0_i32_1 = arith.constant 0 : i32
    %c0_i32_2 = arith.constant 0 : i32
    %c0_i32_3 = arith.constant 0 : i32
    return %c0_i32, %c0_i32_0, %c0_i32_1, %c0_i32_2 : i32, i32, i32, i32
  }
  func.func @transform_4(%arg0: i32) -> (i32, i32, i32) {
    %c0_i32 = arith.constant 0 : i32
    %c0_i32_0 = arith.constant 0 : i32
    %c0_i32_1 = arith.constant 0 : i32
    %c0_i32_2 = arith.constant 0 : i32
    return %c0_i32, %c0_i32_0, %c0_i32_1 : i32, i32, i32
  }
  func.func @transform_5(%arg0: i32) -> (i32, i32, i32) {
    %c0_i32 = arith.constant 0 : i32
    %c0_i32_0 = arith.constant 0 : i32
    %c0_i32_1 = arith.constant 0 : i32
    %c0_i32_2 = arith.constant 0 : i32
    return %c0_i32, %c0_i32_0, %c0_i32_1 : i32, i32, i32
  }
  func.func @transform_6(%arg0: i32) -> (i32, i32, i32) {
    %c0_i32 = arith.constant 0 : i32
    %c0_i32_0 = arith.constant 0 : i32
    %c0_i32_1 = arith.constant 0 : i32
    %c0_i32_2 = arith.constant 0 : i32
    return %c0_i32, %c0_i32_0, %c0_i32_1 : i32, i32, i32
  }
  func.func @transform_7(%arg0: i32) -> (i32, i32, i32) {
    %c0_i32 = arith.constant 0 : i32
    %c0_i32_0 = arith.constant 0 : i32
    %c0_i32_1 = arith.constant 0 : i32
    return %arg0, %c0_i32, %c0_i32_0 : i32, i32, i32
  }
}

</mosaic_0001>

<bundles_post_ra>
// kernel: tpu_custom_call.1
= control target key start
LH: loop header
LB: loop body
LE: loop exit
PB: predicated region body
PF: predicated region fallthrough
CT: control target
= control target key end

     0   :  { %12 = vsyncpa [#allocation4], 0  ;;  %s7494_s0 = inlined_call_operand.hbm [shape: bf16[2,128,128], index: 0, kind: input, shape index: {}]   ;;  %s7495_s1 = inlined_call_operand.hbm [shape: bf16[4,2,128,128], index: 1, kind: input, shape index: {}]   ;;  %s7496_s2 = inlined_call_operand.vmem [shape: f32[4,1,128], index: 2, kind: input, shape index: {}]   ;;  %s7497_s3 = inlined_call_operand.hbm [shape: bf16[4,2,128,128], index: 3, kind: input, shape index: {}]   ;;  %s7498_s4 = inlined_call_operand.vmem [shape: f32[4,1,128], index: 4, kind: input, shape index: {}]   ;;  %s7499_s5 = inlined_call_operand.hbm [shape: bf16[4,128,128], index: 5, kind: input, shape index: {}]   ;;  %s7500_s6 = inlined_call_operand.vmem [shape: f32[4,1,128], index: 6, kind: input, shape index: {}]   ;;  %s7501_s7 = inlined_call_operand.hbm [shape: f32[2,128,128], index: 7, kind: output, shape index: {}]  }
   0x1   :  { %14 = vsyncpa [#allocation4 + $0x1], 0 }
   0x2   :  { %15 = vsyncpa [#allocation7], 0 }
   0x3   :  { %16 = vsyncpa [#allocation10], 0 }
   0x4   :  { %17 = vsyncpa [#allocation5], 0 }
   0x5   :  { %19 = vsyncpa [#allocation5 + $0x1], 0  ;;  %s6479_s24 = smov 0   ;;  %s6481_s25 = smov 0  }
   0x6   :  { %s6483_s26 = smov 0   ;;  %s6485_s27 = smov 0  }
   0x7 LB: > { %s6500_s28 = sadd.s32 4294967295, %s6427_s27   ;;  %s4603_s29 = sadd.s32 4294967294, %s6427_s27   ;;  %s6427_s27 = sphi %s6485_s27, %s7527_s27   ;;  %s6423_s26 = sphi %s6483_s26, %s7526_s26   ;;  %s6419_s25 = sphi %s6481_s25, %s7525_s25   ;;  %s6415_s24 = sphi %s6479_s24, %s7524_s24  }
   0x8   : > { %p45_p0 = scmp.ne.s32.totalorder %s6419_s25, %s6415_s24  ;;  %p7502_p1 = scmp.eq.s32.totalorder %s6500_s28, 0 }
   0x9   : > { %p201_p3 = scmp.eq.s32.totalorder %s4603_s29, 1  ;;  %p4604_p5 = scmp.ge.s32.totalorder %s6427_s27, 1 }
   0xa   : > { %p6509_p4 = por %p7502_p1, %p45_p0  ;;  %p208_p7 = scmp.lt.s32.totalorder %s6427_s27, 3 }
   0xb   : > { %p6514_p6 = por %p201_p3, %p45_p0  ;;  %s6429_s10 = smov [#allocation6]  }
   0xc   : > { %s7506_s30 = scalar_select %p6509_p4, 1, 0 }
   0xd   : > { %s7507_s8 = scalar_select %p6514_p6, 1, 0 }
   0xe   : > { %p6519_p8 = pnand %p4604_p5, %p208_p7  ;;  %s220_s11 = sshll.u32 %s6429_s10, 4  ;;  %s6523_s11 = int_to_ptr.vmem [resolvable:$true] %s220_s11 }
   0xf   : > { %7508 = sst [smem:[#allocation16_spill]] %s7507_s8  ;;  %s6430_s13 = smov [#allocation8]  }
  0x10   : > { %s7509_s9 = scalar_select %p6519_p8, 1, 0 }
  0x11   : > { %p6004_p9 = pneg %p6519_p8  ;;  %s236_s14 = sshll.u32 %s6430_s13, 4  ;;  %s6534_s14 = int_to_ptr.vmem [resolvable:$true] %s236_s14 }
  0x12   : > { %s6431_s15 = smov [#allocation9]   ;;  %s6239_s19 = scalar_lea.hbm %s7495_s1, 8192 }
  0x13   : > { %p6530_p11 = pnand %p6004_p9, %p7502_p1  ;;  %s6536_s16 = sshll.u32 %s6431_s15, 4  ;;  %s253_s16 = int_to_ptr.vmem [resolvable:$true] %s6536_s16 }
  0x14   : > { %p6240_p12 = scmp.ne.s32.totalorder %s7495_s1, %s6239_s19  ;;  %p6246_p5 = scmp.lt.u32.totalorder %s6239_s19, %s7495_s1 }
  0x15   : > { %p6546_p13 = pneg %p6530_p11 }
  0x17   : > { %p6242_p0 = pnand %p6546_p13, %p6240_p12 }
  0x19   : > { %p6243_p3 = pneg %p6242_p0 }
  0x1b   : > { %p6248_p7 = pnand %p6246_p5, %p6243_p3 }
  0x1d   : > { %6251 = shalt.err (!%p6248_p7)
}
  0x1e   : > { %s6252_s10 = scalar_lea.vmem %s6523_s11, 8192  ;;  %p6260_p2 = scmp.lt.s32.totalorder %s6523_s11, %s6523_s11 }
  0x1f   : > { %p6253_p9 = scmp.ne.s32.totalorder %s6523_s11, %s6252_s10  ;;  %p6261_p6 = scmp.lt.s32.totalorder %s6252_s10, %s6252_s10 }
  0x21   : > { %p6255_p10 = pnand %p6253_p9, %p6546_p13  ;;  %p6262_p12 = por %p6261_p6, %p6260_p2 }
  0x23   : > { %p6256_p1 = pneg %p6255_p10 }
  0x25   : > { %p6263_p0 = pnand %p6262_p12, %p6256_p1 }
  0x27   : > { %6266 = shalt.err (!%p6263_p0)
}
  0x28   : > { %s6432_s13 = smov 64   ;;  %s6433_s15 = smov 4  }
  0x29   : > { %6007 = dma.hbm_to_vmem [thread:$0]  (!%p6530_p11), %s7495_s1, 8192, %s6523_s11, [#allocation7], %s6432_s13, %s6432_s13, %s6433_s15  }
  0x2a   : > { %s6267_s21 = scalar_lea.hbm %s7497_s3, 8192 }
  0x2b   : > { %p6268_p1 = scmp.ne.s32.totalorder %s7497_s3, %s6267_s21  ;;  %p6274_p10 = scmp.lt.u32.totalorder %s6267_s21, %s7497_s3 }
  0x2d   : > { %p6270_p2 = pnand %p6268_p1, %p6546_p13 }
  0x2f   : > { %p6271_p6 = pneg %p6270_p2 }
  0x31   : > { %p6276_p3 = pnand %p6274_p10, %p6271_p6 }
  0x33   : > { %6279 = shalt.err (!%p6276_p3)
}
  0x34   : > { %s6280_s11 = scalar_lea.vmem %s6534_s14, 8192  ;;  %p6288_p12 = scmp.lt.s32.totalorder %s6534_s14, %s6534_s14 }
  0x35   : > { %p6281_p5 = scmp.ne.s32.totalorder %s6534_s14, %s6280_s11  ;;  %p6289_p0 = scmp.lt.s32.totalorder %s6280_s11, %s6280_s11 }
  0x37   : > { %p6283_p7 = pnand %p6281_p5, %p6546_p13  ;;  %p6290_p1 = por %p6289_p0, %p6288_p12 }
  0x39   : > { %p6284_p9 = pneg %p6283_p7 }
  0x3b   : > { %p6291_p2 = pnand %p6290_p1, %p6284_p9 }
  0x3d   : > { %6294 = shalt.err (!%p6291_p2)
}
  0x3e   : > { %6010 = dma.hbm_to_vmem [thread:$0]  (!%p6530_p11), %s7497_s3, 8192, %s6534_s14, [#allocation7], %s6432_s13, %s6432_s13, %s6433_s15  }
  0x3f   : > { %s6295_s20 = scalar_lea.hbm %s7499_s5, 4096 }
  0x40   : > { %p6296_p6 = scmp.ne.s32.totalorder %s7499_s5, %s6295_s20  ;;  %p6302_p5 = scmp.lt.u32.totalorder %s6295_s20, %s7499_s5 }
  0x42   : > { %p6298_p10 = pnand %p6296_p6, %p6546_p13 }
  0x44   : > { %p6299_p3 = pneg %p6298_p10 }
  0x46   : > { %p6304_p7 = pnand %p6302_p5, %p6299_p3 }
  0x48   : > { %6307 = shalt.err (!%p6304_p7)
}
  0x49   : > { %s6308_s11 = scalar_lea.vmem %s253_s16, 4096  ;;  %p6316_p1 = scmp.lt.s32.totalorder %s253_s16, %s253_s16 }
  0x4a   : > { %p6309_p9 = scmp.ne.s32.totalorder %s253_s16, %s6308_s11  ;;  %p6317_p2 = scmp.lt.s32.totalorder %s6308_s11, %s6308_s11 }
  0x4c   : > { %p6311_p12 = pnand %p6309_p9, %p6546_p13  ;;  %p6318_p4 = por %p6317_p2, %p6316_p1 }
  0x4e   : > { %p6312_p0 = pneg %p6311_p12 }
  0x50   : > { %p6319_p8 = pnand %p6318_p4, %p6312_p0 }
  0x52   : > { %6322 = shalt.err (!%p6319_p8)
}
  0x53   : > { %6013 = dma.hbm_to_vmem [thread:$0]  (!%p6530_p11), %s7499_s5, 4096, %s253_s16, [#allocation10], %s6432_s13, %s6432_s13, %s6433_s15  }
  0x54   : > { %s6619_s22 = sadd.s32 1, %s6427_s27   ;;  %s32_s17 = sadd.s32 1, %s6423_s26 }
  0x55   : > { %s29_s12 = ssub.s32 %s6427_s27, %s6619_s22  ;;  %p39_p8 = scmp.ne.s32.totalorder %s6423_s26, %s6419_s25 }
  0x56   : > { %p30_p4 = scmp.eq.s32.totalorder %s29_s12, 0  ;;  %p40_p13 = scmp.eq.s32.totalorder %s6427_s27, 0 }
  0x57   : > { %p6025_p6 = scmp.lt.s32.totalorder %s6427_s27, 2  ;;  %p7512_p3 = scmp.eq.s32.totalorder %s6500_s28, 1 }
  0x58   : > { %s6629_s18 = scalar_select %p30_p4, %s6423_s26, %s32_s17  }
  0x59   : > { %p41_p10 = por %p40_p13, %p39_p8  ;;  %p6633_p5 = por %p7512_p3, %p39_p8 }
  0x5a   : > { %s269_s20 = sand.u32 1, %s6423_s26   ;;  %s4802_s21 = sshll.u32 %s6427_s27, 10 }
  0x5b   : > { %s4609_s16 = sshll.u32 %s269_s20, 6  ;;  %s6642_s10 = scalar_lea.hbm %s7494_s0, %s4802_s21 }
  0x5c   : > { %s273_s11 = scalar_lea.vmem [#allocation3], %s4609_s16  ;;  %p6644_p11 = pnand %p6025_p6, %p41_p10 }
  0x5d   : > { %s280_s14 = sshll.u32 %s273_s11, 4  ;;  %s6650_s12 = scalar_lea.sflag [#allocation4], %s269_s20  ;;  %s6648_s14 = int_to_ptr.vmem [resolvable:$true] %s280_s14 }
  0x5e   : > { %s6323_s17 = scalar_lea.hbm %s6642_s10, 1024  ;;  %p6325_p9 = pneg %p6644_p11 }
  0x5f   : > { %p6324_p7 = scmp.ne.s32.totalorder %s6642_s10, %s6323_s17  ;;  %s6328_s23 = scalar_lea.hbm %s7494_s0, 2048 }
  0x60   : > { %p6329_p1 = scmp.lt.u32.totalorder %s6642_s10, %s7494_s0  ;;  %p6330_p2 = scmp.lt.u32.totalorder %s6328_s23, %s6323_s17 }
  0x61   : > { %p6326_p12 = pnand %p6325_p9, %p6324_p7  ;;  %p6332_p8 = scmp.lt.u32.totalorder %s6323_s17, %s6642_s10 }
  0x62   : > { %p6331_p4 = por %p6330_p2, %p6329_p1 }
  0x63   : > { %p6327_p0 = pneg %p6326_p12 }
  0x64   : > { %p6333_p13 = por %p6332_p8, %p6331_p4 }
  0x66   : > { %p6334_p6 = pnand %p6333_p13, %p6327_p0 }
  0x68   : > { %6337 = shalt.err (!%p6334_p6)
}
  0x69   : > { %s6338_s20 = scalar_lea.vmem %s6648_s14, 1024  ;;  %s6434_s21 = smov [#allocation3]  }
  0x6a   : > { %p6339_p10 = scmp.ne.s32.totalorder %s6648_s14, %s6338_s20  ;;  %s6343_s16 = sshll.u32 %s6434_s21, 4  ;;  %s6344_s16 = int_to_ptr.vmem [resolvable:$false] %s6343_s16 }
  0x6b   : > { %s6345_s29 = scalar_lea.vmem %s6344_s16, 2048  ;;  %p6346_p12 = scmp.lt.s32.totalorder %s6648_s14, %s6344_s16 }
  0x6c   : > { %p6341_p3 = pnand %p6339_p10, %p6325_p9  ;;  %p6347_p1 = scmp.lt.s32.totalorder %s6345_s29, %s6338_s20 }
  0x6e   : > { %p6342_p7 = pneg %p6341_p3  ;;  %p6348_p2 = por %p6347_p1, %p6346_p12 }
  0x70   : > { %p6349_p4 = pnand %p6348_p2, %p6342_p7 }
  0x72   : > { %6352 = shalt.err (!%p6349_p4)
}
  0x73   : > { %6017 = dma.hbm_to_vmem [thread:$0]  (!%p6644_p11), %s6642_s10, 1024, %s6648_s14, %s6650_s12, %s6432_s13, %s6432_s13, %s6433_s15  }
  0x74   : > { %p7515_p9 = scmp.ne.s32.totalorder %s7509_s9, 0 }
  0x75   : > { %s6684_s17 = sand.u32 (!%p7515_p9), 1, %s6419_s25   ;;  %p7516_p0 = scmp.ne.s32.totalorder (!%p7515_p9), %s7506_s30, 0 }
  0x76   : > { %292 = sbr.rel (%p7515_p9) target bundleno = 2272 (0x8e0), region = 48  ;;  %s4613_s23 = sshll.u32 (!%p7515_p9), %s6684_s17, 6 }
  0x77   : > { %s295_s11 = scalar_lea.sflag (!%p7515_p9), [#allocation4], %s6684_s17  ;;  %s6688_s20 = scalar_lea.vmem (!%p7515_p9), [#allocation3], %s4613_s23 }
  0x7d   : > { %6398 = dma.done.wait (%p7516_p0), %s295_s11, 1024  }
  0x7e   : > { %6400 = vsyncadd (%p7516_p0), %s295_s11, 4294966272  ;;  %p7517_p11 = scmp.eq.s32.totalorder %s6500_s28, 0 }
  0x80   : > { %6402 = dma.done.wait (%p7517_p11), [#allocation7], 16384   ;;  %p7518_p8 = pmov %p7517_p11 }
  0x82   : > { %6404 = vsyncadd (%p7518_p8), [#allocation7], 4294950912  ;;  %p7519_p13 = pmov %p7518_p8 }
  0x83   : > { %p7520_p6 = pmov %p7518_p8 }
  0x84   : > { %6406 = dma.done.wait (%p7519_p13), [#allocation10], 4096  }
  0x85   : > { %6408 = vsyncadd (%p7520_p6), [#allocation10], 4294963200  ;;  %v6435_v0 = vmov 0.0   ;;  %v6070_v1 = vld [vmem:[#allocation6] sm:$0xff]   ;;  %v6071_v2 = vld [vmem:[#allocation6 + $0x8] sm:$0xff]   ;;  %s4617_s21 = sshll.u32 %s6684_s17, 7 }
  0x86   : > { %342 = vst [vmem:[#allocation2] sm:$0xff] %v6435_v0  ;;  %5140 = vmatprep.subr.bf16.mxu1 %v6070_v1  ;;  %v6072_v3 = vld [vmem:[#allocation6 + $0x10] sm:$0xff]   ;;  %v6073_v4 = vld [vmem:[#allocation6 + $0x18] sm:$0xff]   ;;  %v6703_v5 = vld [vmem:[%s6688_s20] sm:$0xff]   ;;  %s7391_s16 = scalar_lea.vmem [#allocation11], %s4617_s21  ;;  %s4803_s29 = sshll.u32 %s6500_s28, 11 }
  0x87   : > { %5141 = vmatpush3.bf16.msra.mxu1 %v6070_v1  ;;  %v6706_v6 = vld [vmem:[%s6688_s20 + $0x8] sm:$0xff]   ;;  %v359_v7 = vunpack.c.l.bf16 %v6703_v5  ;;  %v360_v8 = vunpack.c.h.bf16 %v6703_v5  ;;  %v6713_v11 = vld [vmem:[%s6688_s20 + $0x10] sm:$0xff]   ;;  %v6718_v14 = vld [vmem:[%s6688_s20 + $0x18] sm:$0xff]   ;;  %5124 = vmatprep.mubr.bf16.mxu0 %v6703_v5  ;;  %s4501_s23 = sshll.u32 %s7391_s16, 4  ;;  %s7445_s30 = scalar_lea.hbm %s7501_s7, %s4803_s29  ;;  %s7447_s23 = int_to_ptr.vmem [resolvable:$true] %s4501_s23 }
  0x88   : > { %5142 = vmatprep.subr.bf16.mxu1 %v6071_v2  ;;  %v361_v9 = vunpack.c.l.bf16 %v6706_v6  ;;  %v362_v10 = vunpack.c.h.bf16 %v6706_v6  ;;  %v363_v12 = vunpack.c.l.bf16 %v6713_v11  ;;  %v364_v13 = vunpack.c.h.bf16 %v6713_v11  ;;  %v6074_v15 = vld [vmem:[#allocation6 + $0x20] sm:$0xff]   ;;  %v6727_v19 = vld [vmem:[%s6688_s20 + $0x28] sm:$0xff]   ;;  %v6734_v25 = vld [vmem:[%s6688_s20 + $0x30] sm:$0xff]   ;;  %s4488_s28 = scalar_lea.sflag [#allocation5], %s6684_s17  ;;  %s6353_s9 = scalar_lea.vmem %s7447_s23, 2048 }
  0x89   : > { %375 = vst [vmem:[#allocation2 + $0x8] sm:$0xff] %v359_v7  ;;  %376 = vst [vmem:[#allocation2 + $0x10] sm:$0xff] %v360_v8  ;;  %v365_v16 = vunpack.c.l.bf16 %v6718_v14  ;;  %v366_v17 = vunpack.c.h.bf16 %v6718_v14  ;;  %v6724_v18 = vld [vmem:[%s6688_s20 + $0x20] sm:$0xff]   ;;  %v369_v22 = vunpack.c.l.bf16 %v6727_v19  ;;  %v370_v23 = vunpack.c.h.bf16 %v6727_v19  ;;  %v6075_v24 = vld [vmem:[#allocation6 + $0x28] sm:$0xff]   ;;  %p6354_p10 = scmp.ne.s32.totalorder %s7447_s23, %s6353_s9  ;;  %s6436_s13 = smov [#allocation11]  }
  0x8a   : > { %377 = vst [vmem:[#allocation2 + $0x18] sm:$0xff] %v361_v9  ;;  %378 = vst [vmem:[#allocation2 + $0x20] sm:$0xff] %v362_v10  ;;  %v367_v20 = vunpack.c.l.bf16 %v6724_v18  ;;  %v368_v21 = vunpack.c.h.bf16 %v6724_v18  ;;  %v6737_v26 = vld [vmem:[%s6688_s20 + $0x38] sm:$0xff]   ;;  %v371_v27 = vunpack.c.l.bf16 %v6734_v25  ;;  %v372_v28 = vunpack.c.h.bf16 %v6734_v25  ;;  %v6076_v34 = vld [vmem:[#allocation6 + $0x30] sm:$0xff]   ;;  %s6357_s15 = sshll.u32 %s6436_s13, 4  ;;  %s6358_s15 = int_to_ptr.vmem [resolvable:$false] %s6357_s15 }
  0x8b   : > { %5143 = vmatpush3.bf16.msra.mxu1 %v6071_v2  ;;  %379 = vst [vmem:[#allocation2 + $0x28] sm:$0xff] %v363_v12  ;;  %380 = vst [vmem:[#allocation2 + $0x30] sm:$0xff] %v364_v13  ;;  %v373_v29 = vunpack.c.l.bf16 %v6737_v26  ;;  %v374_v30 = vunpack.c.h.bf16 %v6737_v26  ;;  %v6094_v35 = vld [vmem:[#allocation9] sm:$0xff]   ;;  %v6077_v36 = vld [vmem:[#allocation6 + $0x38] sm:$0xff]   ;;  %p6355_p3 = pnand %p6354_p10, %p6633_p5  ;;  %s6359_s10 = scalar_lea.vmem %s6358_s15, 4096 }
  0x8c   : > { %5144 = vmatprep.subr.bf16.mxu1 %v6072_v3  ;;  %381 = vst [vmem:[#allocation2 + $0x38] sm:$0xff] %v365_v16  ;;  %382 = vst [vmem:[#allocation2 + $0x40] sm:$0xff] %v366_v17  ;;  %5108 = vmatprep.subr.bf16.mxu0 %v6094_v35  ;;  %v6095_v37 = vld [vmem:[#allocation9 + $0x8] sm:$0xff]   ;;  %v6078_v39 = vld [vmem:[#allocation6 + $0x40] sm:$0xff]   ;;  %p6360_p12 = scmp.lt.s32.totalorder %s7447_s23, %s6358_s15  ;;  %p6361_p1 = scmp.lt.s32.totalorder %s6359_s10, %s6353_s9 }
  0x8d   : > { %383 = vst [vmem:[#allocation2 + $0x48] sm:$0xff] %v367_v20  ;;  %384 = vst [vmem:[#allocation2 + $0x50] sm:$0xff] %v368_v21  ;;  %5109 = vmatpush3.bf16.msra.mxu0 %v6094_v35  ;;  %v6096_v40 = vld [vmem:[#allocation9 + $0x10] sm:$0xff]   ;;  %v6097_v45 = vld [vmem:[#allocation9 + $0x18] sm:$0xff]   ;;  %p6356_p7 = pneg %p6355_p3 }
  0x8e   : > { %385 = vst [vmem:[#allocation2 + $0x58] sm:$0xff] %v369_v22  ;;  %386 = vst [vmem:[#allocation2 + $0x60] sm:$0xff] %v370_v23  ;;  %5110 = vmatprep.subr.bf16.mxu0 %v6095_v37  ;;  %v6079_v47 = vld [vmem:[#allocation6 + $0x48] sm:$0xff]   ;;  %v6080_v50 = vld [vmem:[#allocation6 + $0x50] sm:$0xff]   ;;  %p6362_p2 = por %p6361_p1, %p6360_p12 }
  0x8f   : > { %5145 = vmatpush3.bf16.msra.mxu1 %v6072_v3  ;;  %387 = vst [vmem:[#allocation2 + $0x68] sm:$0xff] %v371_v27  ;;  %388 = vst [vmem:[#allocation2 + $0x70] sm:$0xff] %v372_v28  ;;  %v6098_v52 = vld [vmem:[#allocation9 + $0x20] sm:$0xff]   ;;  %v6099_v54 = vld [vmem:[#allocation9 + $0x28] sm:$0xff]  }
  0x90   : > { %5146 = vmatprep.subr.bf16.mxu1 %v6073_v4  ;;  %v608_v31 = vld [vmem:[#allocation2 + $0x7] sm:$0xff]  ;;  %v609_v32 = vld [vmem:[#allocation2 + $0xf] sm:$0xff]  ;;  %389 = vst [vmem:[#allocation2 + $0x78] sm:$0xff] %v373_v29  ;;  %390 = vst [vmem:[#allocation2 + $0x80] sm:$0xff] %v374_v30  ;;  %p6363_p4 = pnand %p6362_p2, %p6356_p7 }
  0x91   : > { %v624_v33 = vpack.c.bf16 %v609_v32, %v608_v31  ;;  %v610_v38 = vld [vmem:[#allocation2 + $0x17] sm:$0xff]  ;;  %v611_v41 = vld [vmem:[#allocation2 + $0x1f] sm:$0xff]  ;;  %5111 = vmatpush3.bf16.msra.mxu0 %v6095_v37  ;;  %v6082_v61 = vld [vmem:[#allocation6 + $0x60] sm:$0xff]  }
  0x92   : > { %v612_v42 = vld [vmem:[#allocation2 + $0x27] sm:$0xff]  ;;  %v613_v43 = vld [vmem:[#allocation2 + $0x2f] sm:$0xff]  ;;  %v625_v44 = vpack.c.bf16 %v611_v41, %v610_v38  ;;  %5112 = vmatprep.subr.bf16.mxu0 %v6096_v40  ;;  %v6100_v58 = vld [vmem:[#allocation9 + $0x30] sm:$0xff]  }
  0x93   : > { %5147 = vmatpush3.bf16.msra.mxu1 %v6073_v4  ;;  %5156 = vmatprep.mubr.bf16.mxu1 %v624_v33  ;;  %v626_v46 = vpack.c.bf16 %v613_v43, %v612_v42  ;;  %v614_v48 = vld [vmem:[#allocation2 + $0x37] sm:$0xff]  ;;  %v615_v49 = vld [vmem:[#allocation2 + $0x3f] sm:$0xff]  ;;  %v6102_v4 = vld [vmem:[#allocation8] sm:$0xff]  }
  0x94   : > { %5148 = vmatprep.subr.bf16.mxu1 %v6074_v15  ;;  %v616_v51 = vld [vmem:[#allocation2 + $0x47] sm:$0xff]  ;;  %v617_v53 = vld [vmem:[#allocation2 + $0x4f] sm:$0xff]  ;;  %v627_v55 = vpack.c.bf16 %v615_v49, %v614_v48  ;;  %v6084_v9 = vld [vmem:[#allocation6 + $0x70] sm:$0xff]  }
  0x95   : > { %5113 = vmatpush3.bf16.msra.mxu0 %v6096_v40  ;;  %v6081_v56 = vld [vmem:[#allocation6 + $0x58] sm:$0xff]   ;;  %v628_v57 = vpack.c.bf16 %v617_v53, %v616_v51  ;;  %v618_v59 = vld [vmem:[#allocation2 + $0x57] sm:$0xff]  ;;  %v6758_v17 = vld [vmem:[#allocation8 + $0x40] sm:$0xff]  }
  0x96   : > { %5114 = vmatprep.subr.bf16.mxu0 %v6097_v45  ;;  %v619_v60 = vld [vmem:[#allocation2 + $0x5f] sm:$0xff]  ;;  %v620_v62 = vld [vmem:[#allocation2 + $0x67] sm:$0xff]  ;;  %v621_v63 = vld [vmem:[#allocation2 + $0x6f] sm:$0xff] }
  0x97   : > { %5149 = vmatpush3.bf16.msra.mxu1 %v6074_v15  ;;  %v6101_v0 = vld [vmem:[#allocation9 + $0x38] sm:$0xff]   ;;  %v629_v1 = vpack.c.bf16 %v619_v60, %v618_v59  ;;  %v6083_v2 = vld [vmem:[#allocation6 + $0x68] sm:$0xff]   ;;  %v630_v3 = vpack.c.bf16 %v621_v63, %v620_v62  ;;  %v6104_v15 = vld [vmem:[#allocation8 + $0x10] sm:$0xff]  }
  0x98   : > { %5150 = vmatprep.subr.bf16.mxu1 %v6075_v24  ;;  %v622_v7 = vld [vmem:[#allocation2 + $0x77] sm:$0xff]  ;;  %v623_v8 = vld [vmem:[#allocation2 + $0x7f] sm:$0xff] }
  0x99   : > { %5115 = vmatpush3.bf16.msra.mxu0 %v6097_v45  ;;  %v6103_v10 = vld [vmem:[#allocation8 + $0x8] sm:$0xff]   ;;  %v631_v12 = vpack.c.bf16 %v623_v8, %v622_v7  ;;  %v6085_v13 = vld [vmem:[#allocation6 + $0x78] sm:$0xff]   ;;  %v6120_v20 = vld [vmem:[#allocation6 + $0x90] sm:$0xff]  }
  0x9a   : > { %5116 = vmatprep.subr.bf16.mxu0 %v6098_v52  ;;  %v6105_v16 = vld [vmem:[#allocation8 + $0x18] sm:$0xff]  }
  0x9b   : > { %5151 = vmatpush3.bf16.msra.mxu1 %v6075_v24 }
  0x9c   : > { %5152 = vmatprep.subr.bf16.mxu1 %v6076_v34 }
  0x9d   : > { %5117 = vmatpush3.bf16.msra.mxu0 %v6098_v52 }
  0x9e   : > { %5118 = vmatprep.subr.bf16.mxu0 %v6099_v54 }
  0x9f   : > { %5153 = vmatpush3.bf16.msra.mxu1 %v6076_v34 }
  0xa0   : > { %5154 = vmatprep.subr.bf16.mxu1 %v6077_v36 }
  0xa1   : > { %5119 = vmatpush3.bf16.msra.mxu0 %v6099_v54 }
  0xa2   : > { %5120 = vmatprep.subr.bf16.mxu0 %v6100_v58 }
  0xa3   : > { %5155 = vmatpush3.bf16.msra.mxu1 %v6077_v36 }
  0xa4   : > { %5172 = vmatprep.subr.bf16.mxu1 %v6078_v39 }
  0xa5   : > { %5121 = vmatpush3.bf16.msra.mxu0 %v6100_v58 }
  0xa6   : > { %5157 = vmatmul.mubr.bf16.vlgmr.msra.gmra.mrb[0].mxu1 %v625_v44  ;;  %5122 = vmatprep.subr.bf16.mxu0 %v6101_v0 }
  0xa7   : > { %5173 = vmatpush3.bf16.msra.mxu1 %v6078_v39  ;;  %5160 = vmatprep.mubr.bf16.mxu1 %v626_v46 }
  0xa8   : > { %5174 = vmatprep.subr.bf16.mxu1 %v6079_v47 }
  0xa9   : > { %5123 = vmatpush3.bf16.msra.mxu0 %v6101_v0 }
  0xaa   : > { %5204 = vmatprep.subr.bf16.mxu0 %v6102_v4 }
  0xab   : > { %5175 = vmatpush3.bf16.msra.mxu1 %v6079_v47 }
  0xac   : > { %5176 = vmatprep.subr.bf16.mxu1 %v6080_v50  ;;  %5125 = vmatmul.mubr.bf16.vlgmr.msra.gmra.mrb[0].mxu0 %v6706_v6 }
  0xad   : > { %5205 = vmatpush3.bf16.msra.mxu0 %v6102_v4  ;;  %5128 = vmatprep.mubr.bf16.mxu0 %v6713_v11 }
  0xae   : > { %5161 = vmatmul.mubr.bf16.gmra.mrb[4].mxu1 %v627_v55  ;;  %5206 = vmatprep.subr.bf16.mxu0 %v6103_v10 }
  0xaf   : > { %5177 = vmatpush3.bf16.msra.mxu1 %v6080_v50  ;;  %5164 = vmatprep.mubr.bf16.mxu1 %v628_v57 }
  0xb0   : > { %5178 = vmatprep.subr.bf16.mxu1 %v6081_v56 }
  0xb1   : > { %5207 = vmatpush3.bf16.msra.mxu0 %v6103_v10 }
  0xb2   : > { %5208 = vmatprep.subr.bf16.mxu0 %v6104_v15 }
  0xb3   : > { %5179 = vmatpush3.bf16.msra.mxu1 %v6081_v56 }
  0xb4   : > { %5180 = vmatprep.subr.bf16.mxu1 %v6082_v61  ;;  %5129 = vmatmul.mubr.bf16.gmra.mrb[4].mxu0 %v6718_v14 }
  0xb5   : > { %5209 = vmatpush3.bf16.msra.mxu0 %v6104_v15  ;;  %5132 = vmatprep.mubr.bf16.mxu0 %v6724_v18 }
  0xb6   : > { %5165 = vmatmul.mubr.bf16.gmra.mrb[8].mxu1 %v629_v1  ;;  %5210 = vmatprep.subr.bf16.mxu0 %v6105_v16 }
  0xb7   : > { %5181 = vmatpush3.bf16.msra.mxu1 %v6082_v61  ;;  %5168 = vmatprep.mubr.bf16.mxu1 %v630_v3 }
  0xb8   : > { %5182 = vmatprep.subr.bf16.mxu1 %v6083_v2 }
  0xb9   : > { %5211 = vmatpush3.bf16.msra.mxu0 %v6105_v16 }
  0xbb   : > { %5183 = vmatpush3.bf16.msra.mxu1 %v6083_v2 }
  0xbc   : > { %5184 = vmatprep.subr.bf16.mxu1 %v6084_v9  ;;  %5133 = vmatmul.mubr.bf16.gmra.mrb[8].mxu0 %v6727_v19 }
  0xbd   : > { %5136 = vmatprep.mubr.bf16.mxu0 %v6734_v25 }
  0xbe   : > { %5169 = vmatmul.mubr.bf16.gmra.mrb[12].mxu1 %v631_v12 }
  0xbf   : > { %5185 = vmatpush3.bf16.msra.mxu1 %v6084_v9  ;;  %5188 = vmatprep.mubr.bf16.mxu1 %v6703_v5  ;;  %v6106_v5 = vld [vmem:[#allocation8 + $0x20] sm:$0xff]  }
  0xc0   : > { %5186 = vmatprep.subr.bf16.mxu1 %v6085_v13  ;;  %5212 = vmatprep.subr.bf16.mxu0 %v6106_v5 }
  0xc1   : > { %5213 = vmatpush3.bf16.msra.mxu0 %v6106_v5 }
  0xc3   : > { %5187 = vmatpush3.bf16.msra.mxu1 %v6085_v13  ;;  %v6111_v13 = vld [vmem:[#allocation8 + $0x48] sm:$0xff]  }
  0xc4   : > { %5137 = vmatmul.mubr.bf16.gmra.mrb[12].mxu0 %v6737_v26 }
  0xc6   : > { %5189 = vmatmul.mubr.bf16.vlgmr.msra.gmra.mrb[0].mxu1 %v6706_v6  ;;  %v6107_v6 = vld [vmem:[#allocation8 + $0x28] sm:$0xff]  }
  0xc7   : > { %5192 = vmatprep.mubr.bf16.mxu1 %v6713_v11  ;;  %5214 = vmatprep.subr.bf16.mxu0 %v6107_v6  ;;  %v6108_v11 = vld [vmem:[#allocation8 + $0x30] sm:$0xff]  }
  0xc8   : > { %5215 = vmatpush3.bf16.msra.mxu0 %v6107_v6 }
  0xc9   : > { %5216 = vmatprep.subr.bf16.mxu0 %v6108_v11 }
  0xcc   : > { %5217 = vmatpush3.bf16.msra.mxu0 %v6108_v11 }
  0xce   : > { %5193 = vmatmul.mubr.bf16.gmra.mrb[4].mxu1 %v6718_v14  ;;  %v6109_v14 = vld [vmem:[#allocation8 + $0x38] sm:$0xff]  }
  0xcf   : > { %5196 = vmatprep.mubr.bf16.mxu1 %v6724_v18  ;;  %5218 = vmatprep.subr.bf16.mxu0 %v6109_v14  ;;  %v6118_v18 = vld [vmem:[#allocation6 + $0x80] sm:$0xff]  }
  0xd0   : > { %5219 = vmatpush3.bf16.msra.mxu0 %v6109_v14  ;;  %5268 = vmatprep.subr.bf16.mxu1 %v6118_v18 }
  0xd1   : > { %5236 = vmatprep.subr.bf16.mxu0 %v6758_v17  ;;  %5269 = vmatpush3.bf16.msra.mxu1 %v6118_v18 }
  0xd6   : > { %5197 = vmatmul.mubr.bf16.gmra.mrb[8].mxu1 %v6727_v19  ;;  %v6119_v19 = vld [vmem:[#allocation6 + $0x88] sm:$0xff]  }
  0xd7   : > { %5200 = vmatprep.mubr.bf16.mxu1 %v6734_v25  ;;  %5270 = vmatprep.subr.bf16.mxu1 %v6119_v19  ;;  %v6772_v25 = vld [vmem:[%s7496_s2] ss:$0 sm:$0xff] }
  0xd8   : > { %5271 = vmatpush3.bf16.msra.mxu1 %v6119_v19 }
  0xd9   : > { %5272 = vmatprep.subr.bf16.mxu1 %v6120_v20 }
  0xdc   : > { %5273 = vmatpush3.bf16.msra.mxu1 %v6120_v20 }
  0xde   : > { %5201 = vmatmul.mubr.bf16.gmra.mrb[12].mxu1 %v6737_v26 }
 0x17f   : > { %v6761_v21 = vpop.f32.mrb[0].mxu0 }
 0x180   : > { %v6763_v22 = vpop.f32.mrb[1].mxu0 }
 0x181   : > { %v6765_v23 = vpop.f32.mrb[2].mxu0 }
 0x182   : > { %v6767_v24 = vpop.f32.mrb[3].mxu0 }
 0x187   : > { %v6774_v26 = vpop.f32.mrb[4].mxu0 }
 0x188   : > { %v6776_v27 = vpop.f32.mrb[5].mxu0 }
 0x189   : > { %v6778_v29 = vpop.f32.mrb[6].mxu0 }
 0x18a   : > { %v6781_v32 = vpop.f32.mrb[7].mxu0 }
 0x18f   : > { %v6786_v42 = vpop.f32.mrb[8].mxu0 }
 0x190   : > { %v6790_v44 = vpop.f32.mrb[9].mxu0 }
 0x191   : > { %v6794_v47 = vpop.f32.mrb[10].mxu0 }
 0x192   : > { %v6797_v50 = vpop.f32.mrb[11].mxu0 }
 0x197   : > { %v6802_v61 = vpop.f32.mrb[12].mxu0 }
 0x198   : > { %v6806_v2 = vpop.f32.mrb[13].mxu0 }
 0x199   : > { %v5190_v28 = vpop.f32.mrb[0].mxu1  ;;  %v6810_v9 = vpop.f32.mrb[14].mxu0 }
 0x19a   : > { %v5732_v30 = vadd.f32 %v5190_v28, %v6772_v25  ;;  %v914_v31 = vpop.f32.mrb[1].mxu1  ;;  %v6813_v15 = vpop.f32.mrb[15].mxu0  ;;  %v6112_v28 = vld [vmem:[#allocation8 + $0x50] sm:$0xff]  }
 0x19b   : > { %v5733_v33 = vadd.f32 %v6772_v25, %v914_v31  ;;  %v5191_v34 = vpop.f32.mrb[2].mxu1 }
 0x19c   : > { %v995_v35 = vmax.f32 %v5732_v30, 0.0  ;;  %v5734_v36 = vadd.f32 %v5191_v34, %v6772_v25  ;;  %v917_v37 = vpop.f32.mrb[3].mxu1 }
 0x19d   : > { %v993_v38 = vmax.f32 %v5733_v33, 0.0  ;;  %v5735_v39 = vadd.f32 %v6772_v25, %v917_v37 }
 0x19e   : > { %1011 = vst [vmem:[#allocation2 + $0x18] sm:$0xff] %v995_v35  ;;  %v996_v40 = vmax.f32 %v5734_v36, 0.0 }
 0x19f   : > { %1009 = vst [vmem:[#allocation2 + $0x8] sm:$0xff] %v993_v38  ;;  %v994_v41 = vmax.f32 %v5735_v39, 0.0 }
 0x1a0   : > { %1012 = vst [vmem:[#allocation2 + $0x20] sm:$0xff] %v996_v40  ;;  %v6788_v43 = vpack.c.bf16 %v996_v40, %v995_v35 }
 0x1a1   : > { %1010 = vst [vmem:[#allocation2 + $0x10] sm:$0xff] %v994_v41  ;;  %v6792_v45 = vpack.c.bf16 %v994_v41, %v993_v38  ;;  %v5194_v46 = vpop.f32.mrb[4].mxu1 }
 0x1a2   : > { %v5736_v48 = vadd.f32 %v5194_v46, %v6772_v25  ;;  %v930_v49 = vpop.f32.mrb[5].mxu1  ;;  %v6113_v46 = vld [vmem:[#allocation8 + $0x58] sm:$0xff]  }
 0x1a3   : > { %v5737_v51 = vadd.f32 %v6772_v25, %v930_v49  ;;  %v5195_v52 = vpop.f32.mrb[6].mxu1 }
 0x1a4   : > { %v999_v53 = vmax.f32 %v5736_v48, 0.0  ;;  %v5738_v54 = vadd.f32 %v5195_v52, %v6772_v25  ;;  %v933_v55 = vpop.f32.mrb[7].mxu1 }
 0x1a5   : > { %v997_v56 = vmax.f32 %v5737_v51, 0.0  ;;  %v5739_v57 = vadd.f32 %v6772_v25, %v933_v55 }
 0x1a6   : > { %1015 = vst [vmem:[#allocation2 + $0x38] sm:$0xff] %v999_v53  ;;  %v1000_v58 = vmax.f32 %v5738_v54, 0.0  ;;  %v1034_v1 = vld [vmem:[#allocation2 + $0x7] sm:$0xff] }
 0x1a7   : > { %v1037_v59 = vld [vmem:[#allocation2 + $0x1f] sm:$0xff]  ;;  %1013 = vst [vmem:[#allocation2 + $0x28] sm:$0xff] %v997_v56  ;;  %v998_v60 = vmax.f32 %v5739_v57, 0.0  ;;  %v6114_v57 = vld [vmem:[#allocation8 + $0x60] sm:$0xff]  }
 0x1a8   : > { %v1035_v62 = vld [vmem:[#allocation2 + $0xf] sm:$0xff]  ;;  %v1036_v63 = vld [vmem:[#allocation2 + $0x17] sm:$0xff]  ;;  %1016 = vst [vmem:[#allocation2 + $0x40] sm:$0xff] %v1000_v58  ;;  %v6804_v0 = vpack.c.bf16 %v1000_v58, %v999_v53 }
 0x1a9   : > { %1014 = vst [vmem:[#allocation2 + $0x30] sm:$0xff] %v998_v60  ;;  %v6808_v3 = vpack.c.bf16 %v998_v60, %v997_v56  ;;  %v5198_v4 = vpop.f32.mrb[8].mxu1  ;;  %v1050_v7 = vpack.c.bf16 %v1035_v62, %v1034_v1  ;;  %v1051_v8 = vpack.c.bf16 %v1037_v59, %v1036_v63 }
 0x1aa   : > { %v5740_v10 = vadd.f32 %v5198_v4, %v6772_v25  ;;  %v946_v12 = vpop.f32.mrb[9].mxu1 }
 0x1ab   : > { %v5741_v16 = vadd.f32 %v6772_v25, %v946_v12  ;;  %v5199_v5 = vpop.f32.mrb[10].mxu1  ;;  %5220 = vmatprep.mubr.bf16.mxu0 %v1050_v7 }
 0x1ac   : > { %v1003_v6 = vmax.f32 %v5740_v10, 0.0  ;;  %v5742_v11 = vadd.f32 %v5199_v5, %v6772_v25  ;;  %v949_v14 = vpop.f32.mrb[11].mxu1  ;;  %5221 = vmatmul.mubr.bf16.vlgmr.msra.gmra.mrb[16].mxu0 %v1051_v8  ;;  %v6116_v10 = vld [vmem:[#allocation8 + $0x70] sm:$0xff]  }
 0x1ad   : > { %v1001_v18 = vmax.f32 %v5741_v16, 0.0  ;;  %v5743_v19 = vadd.f32 %v6772_v25, %v949_v14  ;;  %5237 = vmatpush3.bf16.msra.mxu0 %v6758_v17  ;;  %v6117_v14 = vld [vmem:[#allocation8 + $0x78] sm:$0xff]  }
 0x1ae   : > { %1019 = vst [vmem:[#allocation2 + $0x58] sm:$0xff] %v1003_v6  ;;  %v1004_v20 = vmax.f32 %v5742_v11, 0.0  ;;  %5238 = vmatprep.subr.bf16.mxu0 %v6111_v13  ;;  %v1038_v33 = vld [vmem:[#allocation2 + $0x27] sm:$0xff] }
 0x1af   : > { %v1041_v30 = vld [vmem:[#allocation2 + $0x3f] sm:$0xff]  ;;  %1017 = vst [vmem:[#allocation2 + $0x48] sm:$0xff] %v1001_v18  ;;  %v1002_v31 = vmax.f32 %v5743_v19, 0.0  ;;  %v6122_v19 = vld [vmem:[#allocation6 + $0xa0] sm:$0xff]  }
 0x1b0   : > { %v1039_v34 = vld [vmem:[#allocation2 + $0x2f] sm:$0xff]  ;;  %v1040_v35 = vld [vmem:[#allocation2 + $0x37] sm:$0xff]  ;;  %1020 = vst [vmem:[#allocation2 + $0x60] sm:$0xff] %v1004_v20  ;;  %v6819_v36 = vpack.c.bf16 %v1004_v20, %v1003_v6 }
 0x1b1   : > { %1018 = vst [vmem:[#allocation2 + $0x50] sm:$0xff] %v1002_v31  ;;  %v1029_v37 = vpack.c.bf16 %v1002_v31, %v1001_v18  ;;  %v5202_v38 = vpop.f32.mrb[12].mxu1  ;;  %5239 = vmatpush3.bf16.msra.mxu0 %v6111_v13  ;;  %v1052_v39 = vpack.c.bf16 %v1039_v34, %v1038_v33  ;;  %v1053_v40 = vpack.c.bf16 %v1041_v30, %v1040_v35  ;;  %v6121_v18 = vld [vmem:[#allocation6 + $0x98] sm:$0xff]   ;;  %v6124_v20 = vld [vmem:[#allocation6 + $0xb0] sm:$0xff]  }
 0x1b2   : > { %v5744_v17 = vadd.f32 %v5202_v38, %v6772_v25  ;;  %v962_v41 = vpop.f32.mrb[13].mxu1  ;;  %5240 = vmatprep.subr.bf16.mxu0 %v6112_v28  ;;  %5274 = vmatprep.subr.bf16.mxu1 %v6121_v18  ;;  %v6136_v30 = vld [vmem:[#allocation8 + $0x90] sm:$0xff]   ;;  %v6137_v31 = vld [vmem:[#allocation8 + $0x98] sm:$0xff]  }
 0x1b3   : > { %v5745_v48 = vadd.f32 %v6772_v25, %v962_v41  ;;  %v5203_v49 = vpop.f32.mrb[14].mxu1  ;;  %5224 = vmatprep.mubr.bf16.mxu0 %v1052_v39  ;;  %5275 = vmatpush3.bf16.msra.mxu1 %v6121_v18  ;;  %v6836_v33 = vld [vmem:[%s7498_s4] ss:$0 sm:$0xff] }
 0x1b4   : > { %v1007_v51 = vmax.f32 %v5744_v17, 0.0  ;;  %v5746_v52 = vadd.f32 %v5203_v49, %v6772_v25  ;;  %v965_v53 = vpop.f32.mrb[15].mxu1  ;;  %5225 = vmatmul.mubr.bf16.gmra.mrb[20].mxu0 %v1053_v40  ;;  %5276 = vmatprep.subr.bf16.mxu1 %v6122_v19  ;;  %v6841_v34 = vld [vmem:[%s7500_s6] ss:$0 sm:$0xff] }
 0x1b5   : > { %v1005_v54 = vmax.f32 %v5745_v48, 0.0  ;;  %v5747_v55 = vadd.f32 %v6772_v25, %v965_v53  ;;  %5241 = vmatpush3.bf16.msra.mxu0 %v6112_v28  ;;  %v6115_v25 = vld [vmem:[#allocation8 + $0x68] sm:$0xff]   ;;  %v553_v40 = vadd.f32 %v6761_v21, %v6841_v34  ;;  %v545_v48 = vadd.f32 %v6841_v34, %v6763_v22 }
 0x1b6   : > { %1023 = vst [vmem:[#allocation2 + $0x78] sm:$0xff] %v1007_v51  ;;  %v1008_v56 = vmax.f32 %v5746_v52, 0.0  ;;  %5242 = vmatprep.subr.bf16.mxu0 %v6113_v46  ;;  %v1042_v60 = vld [vmem:[#allocation2 + $0x47] sm:$0xff]  ;;  %v6135_v28 = vld [vmem:[#allocation8 + $0x88] sm:$0xff]   ;;  %v556_v52 = vadd.f32 %v6765_v23, %v6841_v34 }
 0x1b7   : > { %v1045_v58 = vld [vmem:[#allocation2 + $0x5f] sm:$0xff]  ;;  %1021 = vst [vmem:[#allocation2 + $0x68] sm:$0xff] %v1005_v54  ;;  %v1006_v59 = vmax.f32 %v5747_v55, 0.0  ;;  %5277 = vmatpush3.bf16.msra.mxu1 %v6122_v19  ;;  %v548_v55 = vadd.f32 %v6841_v34, %v6767_v24 }
 0x1b8   : > { %v1043_v62 = vld [vmem:[#allocation2 + $0x4f] sm:$0xff]  ;;  %v1044_v63 = vld [vmem:[#allocation2 + $0x57] sm:$0xff]  ;;  %1024 = vst [vmem:[#allocation2 + $0x80] sm:$0xff] %v1008_v56  ;;  %v1032_v1 = vpack.c.bf16 %v1008_v56, %v1007_v51 }
 0x1b9   : > { %1022 = vst [vmem:[#allocation2 + $0x70] sm:$0xff] %v1006_v59  ;;  %v1031_v4 = vpack.c.bf16 %v1006_v59, %v1005_v54  ;;  %5243 = vmatpush3.bf16.msra.mxu0 %v6113_v46  ;;  %v1054_v7 = vpack.c.bf16 %v1043_v62, %v1042_v60  ;;  %v1055_v8 = vpack.c.bf16 %v1045_v58, %v1044_v63 }
 0x1ba   : > { %5244 = vmatprep.subr.bf16.mxu0 %v6114_v57 }
 0x1bb   : > { %5228 = vmatprep.mubr.bf16.mxu0 %v1054_v7  ;;  %v569_v7 = vadd.f32 %v6774_v26, %v6841_v34  ;;  %v564_v26 = vadd.f32 %v6841_v34, %v6781_v32 }
 0x1bc   : > { %5229 = vmatmul.mubr.bf16.gmra.mrb[24].mxu0 %v1055_v8 }
 0x1bd   : > { %5245 = vmatpush3.bf16.msra.mxu0 %v6114_v57 }
 0x1be   : > { %5246 = vmatprep.subr.bf16.mxu0 %v6115_v25  ;;  %v1046_v13 = vld [vmem:[#allocation2 + $0x67] sm:$0xff] }
 0x1bf   : > { %v1049_v12 = vld [vmem:[#allocation2 + $0x7f] sm:$0xff] }
 0x1c0   : > { %v1047_v16 = vld [vmem:[#allocation2 + $0x6f] sm:$0xff]  ;;  %v1048_v5 = vld [vmem:[#allocation2 + $0x77] sm:$0xff] }
 0x1c1   : > { %5247 = vmatpush3.bf16.msra.mxu0 %v6115_v25  ;;  %v1056_v6 = vpack.c.bf16 %v1047_v16, %v1046_v13  ;;  %v1057_v11 = vpack.c.bf16 %v1049_v12, %v1048_v5  ;;  %v561_v12 = vadd.f32 %v6841_v34, %v6776_v27  ;;  %v572_v5 = vadd.f32 %v6778_v29, %v6841_v34 }
 0x1c2   : > { %5248 = vmatprep.subr.bf16.mxu0 %v6116_v10 }
 0x1c3   : > { %5232 = vmatprep.mubr.bf16.mxu0 %v1056_v6 }
 0x1c4   : > { %5233 = vmatmul.mubr.bf16.gmra.mrb[28].mxu0 %v1057_v11 }
 0x1c5   : > { %5249 = vmatpush3.bf16.msra.mxu0 %v6116_v10  ;;  %5252 = vmatprep.mubr.bf16.mxu0 %v6792_v45  ;;  %v6123_v45 = vld [vmem:[#allocation6 + $0xa8] sm:$0xff]  }
 0x1c6   : > { %5250 = vmatprep.subr.bf16.mxu0 %v6117_v14  ;;  %5278 = vmatprep.subr.bf16.mxu1 %v6123_v45 }
 0x1c7   : > { %5279 = vmatpush3.bf16.msra.mxu1 %v6123_v45 }
 0x1c8   : > { %5280 = vmatprep.subr.bf16.mxu1 %v6124_v20 }
 0x1c9   : > { %5251 = vmatpush3.bf16.msra.mxu0 %v6117_v14 }
 0x1cb   : > { %5281 = vmatpush3.bf16.msra.mxu1 %v6124_v20 }
 0x1cc   : > { %5253 = vmatmul.mubr.bf16.vlgmr.msra.gmra.mrb[16].mxu0 %v6788_v43  ;;  %v6125_v43 = vld [vmem:[#allocation6 + $0xb8] sm:$0xff]  }
 0x1cd   : > { %5256 = vmatprep.mubr.bf16.mxu0 %v6808_v3  ;;  %5282 = vmatprep.subr.bf16.mxu1 %v6125_v43  ;;  %v6134_v3 = vld [vmem:[#allocation8 + $0x80] sm:$0xff]  }
 0x1ce   : > { %5332 = vmatprep.subr.bf16.mxu0 %v6134_v3 }
 0x1cf   : > { %5283 = vmatpush3.bf16.msra.mxu1 %v6125_v43  ;;  %5333 = vmatpush3.bf16.msra.mxu0 %v6134_v3 }
 0x1d0   : > { %5334 = vmatprep.subr.bf16.mxu0 %v6135_v28 }
 0x1d3   : > { %5335 = vmatpush3.bf16.msra.mxu0 %v6135_v28 }
 0x1d4   : > { %5257 = vmatmul.mubr.bf16.gmra.mrb[20].mxu0 %v6804_v0  ;;  %v6830_v0 = vld [vmem:[#allocation6 + $0xc0] sm:$0xff]   ;;  %5336 = vmatprep.subr.bf16.mxu0 %v6136_v30 }
 0x1d5   : > { %5260 = vmatprep.mubr.bf16.mxu0 %v1029_v37  ;;  %5300 = vmatprep.subr.bf16.mxu1 %v6830_v0 }
 0x1d7   : > { %5337 = vmatpush3.bf16.msra.mxu0 %v6136_v30 }
 0x1d8   : > { %5338 = vmatprep.subr.bf16.mxu0 %v6137_v31 }
 0x1db   : > { %5339 = vmatpush3.bf16.msra.mxu0 %v6137_v31 }
 0x1dc   : > { %5261 = vmatmul.mubr.bf16.gmra.mrb[24].mxu0 %v6819_v36 }
 0x1dd   : > { %5264 = vmatprep.mubr.bf16.mxu0 %v1031_v4 }
 0x1e4   : > { %5265 = vmatmul.mubr.bf16.gmra.mrb[28].mxu0 %v1032_v1 }
 0x29f   : > { %v5254_v35 = vpop.f32.mrb[16].mxu0 }
 0x2a0   : > { %v5748_v36 = vadd.f32 %v5254_v35, %v6836_v33  ;;  %v1340_v37 = vpop.f32.mrb[17].mxu0 }
 0x2a1   : > { %v5749_v38 = vadd.f32 %v6836_v33, %v1340_v37  ;;  %v5255_v39 = vpop.f32.mrb[18].mxu0  ;;  %v577_v37 = vadd.f32 %v6841_v34, %v6790_v44 }
 0x2a2   : > { %v1421_v17 = vmax.f32 %v5748_v36, 0.0  ;;  %v5750_v41 = vadd.f32 %v5255_v39, %v6836_v33  ;;  %v1343_v46 = vpop.f32.mrb[19].mxu0  ;;  %v585_v36 = vadd.f32 %v6786_v42, %v6841_v34  ;;  %v588_v42 = vadd.f32 %v6794_v47, %v6841_v34 }
 0x2a3   : > { %v1419_v49 = vmax.f32 %v5749_v38, 0.0  ;;  %v5751_v51 = vadd.f32 %v6836_v33, %v1343_v46 }
 0x2a4   : > { %v1437_v53 = vadd.f32 %v1421_v17, %v553_v40  ;;  %v1422_v54 = vmax.f32 %v5750_v41, 0.0 }
 0x2a5   : > { %v1435_v56 = vadd.f32 %v1419_v49, %v545_v48  ;;  %v1420_v21 = vmax.f32 %v5751_v51, 0.0 }
 0x2a6   : > { %v6855_v57 = vmax.f32 %v1437_v53, 0.0  ;;  %v1438_v58 = vadd.f32 %v1422_v54, %v556_v52  ;;  %v6127_v54 = vld [vmem:[#allocation6 + $0xc8] sm:$0xff]  }
 0x2a7   : > { %v6857_v59 = vmax.f32 %v1435_v56, 0.0  ;;  %v1436_v60 = vadd.f32 %v1420_v21, %v548_v55  ;;  %v5258_v22 = vpop.f32.mrb[20].mxu0  ;;  %v580_v55 = vadd.f32 %v6841_v34, %v6797_v50 }
 0x2a8   : > { %1469 = vst [vmem:[#allocation2 + $0x18] sm:$0xff] %v6855_v57  ;;  %v6860_v62 = vmax.f32 %v1438_v58, 0.0  ;;  %v5752_v23 = vadd.f32 %v5258_v22, %v6836_v33  ;;  %v1356_v63 = vpop.f32.mrb[21].mxu0 }
 0x2a9   : > { %1467 = vst [vmem:[#allocation2 + $0x8] sm:$0xff] %v6857_v59  ;;  %v6864_v1 = vmax.f32 %v1436_v60, 0.0  ;;  %v5753_v24 = vadd.f32 %v6836_v33, %v1356_v63  ;;  %v5259_v4 = vpop.f32.mrb[22].mxu0 }
 0x2aa   : > { %1470 = vst [vmem:[#allocation2 + $0x20] sm:$0xff] %v6860_v62  ;;  %v1425_v8 = vmax.f32 %v5752_v23, 0.0  ;;  %v5754_v25 = vadd.f32 %v5259_v4, %v6836_v33  ;;  %v1359_v10 = vpop.f32.mrb[23].mxu0  ;;  %v6128_v4 = vld [vmem:[#allocation6 + $0xd0] sm:$0xff]  }
 0x2ab   : > { %1468 = vst [vmem:[#allocation2 + $0x10] sm:$0xff] %v6864_v1  ;;  %v1423_v13 = vmax.f32 %v5753_v24, 0.0  ;;  %v5755_v16 = vadd.f32 %v6836_v33, %v1359_v10 }
 0x2ac   : > { %v1441_v6 = vadd.f32 %v1425_v8, %v569_v7  ;;  %v1426_v11 = vmax.f32 %v5754_v25, 0.0 }
 0x2ad   : > { %v1439_v14 = vadd.f32 %v1423_v13, %v561_v12  ;;  %v1424_v18 = vmax.f32 %v5755_v16, 0.0  ;;  %v593_v12 = vadd.f32 %v6841_v34, %v6806_v2  ;;  %v604_v2 = vadd.f32 %v6810_v9, %v6841_v34 }
 0x2ae   : > { %v6879_v19 = vmax.f32 %v1441_v6, 0.0  ;;  %v1442_v45 = vadd.f32 %v1426_v11, %v572_v5 }
 0x2af   : > { %v6881_v20 = vmax.f32 %v1439_v14, 0.0  ;;  %v1440_v27 = vadd.f32 %v1424_v18, %v564_v26  ;;  %v5262_v43 = vpop.f32.mrb[24].mxu0 }
 0x2b0   : > { %1473 = vst [vmem:[#allocation2 + $0x38] sm:$0xff] %v6879_v19  ;;  %v6884_v3 = vmax.f32 %v1442_v45, 0.0  ;;  %v5756_v29 = vadd.f32 %v5262_v43, %v6836_v33  ;;  %v1372_v28 = vpop.f32.mrb[25].mxu0  ;;  %v1493_v17 = vld [vmem:[#allocation2 + $0x6] sm:$0xff] }
 0x2b1   : > { %1471 = vst [vmem:[#allocation2 + $0x28] sm:$0xff] %v6881_v20  ;;  %v6888_v30 = vmax.f32 %v1440_v27, 0.0  ;;  %v5757_v32 = vadd.f32 %v6836_v33, %v1372_v28  ;;  %v5263_v31 = vpop.f32.mrb[26].mxu0  ;;  %v1496_v35 = vld [vmem:[#allocation2 + $0x1e] sm:$0xff]  ;;  %v596_v28 = vadd.f32 %v6841_v34, %v6813_v15 }
 0x2b2   : > { %1474 = vst [vmem:[#allocation2 + $0x40] sm:$0xff] %v6884_v3  ;;  %v1429_v38 = vmax.f32 %v5756_v29, 0.0  ;;  %v5758_v39 = vadd.f32 %v5263_v31, %v6836_v33  ;;  %v1375_v40 = vpop.f32.mrb[27].mxu0  ;;  %v1494_v41 = vld [vmem:[#allocation2 + $0xe] sm:$0xff]  ;;  %v1495_v46 = vld [vmem:[#allocation2 + $0x16] sm:$0xff]  ;;  %v6129_v29 = vld [vmem:[#allocation6 + $0xd8] sm:$0xff]  }
 0x2b3   : > { %1472 = vst [vmem:[#allocation2 + $0x30] sm:$0xff] %v6888_v30  ;;  %v1427_v48 = vmax.f32 %v5757_v32, 0.0  ;;  %v5759_v49 = vadd.f32 %v6836_v33, %v1375_v40  ;;  %v1509_v51 = vpack.c.bf16 %v1494_v41, %v1493_v17  ;;  %v1510_v52 = vpack.c.bf16 %v1496_v35, %v1495_v46 }
 0x2b4   : > { %v1445_v44 = vadd.f32 %v1429_v38, %v585_v36  ;;  %v1430_v53 = vmax.f32 %v5758_v39, 0.0  ;;  %v6130_v38 = vld [vmem:[#allocation6 + $0xe0] sm:$0xff]  }
 0x2b5   : > { %v1443_v56 = vadd.f32 %v1427_v48, %v577_v37  ;;  %v1428_v21 = vmax.f32 %v5759_v49, 0.0  ;;  %5284 = vmatprep.mubr.bf16.mxu1 %v1509_v51  ;;  %v6131_v48 = vld [vmem:[#allocation6 + $0xe8] sm:$0xff]   ;;  %v6132_v49 = vld [vmem:[#allocation6 + $0xf0] sm:$0xff]  }
 0x2b6   : > { %v6903_v58 = vmax.f32 %v1445_v44, 0.0  ;;  %v1446_v60 = vadd.f32 %v1430_v53, %v588_v42  ;;  %5285 = vmatmul.mubr.bf16.vlgmr.msra.gmra.mrb[16].mxu1 %v1510_v52 }
 0x2b7   : > { %v6905_v22 = vmax.f32 %v1443_v56, 0.0  ;;  %v1444_v23 = vadd.f32 %v1428_v21, %v580_v55  ;;  %v5266_v63 = vpop.f32.mrb[28].mxu0  ;;  %5301 = vmatpush3.bf16.msra.mxu1 %v6830_v0  ;;  %v601_v0 = vadd.f32 %v6802_v61, %v6841_v34  ;;  %v6133_v55 = vld [vmem:[#allocation6 + $0xf8] sm:$0xff]   ;;  %v1483_v56 = vpack.c.bf16 %v6864_v1, %v6857_v59 }
 0x2b8   : > { %1477 = vst [vmem:[#allocation2 + $0x58] sm:$0xff] %v6903_v58  ;;  %v6909_v47 = vmax.f32 %v1446_v60, 0.0  ;;  %v5760_v24 = vadd.f32 %v5266_v63, %v6836_v33  ;;  %v1388_v50 = vpop.f32.mrb[29].mxu0  ;;  %5302 = vmatprep.subr.bf16.mxu1 %v6127_v54  ;;  %v1497_v6 = vld [vmem:[#allocation2 + $0x26] sm:$0xff]  ;;  %v1484_v21 = vpack.c.bf16 %v6860_v62, %v6855_v57  ;;  %v1485_v60 = vpack.c.bf16 %v6888_v30, %v6881_v20 }
 0x2b9   : > { %1475 = vst [vmem:[#allocation2 + $0x48] sm:$0xff] %v6905_v22  ;;  %v6913_v7 = vmax.f32 %v1444_v23, 0.0  ;;  %v5761_v8 = vadd.f32 %v6836_v33, %v1388_v50  ;;  %v5267_v25 = vpop.f32.mrb[30].mxu0  ;;  %v1500_v10 = vld [vmem:[#allocation2 + $0x3e] sm:$0xff]  ;;  %v1486_v23 = vpack.c.bf16 %v6884_v3, %v6879_v19 }
 0x2ba   : > { %1478 = vst [vmem:[#allocation2 + $0x60] sm:$0xff] %v6909_v47  ;;  %v1433_v13 = vmax.f32 %v5760_v24, 0.0  ;;  %v5762_v16 = vadd.f32 %v5267_v25, %v6836_v33  ;;  %v1391_v5 = vpop.f32.mrb[31].mxu0  ;;  %v1498_v11 = vld [vmem:[#allocation2 + $0x2e] sm:$0xff]  ;;  %v1499_v26 = vld [vmem:[#allocation2 + $0x36] sm:$0xff]  ;;  %v1488_v24 = vpack.c.bf16 %v6909_v47, %v6903_v58 }
 0x2bb   : > { %1476 = vst [vmem:[#allocation2 + $0x50] sm:$0xff] %v6913_v7  ;;  %v1431_v14 = vmax.f32 %v5761_v8, 0.0  ;;  %v5763_v18 = vadd.f32 %v6836_v33, %v1391_v5  ;;  %5303 = vmatpush3.bf16.msra.mxu1 %v6127_v54  ;;  %v1511_v45 = vpack.c.bf16 %v1498_v11, %v1497_v6  ;;  %v1512_v61 = vpack.c.bf16 %v1500_v10, %v1499_v26  ;;  %v6138_v8 = vld [vmem:[#allocation8 + $0xa0] sm:$0xff]   ;;  %v6139_v25 = vld [vmem:[#allocation8 + $0xa8] sm:$0xff]   ;;  %v6140_v10 = vld [vmem:[#allocation8 + $0xb0] sm:$0xff]  }
 0x2bc   : > { %v1449_v27 = vadd.f32 %v1433_v13, %v601_v0  ;;  %v1434_v43 = vmax.f32 %v5762_v16, 0.0  ;;  %5304 = vmatprep.subr.bf16.mxu1 %v6128_v4  ;;  %v1487_v63 = vpack.c.bf16 %v6913_v7, %v6905_v22  ;;  %5340 = vmatprep.subr.bf16.mxu0 %v6138_v8  ;;  %v6141_v0 = vld [vmem:[#allocation8 + $0xb8] sm:$0xff]   ;;  %v6150_v13 = vld [vmem:[#allocation9 + $0x80] sm:$0xff]   ;;  %v6151_v16 = vld [vmem:[#allocation9 + $0x88] sm:$0xff]  }
 0x2bd   : > { %v1447_v32 = vadd.f32 %v1431_v14, %v593_v12  ;;  %v1432_v31 = vmax.f32 %v5763_v18, 0.0  ;;  %5288 = vmatprep.mubr.bf16.mxu1 %v1511_v45  ;;  %5341 = vmatpush3.bf16.msra.mxu0 %v6138_v8  ;;  %v6956_v12 = vld [vmem:[#allocation8 + $0xc0] sm:$0xff]   ;;  %v6152_v5 = vld [vmem:[#allocation9 + $0x90] sm:$0xff]   ;;  %v6154_v6 = vld [vmem:[#allocation9 + $0x98] sm:$0xff]  }
 0x2be   : > { %v6928_v35 = vmax.f32 %v1449_v27, 0.0  ;;  %v1450_v36 = vadd.f32 %v1434_v43, %v604_v2  ;;  %5289 = vmatmul.mubr.bf16.gmra.mrb[20].mxu1 %v1512_v61  ;;  %5342 = vmatprep.subr.bf16.mxu0 %v6139_v25  ;;  %v6156_v11 = vld [vmem:[#allocation9 + $0xa0] sm:$0xff]   ;;  %v6962_v26 = vld [vmem:[%s7496_s2 + $0x1] ss:$0 sm:$0xff]  ;;  %v6143_v8 = vld [vmem:[#allocation8 + $0xc8] sm:$0xff]  }
 0x2bf   : > { %v6930_v33 = vmax.f32 %v1447_v32, 0.0  ;;  %v1448_v37 = vadd.f32 %v1432_v31, %v596_v28  ;;  %5305 = vmatpush3.bf16.msra.mxu1 %v6128_v4 }
 0x2c0   : > { %1481 = vst [vmem:[#allocation2 + $0x78] sm:$0xff] %v6928_v35  ;;  %v6933_v9 = vmax.f32 %v1450_v36, 0.0  ;;  %5306 = vmatprep.subr.bf16.mxu1 %v6129_v29  ;;  %v1501_v39 = vld [vmem:[#allocation2 + $0x46] sm:$0xff] }
 0x2c1   : > { %1479 = vst [vmem:[#allocation2 + $0x68] sm:$0xff] %v6930_v33  ;;  %v6936_v15 = vmax.f32 %v1448_v37, 0.0  ;;  %v1504_v34 = vld [vmem:[#allocation2 + $0x5e] sm:$0xff]  ;;  %5343 = vmatpush3.bf16.msra.mxu0 %v6139_v25 }
 0x2c2   : > { %1482 = vst [vmem:[#allocation2 + $0x80] sm:$0xff] %v6933_v9  ;;  %v1502_v40 = vld [vmem:[#allocation2 + $0x4e] sm:$0xff]  ;;  %v1503_v17 = vld [vmem:[#allocation2 + $0x56] sm:$0xff]  ;;  %v1490_v4 = vpack.c.bf16 %v6933_v9, %v6928_v35  ;;  %5344 = vmatprep.subr.bf16.mxu0 %v6140_v10 }
 0x2c3   : > { %1480 = vst [vmem:[#allocation2 + $0x70] sm:$0xff] %v6936_v15  ;;  %5307 = vmatpush3.bf16.msra.mxu1 %v6129_v29  ;;  %v1513_v41 = vpack.c.bf16 %v1502_v40, %v1501_v39  ;;  %v1514_v46 = vpack.c.bf16 %v1504_v34, %v1503_v17  ;;  %v1489_v50 = vpack.c.bf16 %v6936_v15, %v6930_v33 }
 0x2c4   : > { %5308 = vmatprep.subr.bf16.mxu1 %v6130_v38 }
 0x2c5   : > { %5292 = vmatprep.mubr.bf16.mxu1 %v1513_v41  ;;  %5345 = vmatpush3.bf16.msra.mxu0 %v6140_v10 }
 0x2c6   : > { %5293 = vmatmul.mubr.bf16.gmra.mrb[24].mxu1 %v1514_v46  ;;  %5346 = vmatprep.subr.bf16.mxu0 %v6141_v0 }
 0x2c7   : > { %5309 = vmatpush3.bf16.msra.mxu1 %v6130_v38 }
 0x2c8   : > { %5310 = vmatprep.subr.bf16.mxu1 %v6131_v48  ;;  %v1505_v52 = vld [vmem:[#allocation2 + $0x66] sm:$0xff] }
 0x2c9   : > { %v1508_v51 = vld [vmem:[#allocation2 + $0x7e] sm:$0xff]  ;;  %5347 = vmatpush3.bf16.msra.mxu0 %v6141_v0 }
 0x2ca   : > { %v1506_v42 = vld [vmem:[#allocation2 + $0x6e] sm:$0xff]  ;;  %v1507_v44 = vld [vmem:[#allocation2 + $0x76] sm:$0xff]  ;;  %5364 = vmatprep.subr.bf16.mxu0 %v6956_v12 }
 0x2cb   : > { %5311 = vmatpush3.bf16.msra.mxu1 %v6131_v48  ;;  %v1515_v53 = vpack.c.bf16 %v1506_v42, %v1505_v52  ;;  %v1516_v54 = vpack.c.bf16 %v1508_v51, %v1507_v44 }
 0x2cc   : > { %5312 = vmatprep.subr.bf16.mxu1 %v6132_v49 }
 0x2cd   : > { %5296 = vmatprep.mubr.bf16.mxu1 %v1515_v53 }
 0x2ce   : > { %5297 = vmatmul.mubr.bf16.gmra.mrb[28].mxu1 %v1516_v54 }
 0x2cf   : > { %5313 = vmatpush3.bf16.msra.mxu1 %v6132_v49  ;;  %5316 = vmatprep.mubr.bf16.mxu1 %v1483_v56 }
 0x2d0   : > { %5314 = vmatprep.subr.bf16.mxu1 %v6133_v55 }
 0x2d3   : > { %5315 = vmatpush3.bf16.msra.mxu1 %v6133_v55 }
 0x2d4   : > { %5396 = vmatprep.subr.bf16.mxu1 %v6150_v13 }
 0x2d6   : > { %5317 = vmatmul.mubr.bf16.vlgmr.msra.gmra.mrb[16].mxu1 %v1484_v21 }
 0x2d7   : > { %5320 = vmatprep.mubr.bf16.mxu1 %v1485_v60  ;;  %5397 = vmatpush3.bf16.msra.mxu1 %v6150_v13 }
 0x2d8   : > { %5398 = vmatprep.subr.bf16.mxu1 %v6151_v16 }
 0x2db   : > { %5399 = vmatpush3.bf16.msra.mxu1 %v6151_v16 }
 0x2dc   : > { %5400 = vmatprep.subr.bf16.mxu1 %v6152_v5 }
 0x2de   : > { %5321 = vmatmul.mubr.bf16.gmra.mrb[20].mxu1 %v1486_v23 }
 0x2df   : > { %5324 = vmatprep.mubr.bf16.mxu1 %v1487_v63  ;;  %5401 = vmatpush3.bf16.msra.mxu1 %v6152_v5 }
 0x2e0   : > { %5402 = vmatprep.subr.bf16.mxu1 %v6154_v6 }
 0x2e3   : > { %5403 = vmatpush3.bf16.msra.mxu1 %v6154_v6 }
 0x2e4   : > { %5404 = vmatprep.subr.bf16.mxu1 %v6156_v11 }
 0x2e6   : > { %5325 = vmatmul.mubr.bf16.gmra.mrb[24].mxu1 %v1488_v24 }
 0x2e7   : > { %5328 = vmatprep.mubr.bf16.mxu1 %v1489_v50  ;;  %5405 = vmatpush3.bf16.msra.mxu1 %v6156_v11 }
 0x2ee   : > { %5329 = vmatmul.mubr.bf16.gmra.mrb[28].mxu1 %v1490_v4 }
 0x3a9   : > { %v5318_v14 = vpop.f32.mrb[16].mxu1 }
 0x3aa   : > { %v5764_v18 = vadd.f32 %v5318_v14, %v6962_v26  ;;  %v1800_v45 = vpop.f32.mrb[17].mxu1  ;;  %v6144_v14 = vld [vmem:[#allocation8 + $0xd0] sm:$0xff]  }
 0x3ab   : > { %v5765_v61 = vadd.f32 %v6962_v26, %v1800_v45  ;;  %v5319_v2 = vpop.f32.mrb[18].mxu1 }
 0x3ac   : > { %v1881_v27 = vmax.f32 %v5764_v18, 0.0  ;;  %v5766_v43 = vadd.f32 %v5319_v2, %v6962_v26  ;;  %v1803_v29 = vpop.f32.mrb[19].mxu1 }
 0x3ad   : > { %v1879_v28 = vmax.f32 %v5765_v61, 0.0  ;;  %v5767_v32 = vadd.f32 %v6962_v26, %v1803_v29 }
 0x3ae   : > { %1897 = vst [vmem:[#allocation2 + $0x18] sm:$0xff] %v1881_v27  ;;  %v1882_v31 = vmax.f32 %v5766_v43, 0.0 }
 0x3af   : > { %1895 = vst [vmem:[#allocation2 + $0x8] sm:$0xff] %v1879_v28  ;;  %v1880_v36 = vmax.f32 %v5767_v32, 0.0 }
 0x3b0   : > { %1898 = vst [vmem:[#allocation2 + $0x20] sm:$0xff] %v1882_v31  ;;  %v6968_v37 = vpack.c.bf16 %v1882_v31, %v1881_v27 }
 0x3b1   : > { %1896 = vst [vmem:[#allocation2 + $0x10] sm:$0xff] %v1880_v36  ;;  %v6970_v38 = vpack.c.bf16 %v1880_v36, %v1879_v28  ;;  %v5322_v34 = vpop.f32.mrb[20].mxu1 }
 0x3b2   : > { %v5768_v39 = vadd.f32 %v5322_v34, %v6962_v26  ;;  %v1816_v40 = vpop.f32.mrb[21].mxu1  ;;  %v6145_v34 = vld [vmem:[#allocation8 + $0xd8] sm:$0xff]  }
 0x3b3   : > { %v5769_v17 = vadd.f32 %v6962_v26, %v1816_v40  ;;  %v5323_v41 = vpop.f32.mrb[22].mxu1 }
 0x3b4   : > { %v1885_v46 = vmax.f32 %v5768_v39, 0.0  ;;  %v5770_v48 = vadd.f32 %v5323_v41, %v6962_v26  ;;  %v1819_v49 = vpop.f32.mrb[23].mxu1 }
 0x3b5   : > { %v1883_v51 = vmax.f32 %v5769_v17, 0.0  ;;  %v5771_v52 = vadd.f32 %v6962_v26, %v1819_v49 }
 0x3b6   : > { %1901 = vst [vmem:[#allocation2 + $0x38] sm:$0xff] %v1885_v46  ;;  %v1886_v42 = vmax.f32 %v5770_v48, 0.0  ;;  %v1921_v55 = vld [vmem:[#allocation2 + $0x6] sm:$0xff] }
 0x3b7   : > { %1899 = vst [vmem:[#allocation2 + $0x28] sm:$0xff] %v1883_v51  ;;  %v1884_v44 = vmax.f32 %v5771_v52, 0.0  ;;  %v1924_v53 = vld [vmem:[#allocation2 + $0x1e] sm:$0xff]  ;;  %v6146_v52 = vld [vmem:[#allocation8 + $0xe0] sm:$0xff]  }
 0x3b8   : > { %1902 = vst [vmem:[#allocation2 + $0x40] sm:$0xff] %v1886_v42  ;;  %v6976_v54 = vpack.c.bf16 %v1886_v42, %v1885_v46  ;;  %v1922_v56 = vld [vmem:[#allocation2 + $0xe] sm:$0xff]  ;;  %v1923_v21 = vld [vmem:[#allocation2 + $0x16] sm:$0xff] }
 0x3b9   : > { %1900 = vst [vmem:[#allocation2 + $0x30] sm:$0xff] %v1884_v44  ;;  %v6978_v60 = vpack.c.bf16 %v1884_v44, %v1883_v51  ;;  %v5326_v23 = vpop.f32.mrb[24].mxu1  ;;  %v1937_v63 = vpack.c.bf16 %v1922_v56, %v1921_v55  ;;  %v1938_v24 = vpack.c.bf16 %v1924_v53, %v1923_v21 }
 0x3ba   : > { %v5772_v50 = vadd.f32 %v5326_v23, %v6962_v26  ;;  %v1832_v4 = vpop.f32.mrb[25].mxu1 }
 0x3bb   : > { %v5773_v25 = vadd.f32 %v6962_v26, %v1832_v4  ;;  %v5327_v10 = vpop.f32.mrb[26].mxu1  ;;  %5348 = vmatprep.mubr.bf16.mxu0 %v1937_v63 }
 0x3bc   : > { %v1889_v0 = vmax.f32 %v5772_v50, 0.0  ;;  %v5774_v13 = vadd.f32 %v5327_v10, %v6962_v26  ;;  %v1835_v16 = vpop.f32.mrb[27].mxu1  ;;  %5349 = vmatmul.mubr.bf16.vlgmr.msra.gmra.mrb[32].mxu0 %v1938_v24  ;;  %v6148_v50 = vld [vmem:[#allocation8 + $0xf0] sm:$0xff]  }
 0x3bd   : > { %v1887_v5 = vmax.f32 %v5773_v25, 0.0  ;;  %v5775_v6 = vadd.f32 %v6962_v26, %v1835_v16  ;;  %5365 = vmatpush3.bf16.msra.mxu0 %v6956_v12  ;;  %v6149_v16 = vld [vmem:[#allocation8 + $0xf8] sm:$0xff]  }
 0x3be   : > { %1905 = vst [vmem:[#allocation2 + $0x58] sm:$0xff] %v1889_v0  ;;  %v1890_v11 = vmax.f32 %v5774_v13, 0.0  ;;  %5366 = vmatprep.subr.bf16.mxu0 %v6143_v8  ;;  %v1925_v2 = vld [vmem:[#allocation2 + $0x26] sm:$0xff] }
 0x3bf   : > { %1903 = vst [vmem:[#allocation2 + $0x48] sm:$0xff] %v1887_v5  ;;  %v1888_v18 = vmax.f32 %v5775_v6, 0.0  ;;  %v1928_v45 = vld [vmem:[#allocation2 + $0x3e] sm:$0xff]  ;;  %v6155_v6 = vld [vmem:[#allocation6 + $0x108] sm:$0xff]  }
 0x3c0   : > { %1906 = vst [vmem:[#allocation2 + $0x60] sm:$0xff] %v1890_v11  ;;  %v6985_v61 = vpack.c.bf16 %v1890_v11, %v1889_v0  ;;  %v1926_v27 = vld [vmem:[#allocation2 + $0x2e] sm:$0xff]  ;;  %v1927_v43 = vld [vmem:[#allocation2 + $0x36] sm:$0xff] }
 0x3c1   : > { %1904 = vst [vmem:[#allocation2 + $0x50] sm:$0xff] %v1888_v18  ;;  %v6987_v29 = vpack.c.bf16 %v1888_v18, %v1887_v5  ;;  %v5330_v28 = vpop.f32.mrb[28].mxu1  ;;  %5367 = vmatpush3.bf16.msra.mxu0 %v6143_v8  ;;  %v1939_v32 = vpack.c.bf16 %v1926_v27, %v1925_v2  ;;  %v1940_v12 = vpack.c.bf16 %v1928_v45, %v1927_v43  ;;  %v6153_v5 = vld [vmem:[#allocation6 + $0x100] sm:$0xff]   ;;  %v6157_v11 = vld [vmem:[#allocation6 + $0x110] sm:$0xff]   ;;  %v6163_v18 = vld [vmem:[#allocation6 + $0x128] sm:$0xff]  }
 0x3c2   : > { %v5776_v31 = vadd.f32 %v5330_v28, %v6962_v26  ;;  %v1848_v36 = vpop.f32.mrb[29].mxu1  ;;  %5368 = vmatprep.subr.bf16.mxu0 %v6144_v14  ;;  %v6164_v45 = vld [vmem:[#allocation6 + $0x130] sm:$0xff]   ;;  %v6999_v2 = vld [vmem:[#allocation6 + $0x140] sm:$0xff]   ;;  %v7005_v27 = vld [vmem:[%s7498_s4 + $0x1] ss:$0 sm:$0xff] }
 0x3c3   : > { %v5777_v39 = vadd.f32 %v6962_v26, %v1848_v36  ;;  %v5331_v40 = vpop.f32.mrb[30].mxu1  ;;  %5352 = vmatprep.mubr.bf16.mxu0 %v1939_v32 }
 0x3c4   : > { %v1893_v17 = vmax.f32 %v5776_v31, 0.0  ;;  %v5778_v41 = vadd.f32 %v5331_v40, %v6962_v26  ;;  %v1851_v46 = vpop.f32.mrb[31].mxu1  ;;  %5353 = vmatmul.mubr.bf16.gmra.mrb[36].mxu0 %v1940_v12 }
 0x3c5   : > { %v1891_v48 = vmax.f32 %v5777_v39, 0.0  ;;  %v5779_v49 = vadd.f32 %v6962_v26, %v1851_v46  ;;  %5369 = vmatpush3.bf16.msra.mxu0 %v6144_v14  ;;  %v6147_v26 = vld [vmem:[#allocation8 + $0xe8] sm:$0xff]   ;;  %v6159_v14 = vld [vmem:[#allocation6 + $0x118] sm:$0xff]  }
 0x3c6   : > { %1909 = vst [vmem:[#allocation2 + $0x78] sm:$0xff] %v1893_v17  ;;  %v1894_v51 = vmax.f32 %v5778_v41, 0.0  ;;  %5370 = vmatprep.subr.bf16.mxu0 %v6145_v34  ;;  %v1929_v55 = vld [vmem:[#allocation2 + $0x46] sm:$0xff] }
 0x3c7   : > { %1907 = vst [vmem:[#allocation2 + $0x68] sm:$0xff] %v1891_v48  ;;  %v1892_v42 = vmax.f32 %v5779_v49, 0.0  ;;  %v1932_v44 = vld [vmem:[#allocation2 + $0x5e] sm:$0xff] }
 0x3c8   : > { %1910 = vst [vmem:[#allocation2 + $0x80] sm:$0xff] %v1894_v51  ;;  %v1918_v53 = vpack.c.bf16 %v1894_v51, %v1893_v17  ;;  %v1930_v56 = vld [vmem:[#allocation2 + $0x4e] sm:$0xff]  ;;  %v1931_v21 = vld [vmem:[#allocation2 + $0x56] sm:$0xff] }
 0x3c9   : > { %1908 = vst [vmem:[#allocation2 + $0x70] sm:$0xff] %v1892_v42  ;;  %v1917_v23 = vpack.c.bf16 %v1892_v42, %v1891_v48  ;;  %5371 = vmatpush3.bf16.msra.mxu0 %v6145_v34  ;;  %v1941_v63 = vpack.c.bf16 %v1930_v56, %v1929_v55  ;;  %v1942_v24 = vpack.c.bf16 %v1932_v44, %v1931_v21 }
 0x3ca   : > { %5372 = vmatprep.subr.bf16.mxu0 %v6146_v52 }
 0x3cb   : > { %5356 = vmatprep.mubr.bf16.mxu0 %v1941_v63 }
 0x3cc   : > { %5357 = vmatmul.mubr.bf16.gmra.mrb[40].mxu0 %v1942_v24 }
 0x3cd   : > { %5373 = vmatpush3.bf16.msra.mxu0 %v6146_v52 }
 0x3ce   : > { %5374 = vmatprep.subr.bf16.mxu0 %v6147_v26  ;;  %v1933_v8 = vld [vmem:[#allocation2 + $0x66] sm:$0xff] }
 0x3cf   : > { %v1936_v4 = vld [vmem:[#allocation2 + $0x7e] sm:$0xff] }
 0x3d0   : > { %v1934_v25 = vld [vmem:[#allocation2 + $0x6e] sm:$0xff]  ;;  %v1935_v10 = vld [vmem:[#allocation2 + $0x76] sm:$0xff] }
 0x3d1   : > { %5375 = vmatpush3.bf16.msra.mxu0 %v6147_v26  ;;  %v1943_v0 = vpack.c.bf16 %v1934_v25, %v1933_v8  ;;  %v1944_v13 = vpack.c.bf16 %v1936_v4, %v1935_v10 }
 0x3d2   : > { %5376 = vmatprep.subr.bf16.mxu0 %v6148_v50 }
 0x3d3   : > { %5360 = vmatprep.mubr.bf16.mxu0 %v1943_v0 }
 0x3d4   : > { %5361 = vmatmul.mubr.bf16.gmra.mrb[44].mxu0 %v1944_v13 }
 0x3d5   : > { %5377 = vmatpush3.bf16.msra.mxu0 %v6148_v50  ;;  %5380 = vmatprep.mubr.bf16.mxu0 %v6970_v38  ;;  %v6158_v38 = vld [vmem:[#allocation9 + $0xa8] sm:$0xff]  }
 0x3d6   : > { %5378 = vmatprep.subr.bf16.mxu0 %v6149_v16  ;;  %5406 = vmatprep.subr.bf16.mxu1 %v6158_v38 }
 0x3d7   : > { %5407 = vmatpush3.bf16.msra.mxu1 %v6158_v38 }
 0x3d9   : > { %5379 = vmatpush3.bf16.msra.mxu0 %v6149_v16 }
 0x3da   : > { %5428 = vmatprep.subr.bf16.mxu0 %v6153_v5 }
 0x3dc   : > { %5381 = vmatmul.mubr.bf16.vlgmr.msra.gmra.mrb[32].mxu0 %v6968_v37  ;;  %v6160_v37 = vld [vmem:[#allocation9 + $0xb0] sm:$0xff]  }
 0x3dd   : > { %5384 = vmatprep.mubr.bf16.mxu0 %v6978_v60  ;;  %5429 = vmatpush3.bf16.msra.mxu0 %v6153_v5  ;;  %v6161_v60 = vld [vmem:[#allocation6 + $0x120] sm:$0xff]  }
 0x3de   : > { %5430 = vmatprep.subr.bf16.mxu0 %v6155_v6  ;;  %5408 = vmatprep.subr.bf16.mxu1 %v6160_v37 }
 0x3df   : > { %5409 = vmatpush3.bf16.msra.mxu1 %v6160_v37 }
 0x3e1   : > { %5431 = vmatpush3.bf16.msra.mxu0 %v6155_v6 }
 0x3e2   : > { %5432 = vmatprep.subr.bf16.mxu0 %v6157_v11 }
 0x3e4   : > { %5385 = vmatmul.mubr.bf16.gmra.mrb[36].mxu0 %v6976_v54  ;;  %v6162_v54 = vld [vmem:[#allocation9 + $0xb8] sm:$0xff]  }
 0x3e5   : > { %5388 = vmatprep.mubr.bf16.mxu0 %v6987_v29  ;;  %5433 = vmatpush3.bf16.msra.mxu0 %v6157_v11 }
 0x3e6   : > { %5434 = vmatprep.subr.bf16.mxu0 %v6159_v14  ;;  %5410 = vmatprep.subr.bf16.mxu1 %v6162_v54 }
 0x3e7   : > { %5411 = vmatpush3.bf16.msra.mxu1 %v6162_v54 }
 0x3e9   : > { %5435 = vmatpush3.bf16.msra.mxu0 %v6159_v14 }
 0x3ea   : > { %5436 = vmatprep.subr.bf16.mxu0 %v6161_v60 }
 0x3ec   : > { %5389 = vmatmul.mubr.bf16.gmra.mrb[40].mxu0 %v6985_v61  ;;  %v6165_v61 = vld [vmem:[#allocation6 + $0x138] sm:$0xff]  }
 0x3ed   : > { %5392 = vmatprep.mubr.bf16.mxu0 %v1917_v23  ;;  %5437 = vmatpush3.bf16.msra.mxu0 %v6161_v60 }
 0x3ee   : > { %5438 = vmatprep.subr.bf16.mxu0 %v6163_v18 }
 0x3f1   : > { %5439 = vmatpush3.bf16.msra.mxu0 %v6163_v18 }
 0x3f2   : > { %5440 = vmatprep.subr.bf16.mxu0 %v6164_v45 }
 0x3f4   : > { %5393 = vmatmul.mubr.bf16.gmra.mrb[44].mxu0 %v1918_v53 }
 0x3f5   : > { %5441 = vmatpush3.bf16.msra.mxu0 %v6164_v45 }
 0x3f6   : > { %5442 = vmatprep.subr.bf16.mxu0 %v6165_v61 }
 0x3f9   : > { %5443 = vmatpush3.bf16.msra.mxu0 %v6165_v61 }
 0x3fa   : > { %5460 = vmatprep.subr.bf16.mxu0 %v6999_v2 }
 0x4af   : > { %v5382_v43 = vpop.f32.mrb[32].mxu0 }
 0x4b0   : > { %v5780_v29 = vadd.f32 %v5382_v43, %v7005_v27  ;;  %v2228_v28 = vpop.f32.mrb[33].mxu0 }
 0x4b1   : > { %v5781_v32 = vadd.f32 %v7005_v27, %v2228_v28  ;;  %v5383_v12 = vpop.f32.mrb[34].mxu0 }
 0x4b2   : > { %v2309_v31 = vmax.f32 %v5780_v29, 0.0  ;;  %v5782_v36 = vadd.f32 %v5383_v12, %v7005_v27  ;;  %v2231_v34 = vpop.f32.mrb[35].mxu0 }
 0x4b3   : > { %v2307_v39 = vmax.f32 %v5781_v32, 0.0  ;;  %v5783_v40 = vadd.f32 %v7005_v27, %v2231_v34 }
 0x4b4   : > { %v2325_v17 = vadd.f32 %v2309_v31, %v6855_v57  ;;  %v2310_v41 = vmax.f32 %v5782_v36, 0.0 }
 0x4b5   : > { %v2323_v46 = vadd.f32 %v2307_v39, %v6857_v59  ;;  %v2308_v48 = vmax.f32 %v5783_v40, 0.0  ;;  %v6167_v39 = vld [vmem:[#allocation6 + $0x148] sm:$0xff]  }
 0x4b6   : > { %v2341_v49 = vmax.f32 %v2325_v17, 0.0  ;;  %v2326_v51 = vadd.f32 %v2310_v41, %v6860_v62 }
 0x4b7   : > { %v2339_v52 = vmax.f32 %v2323_v46, 0.0  ;;  %v2324_v42 = vadd.f32 %v2308_v48, %v6864_v1  ;;  %v5386_v44 = vpop.f32.mrb[36].mxu0 }
 0x4b8   : > { %2357 = vst [vmem:[#allocation2 + $0x18] sm:$0xff] %v2341_v49  ;;  %v2342_v53 = vmax.f32 %v2326_v51, 0.0  ;;  %v5784_v55 = vadd.f32 %v5386_v44, %v7005_v27  ;;  %v2244_v56 = vpop.f32.mrb[37].mxu0 }
 0x4b9   : > { %2355 = vst [vmem:[#allocation2 + $0x8] sm:$0xff] %v2339_v52  ;;  %v2340_v21 = vmax.f32 %v2324_v42, 0.0  ;;  %v5785_v57 = vadd.f32 %v7005_v27, %v2244_v56  ;;  %v5387_v23 = vpop.f32.mrb[38].mxu0  ;;  %v6168_v42 = vld [vmem:[#allocation6 + $0x150] sm:$0xff]  }
 0x4ba   : > { %v7017_v63 = vpack.c.bf16 %v2342_v53, %v2341_v49  ;;  %2358 = vst [vmem:[#allocation2 + $0x20] sm:$0xff] %v2342_v53  ;;  %v2313_v59 = vmax.f32 %v5784_v55, 0.0  ;;  %v5786_v62 = vadd.f32 %v5387_v23, %v7005_v27  ;;  %v2247_v24 = vpop.f32.mrb[39].mxu0 }
 0x4bb   : > { %2356 = vst [vmem:[#allocation2 + $0x10] sm:$0xff] %v2340_v21  ;;  %v2311_v1 = vmax.f32 %v5785_v57, 0.0  ;;  %v5787_v26 = vadd.f32 %v7005_v27, %v2247_v24  ;;  %v7021_v50 = vpack.c.bf16 %v2340_v21, %v2339_v52 }
 0x4bc   : > { %v2329_v4 = vadd.f32 %v2313_v59, %v6879_v19  ;;  %v2314_v8 = vmax.f32 %v5786_v62, 0.0 }
 0x4bd   : > { %v2327_v25 = vadd.f32 %v2311_v1, %v6881_v20  ;;  %v2312_v10 = vmax.f32 %v5787_v26, 0.0  ;;  %5412 = vmatprep.mubr.bf16.mxu1 %v7021_v50 }
 0x4be   : > { %v2345_v0 = vmax.f32 %v2329_v4, 0.0  ;;  %v2330_v13 = vadd.f32 %v2314_v8, %v6884_v3  ;;  %5413 = vmatmul.mubr.bf16.vlgmr.msra.gmra.mrb[32].mxu1 %v7017_v63 }
 0x4bf   : > { %v2343_v16 = vmax.f32 %v2327_v25, 0.0  ;;  %v2328_v5 = vadd.f32 %v2312_v10, %v6888_v30  ;;  %v5390_v6 = vpop.f32.mrb[40].mxu0  ;;  %v6169_v10 = vld [vmem:[#allocation6 + $0x158] sm:$0xff]  }
 0x4c0   : > { %2361 = vst [vmem:[#allocation2 + $0x38] sm:$0xff] %v2345_v0  ;;  %v2346_v11 = vmax.f32 %v2330_v13, 0.0  ;;  %v5788_v38 = vadd.f32 %v5390_v6, %v7005_v27  ;;  %v2260_v19 = vpop.f32.mrb[41].mxu0  ;;  %v2551_v45 = vld [vmem:[#allocation2 + $0x4] sm:$0xff] }
 0x4c1   : > { %2359 = vst [vmem:[#allocation2 + $0x28] sm:$0xff] %v2343_v16  ;;  %v2344_v14 = vmax.f32 %v2328_v5, 0.0  ;;  %v5789_v20 = vadd.f32 %v7005_v27, %v2260_v19  ;;  %v5391_v37 = vpop.f32.mrb[42].mxu0  ;;  %v2554_v60 = vld [vmem:[#allocation2 + $0x1c] sm:$0xff] }
 0x4c2   : > { %2362 = vst [vmem:[#allocation2 + $0x40] sm:$0xff] %v2346_v11  ;;  %v2317_v54 = vmax.f32 %v5788_v38, 0.0  ;;  %v5790_v3 = vadd.f32 %v5391_v37, %v7005_v27  ;;  %v2263_v18 = vpop.f32.mrb[43].mxu0  ;;  %v2552_v61 = vld [vmem:[#allocation2 + $0xc] sm:$0xff]  ;;  %v7032_v30 = vpack.c.bf16 %v2346_v11, %v2345_v0  ;;  %v2553_v43 = vld [vmem:[#allocation2 + $0x14] sm:$0xff] }
 0x4c3   : > { %2360 = vst [vmem:[#allocation2 + $0x30] sm:$0xff] %v2344_v14  ;;  %v2315_v29 = vmax.f32 %v5789_v20, 0.0  ;;  %v5791_v28 = vadd.f32 %v7005_v27, %v2263_v18  ;;  %v7035_v32 = vpack.c.bf16 %v2344_v14, %v2343_v16  ;;  %v2567_v12 = vpack.c.bf16 %v2552_v61, %v2551_v45  ;;  %v6170_v11 = vld [vmem:[#allocation6 + $0x160] sm:$0xff]  }
 0x4c4   : > { %v2333_v31 = vadd.f32 %v2317_v54, %v6903_v58  ;;  %v2318_v36 = vmax.f32 %v5790_v3, 0.0  ;;  %v2568_v34 = vpack.c.bf16 %v2554_v60, %v2553_v43  ;;  %v6172_v3 = vld [vmem:[#allocation6 + $0x170] sm:$0xff]  }
 0x4c5   : > { %v2331_v40 = vadd.f32 %v2315_v29, %v6905_v22  ;;  %v2316_v17 = vmax.f32 %v5791_v28, 0.0  ;;  %5416 = vmatprep.mubr.bf16.mxu1 %v7035_v32  ;;  %5444 = vmatprep.mubr.bf16.mxu0 %v2567_v12  ;;  %v6173_v12 = vld [vmem:[#allocation6 + $0x178] sm:$0xff]  }
 0x4c6   : > { %v2349_v41 = vmax.f32 %v2333_v31, 0.0  ;;  %v2334_v46 = vadd.f32 %v2318_v36, %v6909_v47  ;;  %5417 = vmatmul.mubr.bf16.gmra.mrb[36].mxu1 %v7032_v30  ;;  %5445 = vmatmul.mubr.bf16.vlgmr.msra.gmra.mrb[48].mxu0 %v2568_v34  ;;  %v6174_v31 = vld [vmem:[#allocation8 + $0x100] sm:$0xff]   ;;  %v6175_v36 = vld [vmem:[#allocation8 + $0x108] sm:$0xff]   ;;  %v6176_v34 = vld [vmem:[#allocation8 + $0x110] sm:$0xff]  }
 0x4c7   : > { %v2347_v48 = vmax.f32 %v2331_v40, 0.0  ;;  %v2332_v49 = vadd.f32 %v2316_v17, %v6913_v7  ;;  %v5394_v51 = vpop.f32.mrb[44].mxu0  ;;  %5461 = vmatpush3.bf16.msra.mxu0 %v6999_v2  ;;  %5492 = vmatprep.subr.bf16.mxu1 %v6174_v31  ;;  %v7060_v40 = vld [vmem:[#allocation8 + $0x140] sm:$0xff]  }
 0x4c8   : > { %2365 = vst [vmem:[#allocation2 + $0x58] sm:$0xff] %v2349_v41  ;;  %v2350_v58 = vmax.f32 %v2334_v46, 0.0  ;;  %v5792_v22 = vadd.f32 %v5394_v51, %v7005_v27  ;;  %v2276_v52 = vpop.f32.mrb[45].mxu0  ;;  %5462 = vmatprep.subr.bf16.mxu0 %v6167_v39  ;;  %v2555_v57 = vld [vmem:[#allocation2 + $0x24] sm:$0xff]  ;;  %5493 = vmatpush3.bf16.msra.mxu1 %v6174_v31  ;;  %v6193_v46 = vld [vmem:[#allocation9 + $0xd0] sm:$0xff]  }
 0x4c9   : > { %2363 = vst [vmem:[#allocation2 + $0x48] sm:$0xff] %v2347_v48  ;;  %v2348_v44 = vmax.f32 %v2332_v49, 0.0  ;;  %v5793_v47 = vadd.f32 %v7005_v27, %v2276_v52  ;;  %v5395_v53 = vpop.f32.mrb[46].mxu0  ;;  %v2558_v55 = vld [vmem:[#allocation2 + $0x3c] sm:$0xff]  ;;  %5494 = vmatprep.subr.bf16.mxu1 %v6175_v36  ;;  %v6190_v17 = vld [vmem:[#allocation9 + $0xc0] sm:$0xff]  }
 0x4ca   : > { %2366 = vst [vmem:[#allocation2 + $0x60] sm:$0xff] %v2350_v58  ;;  %v2321_v56 = vmax.f32 %v5792_v22, 0.0  ;;  %v5794_v7 = vadd.f32 %v5395_v53, %v7005_v27  ;;  %v2279_v21 = vpop.f32.mrb[47].mxu0  ;;  %v2556_v2 = vld [vmem:[#allocation2 + $0x2c] sm:$0xff]  ;;  %v7047_v23 = vpack.c.bf16 %v2350_v58, %v2349_v41  ;;  %v2557_v59 = vld [vmem:[#allocation2 + $0x34] sm:$0xff] }
 0x4cb   : > { %2364 = vst [vmem:[#allocation2 + $0x50] sm:$0xff] %v2348_v44  ;;  %v2319_v62 = vmax.f32 %v5793_v47, 0.0  ;;  %v5795_v24 = vadd.f32 %v7005_v27, %v2279_v21  ;;  %5463 = vmatpush3.bf16.msra.mxu0 %v6167_v39  ;;  %v2375_v1 = vpack.c.bf16 %v2348_v44, %v2347_v48  ;;  %v2569_v26 = vpack.c.bf16 %v2556_v2, %v2555_v57  ;;  %v6181_v39 = vld [vmem:[#allocation8 + $0x138] sm:$0xff]   ;;  %v6191_v41 = vld [vmem:[#allocation9 + $0xc8] sm:$0xff]   ;;  %v6197_v49 = vld [vmem:[#allocation9 + $0xe0] sm:$0xff]  }
 0x4cc   : > { %v2337_v4 = vadd.f32 %v2321_v56, %v6928_v35  ;;  %v2322_v8 = vmax.f32 %v5794_v7, 0.0  ;;  %v2570_v25 = vpack.c.bf16 %v2558_v55, %v2557_v59  ;;  %5464 = vmatprep.subr.bf16.mxu0 %v6168_v42  ;;  %5495 = vmatpush3.bf16.msra.mxu1 %v6175_v36  ;;  %v6195_v48 = vld [vmem:[#allocation9 + $0xd8] sm:$0xff]  }
 0x4cd   : > { %v2335_v0 = vadd.f32 %v2319_v62, %v6930_v33  ;;  %v2320_v13 = vmax.f32 %v5795_v24, 0.0  ;;  %5420 = vmatprep.mubr.bf16.mxu1 %v2375_v1  ;;  %5448 = vmatprep.mubr.bf16.mxu0 %v2569_v26  ;;  %v7098_v62 = vld [vmem:[%s7496_s2 + $0x2] ss:$0 sm:$0xff] }
 0x4ce   : > { %v2353_v16 = vmax.f32 %v2337_v4, 0.0  ;;  %v2338_v5 = vadd.f32 %v2322_v8, %v6933_v9  ;;  %5421 = vmatmul.mubr.bf16.gmra.mrb[40].mxu1 %v7047_v23  ;;  %5449 = vmatmul.mubr.bf16.gmra.mrb[52].mxu0 %v2570_v25 }
 0x4cf   : > { %v2351_v27 = vmax.f32 %v2335_v0, 0.0  ;;  %v2336_v6 = vadd.f32 %v2320_v13, %v6936_v15  ;;  %5465 = vmatpush3.bf16.msra.mxu0 %v6168_v42  ;;  %v6171_v15 = vld [vmem:[#allocation6 + $0x168] sm:$0xff]   ;;  %5496 = vmatprep.subr.bf16.mxu1 %v6176_v34 }
 0x4d0   : > { %2369 = vst [vmem:[#allocation2 + $0x78] sm:$0xff] %v2353_v16  ;;  %v2354_v35 = vmax.f32 %v2338_v5, 0.0  ;;  %5466 = vmatprep.subr.bf16.mxu0 %v6169_v10  ;;  %v2559_v19 = vld [vmem:[#allocation2 + $0x44] sm:$0xff]  ;;  %5497 = vmatpush3.bf16.msra.mxu1 %v6176_v34 }
 0x4d1   : > { %2367 = vst [vmem:[#allocation2 + $0x68] sm:$0xff] %v2351_v27  ;;  %v2352_v38 = vmax.f32 %v2336_v6, 0.0  ;;  %v2562_v33 = vld [vmem:[#allocation2 + $0x5c] sm:$0xff] }
 0x4d2   : > { %2370 = vst [vmem:[#allocation2 + $0x80] sm:$0xff] %v2354_v35  ;;  %v2560_v14 = vld [vmem:[#allocation2 + $0x4c] sm:$0xff]  ;;  %v2378_v20 = vpack.c.bf16 %v2354_v35, %v2353_v16  ;;  %v2561_v37 = vld [vmem:[#allocation2 + $0x54] sm:$0xff] }
 0x4d3   : > { %2368 = vst [vmem:[#allocation2 + $0x70] sm:$0xff] %v2352_v38  ;;  %5467 = vmatpush3.bf16.msra.mxu0 %v6169_v10  ;;  %v2377_v9 = vpack.c.bf16 %v2352_v38, %v2351_v27  ;;  %v2571_v60 = vpack.c.bf16 %v2560_v14, %v2559_v19  ;;  %v2572_v54 = vpack.c.bf16 %v2562_v33, %v2561_v37 }
 0x4d4   : > { %5468 = vmatprep.subr.bf16.mxu0 %v6170_v11 }
 0x4d5   : > { %5424 = vmatprep.mubr.bf16.mxu1 %v2377_v9  ;;  %5452 = vmatprep.mubr.bf16.mxu0 %v2571_v60 }
 0x4d6   : > { %5425 = vmatmul.mubr.bf16.gmra.mrb[44].mxu1 %v2378_v20  ;;  %5453 = vmatmul.mubr.bf16.gmra.mrb[56].mxu0 %v2572_v54 }
 0x4d7   : > { %5469 = vmatpush3.bf16.msra.mxu0 %v6170_v11 }
 0x4d8   : > { %5470 = vmatprep.subr.bf16.mxu0 %v6171_v15  ;;  %v2563_v45 = vld [vmem:[#allocation2 + $0x64] sm:$0xff] }
 0x4d9   : > { %v2566_v18 = vld [vmem:[#allocation2 + $0x7c] sm:$0xff] }
 0x4da   : > { %v2564_v61 = vld [vmem:[#allocation2 + $0x6c] sm:$0xff]  ;;  %v2565_v43 = vld [vmem:[#allocation2 + $0x74] sm:$0xff] }
 0x4db   : > { %5471 = vmatpush3.bf16.msra.mxu0 %v6171_v15  ;;  %v2573_v29 = vpack.c.bf16 %v2564_v61, %v2563_v45  ;;  %v2574_v28 = vpack.c.bf16 %v2566_v18, %v2565_v43 }
 0x4dc   : > { %5472 = vmatprep.subr.bf16.mxu0 %v6172_v3 }
 0x4dd   : > { %5456 = vmatprep.mubr.bf16.mxu0 %v2573_v29 }
 0x4de   : > { %5457 = vmatmul.mubr.bf16.gmra.mrb[60].mxu0 %v2574_v28 }
 0x4df   : > { %5473 = vmatpush3.bf16.msra.mxu0 %v6172_v3  ;;  %5476 = vmatprep.mubr.bf16.mxu0 %v7021_v50  ;;  %v6177_v50 = vld [vmem:[#allocation8 + $0x118] sm:$0xff]  }
 0x4e0   : > { %5474 = vmatprep.subr.bf16.mxu0 %v6173_v12  ;;  %5498 = vmatprep.subr.bf16.mxu1 %v6177_v50 }
 0x4e1   : > { %5499 = vmatpush3.bf16.msra.mxu1 %v6177_v50 }
 0x4e3   : > { %5475 = vmatpush3.bf16.msra.mxu0 %v6173_v12 }
 0x4e4   : > { %5556 = vmatprep.subr.bf16.mxu0 %v6190_v17 }
 0x4e6   : > { %5477 = vmatmul.mubr.bf16.vlgmr.msra.gmra.mrb[48].mxu0 %v7017_v63  ;;  %v6178_v63 = vld [vmem:[#allocation8 + $0x120] sm:$0xff]  }
 0x4e7   : > { %5480 = vmatprep.mubr.bf16.mxu0 %v7035_v32  ;;  %5500 = vmatprep.subr.bf16.mxu1 %v6178_v63  ;;  %v6180_v32 = vld [vmem:[#allocation8 + $0x130] sm:$0xff]  }
 0x4e8   : > { %5501 = vmatpush3.bf16.msra.mxu1 %v6178_v63  ;;  %5557 = vmatpush3.bf16.msra.mxu0 %v6190_v17  ;;  %v6183_v63 = vld [vmem:[#allocation8 + $0x148] sm:$0xff]  }
 0x4e9   : > { %5558 = vmatprep.subr.bf16.mxu0 %v6191_v41 }
 0x4ec   : > { %5559 = vmatpush3.bf16.msra.mxu0 %v6191_v41 }
 0x4ed   : > { %5560 = vmatprep.subr.bf16.mxu0 %v6193_v46 }
 0x4ee   : > { %5481 = vmatmul.mubr.bf16.gmra.mrb[52].mxu0 %v7032_v30  ;;  %v6179_v30 = vld [vmem:[#allocation8 + $0x128] sm:$0xff]  }
 0x4ef   : > { %5484 = vmatprep.mubr.bf16.mxu0 %v2375_v1  ;;  %5502 = vmatprep.subr.bf16.mxu1 %v6179_v30 }
 0x4f0   : > { %5503 = vmatpush3.bf16.msra.mxu1 %v6179_v30  ;;  %5561 = vmatpush3.bf16.msra.mxu0 %v6193_v46 }
 0x4f1   : > { %5504 = vmatprep.subr.bf16.mxu1 %v6180_v32  ;;  %5562 = vmatprep.subr.bf16.mxu0 %v6195_v48 }
 0x4f4   : > { %5505 = vmatpush3.bf16.msra.mxu1 %v6180_v32  ;;  %5563 = vmatpush3.bf16.msra.mxu0 %v6195_v48 }
 0x4f5   : > { %5506 = vmatprep.subr.bf16.mxu1 %v6181_v39  ;;  %5564 = vmatprep.subr.bf16.mxu0 %v6197_v49 }
 0x4f6   : > { %5485 = vmatmul.mubr.bf16.gmra.mrb[56].mxu0 %v7047_v23 }
 0x4f7   : > { %5488 = vmatprep.mubr.bf16.mxu0 %v2377_v9 }
 0x4f8   : > { %5507 = vmatpush3.bf16.msra.mxu1 %v6181_v39  ;;  %5565 = vmatpush3.bf16.msra.mxu0 %v6197_v49 }
 0x4f9   : > { %5524 = vmatprep.subr.bf16.mxu1 %v7060_v40 }
 0x4fe   : > { %5489 = vmatmul.mubr.bf16.gmra.mrb[60].mxu0 %v2378_v20 }
 0x591   : > { %v7063_v51 = vpop.f32.mrb[32].mxu1 }
 0x592   : > { %v7065_v58 = vpop.f32.mrb[33].mxu1 }
 0x593   : > { %v7067_v22 = vpop.f32.mrb[34].mxu1 }
 0x594   : > { %v7069_v52 = vpop.f32.mrb[35].mxu1 }
 0x599   : > { %v7071_v42 = vpop.f32.mrb[36].mxu1 }
 0x59a   : > { %v7073_v44 = vpop.f32.mrb[37].mxu1 }
 0x59b   : > { %v7075_v47 = vpop.f32.mrb[38].mxu1 }
 0x59c   : > { %v7077_v53 = vpop.f32.mrb[39].mxu1 }
 0x5a1   : > { %v7079_v55 = vpop.f32.mrb[40].mxu1 }
 0x5a2   : > { %v7081_v56 = vpop.f32.mrb[41].mxu1 }
 0x5a3   : > { %v7083_v7 = vpop.f32.mrb[42].mxu1 }
 0x5a4   : > { %v7085_v21 = vpop.f32.mrb[43].mxu1 }
 0x5a9   : > { %v7087_v57 = vpop.f32.mrb[44].mxu1 }
 0x5aa   : > { %v7089_v2 = vpop.f32.mrb[45].mxu1 }
 0x5ab   : > { %v7091_v23 = vpop.f32.mrb[46].mxu1 }
 0x5ac   : > { %v7093_v59 = vpop.f32.mrb[47].mxu1 }
 0x5b9   : > { %v5478_v24 = vpop.f32.mrb[48].mxu0 }
 0x5ba   : > { %v5796_v1 = vadd.f32 %v5478_v24, %v7098_v62  ;;  %v2858_v26 = vpop.f32.mrb[49].mxu0  ;;  %v6184_v24 = vld [vmem:[#allocation8 + $0x150] sm:$0xff]  }
 0x5bb   : > { %v5797_v4 = vadd.f32 %v7098_v62, %v2858_v26  ;;  %v5479_v8 = vpop.f32.mrb[50].mxu0 }
 0x5bc   : > { %v2939_v25 = vmax.f32 %v5796_v1, 0.0  ;;  %v5798_v10 = vadd.f32 %v5479_v8, %v7098_v62  ;;  %v2861_v0 = vpop.f32.mrb[51].mxu0 }
 0x5bd   : > { %v2937_v13 = vmax.f32 %v5797_v4, 0.0  ;;  %v5799_v16 = vadd.f32 %v7098_v62, %v2861_v0 }
 0x5be   : > { %2955 = vst [vmem:[#allocation2 + $0x18] sm:$0xff] %v2939_v25  ;;  %v2940_v5 = vmax.f32 %v5798_v10, 0.0 }
 0x5bf   : > { %2953 = vst [vmem:[#allocation2 + $0x8] sm:$0xff] %v2937_v13  ;;  %v2938_v27 = vmax.f32 %v5799_v16, 0.0 }
 0x5c0   : > { %v7104_v6 = vpack.c.bf16 %v2940_v5, %v2939_v25  ;;  %2956 = vst [vmem:[#allocation2 + $0x20] sm:$0xff] %v2940_v5 }
 0x5c1   : > { %v7106_v35 = vpack.c.bf16 %v2938_v27, %v2937_v13  ;;  %2954 = vst [vmem:[#allocation2 + $0x10] sm:$0xff] %v2938_v27  ;;  %v5482_v11 = vpop.f32.mrb[52].mxu0 }
 0x5c2   : > { %v5800_v38 = vadd.f32 %v5482_v11, %v7098_v62  ;;  %v2874_v33 = vpop.f32.mrb[53].mxu0  ;;  %v6185_v11 = vld [vmem:[#allocation8 + $0x158] sm:$0xff]  }
 0x5c3   : > { %v5801_v19 = vadd.f32 %v7098_v62, %v2874_v33  ;;  %v5483_v14 = vpop.f32.mrb[54].mxu0 }
 0x5c4   : > { %v2943_v20 = vmax.f32 %v5800_v38, 0.0  ;;  %v5802_v37 = vadd.f32 %v5483_v14, %v7098_v62  ;;  %v2877_v9 = vpop.f32.mrb[55].mxu0 }
 0x5c5   : > { %v2941_v60 = vmax.f32 %v5801_v19, 0.0  ;;  %v5803_v54 = vadd.f32 %v7098_v62, %v2877_v9 }
 0x5c6   : > { %2959 = vst [vmem:[#allocation2 + $0x38] sm:$0xff] %v2943_v20  ;;  %v2944_v15 = vmax.f32 %v5802_v37, 0.0  ;;  %v2979_v61 = vld [vmem:[#allocation2 + $0x4] sm:$0xff] }
 0x5c7   : > { %2957 = vst [vmem:[#allocation2 + $0x28] sm:$0xff] %v2941_v60  ;;  %v2942_v3 = vmax.f32 %v5803_v54, 0.0  ;;  %v2982_v18 = vld [vmem:[#allocation2 + $0x1c] sm:$0xff]  ;;  %v6186_v54 = vld [vmem:[#allocation8 + $0x160] sm:$0xff]  }
 0x5c8   : > { %v7112_v45 = vpack.c.bf16 %v2944_v15, %v2943_v20  ;;  %2960 = vst [vmem:[#allocation2 + $0x40] sm:$0xff] %v2944_v15  ;;  %v2980_v43 = vld [vmem:[#allocation2 + $0xc] sm:$0xff]  ;;  %v2981_v29 = vld [vmem:[#allocation2 + $0x14] sm:$0xff] }
 0x5c9   : > { %v7114_v28 = vpack.c.bf16 %v2942_v3, %v2941_v60  ;;  %2958 = vst [vmem:[#allocation2 + $0x30] sm:$0xff] %v2942_v3  ;;  %v5486_v12 = vpop.f32.mrb[56].mxu0  ;;  %v2995_v31 = vpack.c.bf16 %v2980_v43, %v2979_v61  ;;  %v2996_v36 = vpack.c.bf16 %v2982_v18, %v2981_v29 }
 0x5ca   : > { %v5804_v34 = vadd.f32 %v5486_v12, %v7098_v62  ;;  %v2890_v50 = vpop.f32.mrb[57].mxu0 }
 0x5cb   : > { %v5805_v30 = vadd.f32 %v7098_v62, %v2890_v50  ;;  %v5487_v32 = vpop.f32.mrb[58].mxu0  ;;  %5508 = vmatprep.mubr.bf16.mxu1 %v2995_v31 }
 0x5cc   : > { %v2947_v39 = vmax.f32 %v5804_v34, 0.0  ;;  %v5806_v17 = vadd.f32 %v5487_v32, %v7098_v62  ;;  %v2893_v41 = vpop.f32.mrb[59].mxu0  ;;  %5509 = vmatmul.mubr.bf16.vlgmr.msra.gmra.mrb[48].mxu1 %v2996_v36  ;;  %v6188_v34 = vld [vmem:[#allocation8 + $0x170] sm:$0xff]  }
 0x5cd   : > { %v2945_v46 = vmax.f32 %v5805_v30, 0.0  ;;  %v5807_v48 = vadd.f32 %v7098_v62, %v2893_v41  ;;  %5525 = vmatpush3.bf16.msra.mxu1 %v7060_v40  ;;  %v6189_v41 = vld [vmem:[#allocation8 + $0x178] sm:$0xff]  }
 0x5ce   : > { %2963 = vst [vmem:[#allocation2 + $0x58] sm:$0xff] %v2947_v39  ;;  %v2948_v49 = vmax.f32 %v5806_v17, 0.0  ;;  %5526 = vmatprep.subr.bf16.mxu1 %v6183_v63  ;;  %v2983_v8 = vld [vmem:[#allocation2 + $0x24] sm:$0xff] }
 0x5cf   : > { %2961 = vst [vmem:[#allocation2 + $0x48] sm:$0xff] %v2945_v46  ;;  %v2946_v1 = vmax.f32 %v5807_v48, 0.0  ;;  %v2986_v26 = vld [vmem:[#allocation2 + $0x3c] sm:$0xff]  ;;  %v6194_v48 = vld [vmem:[#allocation6 + $0x188] sm:$0xff]  }
 0x5d0   : > { %v7121_v4 = vpack.c.bf16 %v2948_v49, %v2947_v39  ;;  %2964 = vst [vmem:[#allocation2 + $0x60] sm:$0xff] %v2948_v49  ;;  %v2984_v25 = vld [vmem:[#allocation2 + $0x2c] sm:$0xff]  ;;  %v2985_v10 = vld [vmem:[#allocation2 + $0x34] sm:$0xff] }
 0x5d1   : > { %v7123_v0 = vpack.c.bf16 %v2946_v1, %v2945_v46  ;;  %2962 = vst [vmem:[#allocation2 + $0x50] sm:$0xff] %v2946_v1  ;;  %v5490_v13 = vpop.f32.mrb[60].mxu0  ;;  %5527 = vmatpush3.bf16.msra.mxu1 %v6183_v63  ;;  %v2997_v16 = vpack.c.bf16 %v2984_v25, %v2983_v8  ;;  %v2998_v40 = vpack.c.bf16 %v2986_v26, %v2985_v10  ;;  %v6192_v46 = vld [vmem:[#allocation6 + $0x180] sm:$0xff]   ;;  %v6196_v49 = vld [vmem:[#allocation6 + $0x190] sm:$0xff]   ;;  %v6205_v26 = vld [vmem:[#allocation6 + $0x1b8] sm:$0xff]  }
 0x5d2   : > { %v5808_v5 = vadd.f32 %v5490_v13, %v7098_v62  ;;  %v2906_v27 = vpop.f32.mrb[61].mxu0  ;;  %5528 = vmatprep.subr.bf16.mxu1 %v6184_v24  ;;  %v6201_v1 = vld [vmem:[#allocation9 + $0xf0] sm:$0xff]   ;;  %v6206_v8 = vld [vmem:[#allocation6 + $0x1c0] sm:$0xff]   ;;  %v7138_v25 = vld [vmem:[%s7498_s4 + $0x2] ss:$0 sm:$0xff] }
 0x5d3   : > { %v5809_v38 = vadd.f32 %v7098_v62, %v2906_v27  ;;  %v5491_v33 = vpop.f32.mrb[62].mxu0  ;;  %5512 = vmatprep.mubr.bf16.mxu1 %v2997_v16  ;;  %v7143_v10 = vld [vmem:[%s7500_s6 + $0x2] ss:$0 sm:$0xff] }
 0x5d4   : > { %v2951_v19 = vmax.f32 %v5808_v5, 0.0  ;;  %v5810_v14 = vadd.f32 %v5491_v33, %v7098_v62  ;;  %v2909_v20 = vpop.f32.mrb[63].mxu0  ;;  %5513 = vmatmul.mubr.bf16.gmra.mrb[52].mxu1 %v2998_v40  ;;  %v2495_v27 = vadd.f32 %v7063_v51, %v7143_v10 }
 0x5d5   : > { %v2949_v37 = vmax.f32 %v5809_v38, 0.0  ;;  %v5811_v9 = vadd.f32 %v7098_v62, %v2909_v20  ;;  %5529 = vmatpush3.bf16.msra.mxu1 %v6184_v24  ;;  %v6187_v62 = vld [vmem:[#allocation8 + $0x168] sm:$0xff]  }
 0x5d6   : > { %2967 = vst [vmem:[#allocation2 + $0x78] sm:$0xff] %v2951_v19  ;;  %v2952_v60 = vmax.f32 %v5810_v14, 0.0  ;;  %5530 = vmatprep.subr.bf16.mxu1 %v6185_v11  ;;  %v2987_v61 = vld [vmem:[#allocation2 + $0x44] sm:$0xff]  ;;  %v6199_v24 = vld [vmem:[#allocation9 + $0xe8] sm:$0xff]  }
 0x5d7   : > { %2965 = vst [vmem:[#allocation2 + $0x68] sm:$0xff] %v2949_v37  ;;  %v2950_v15 = vmax.f32 %v5811_v9, 0.0  ;;  %v2990_v3 = vld [vmem:[#allocation2 + $0x5c] sm:$0xff]  ;;  %5566 = vmatprep.subr.bf16.mxu0 %v6199_v24 }
 0x5d8   : > { %2968 = vst [vmem:[#allocation2 + $0x80] sm:$0xff] %v2952_v60  ;;  %v2976_v18 = vpack.c.bf16 %v2952_v60, %v2951_v19  ;;  %v2988_v43 = vld [vmem:[#allocation2 + $0x4c] sm:$0xff]  ;;  %v2989_v29 = vld [vmem:[#allocation2 + $0x54] sm:$0xff]  ;;  %5567 = vmatpush3.bf16.msra.mxu0 %v6199_v24  ;;  %v2487_v19 = vadd.f32 %v7143_v10, %v7065_v58 }
 0x5d9   : > { %v2975_v12 = vpack.c.bf16 %v2950_v15, %v2949_v37  ;;  %2966 = vst [vmem:[#allocation2 + $0x70] sm:$0xff] %v2950_v15  ;;  %5531 = vmatpush3.bf16.msra.mxu1 %v6185_v11  ;;  %v2999_v31 = vpack.c.bf16 %v2988_v43, %v2987_v61  ;;  %v3000_v36 = vpack.c.bf16 %v2990_v3, %v2989_v29 }
 0x5da   : > { %5532 = vmatprep.subr.bf16.mxu1 %v6186_v54  ;;  %5568 = vmatprep.subr.bf16.mxu0 %v6201_v1  ;;  %v2498_v37 = vadd.f32 %v7067_v22, %v7143_v10 }
 0x5db   : > { %5516 = vmatprep.mubr.bf16.mxu1 %v2999_v31 }
 0x5dc   : > { %5517 = vmatmul.mubr.bf16.gmra.mrb[56].mxu1 %v3000_v36  ;;  %5569 = vmatpush3.bf16.msra.mxu0 %v6201_v1  ;;  %v2511_v36 = vadd.f32 %v7071_v42, %v7143_v10 }
 0x5dd   : > { %5533 = vmatpush3.bf16.msra.mxu1 %v6186_v54  ;;  %v2490_v54 = vadd.f32 %v7143_v10, %v7069_v52 }
 0x5de   : > { %5534 = vmatprep.subr.bf16.mxu1 %v6187_v62  ;;  %v2991_v63 = vld [vmem:[#allocation2 + $0x64] sm:$0xff] }
 0x5df   : > { %v2994_v50 = vld [vmem:[#allocation2 + $0x7c] sm:$0xff] }
 0x5e0   : > { %v2992_v30 = vld [vmem:[#allocation2 + $0x6c] sm:$0xff]  ;;  %v2993_v32 = vld [vmem:[#allocation2 + $0x74] sm:$0xff] }
 0x5e1   : > { %5535 = vmatpush3.bf16.msra.mxu1 %v6187_v62  ;;  %v3001_v39 = vpack.c.bf16 %v2992_v30, %v2991_v63  ;;  %v3002_v17 = vpack.c.bf16 %v2994_v50, %v2993_v32  ;;  %v7161_v50 = vld [vmem:[#allocation2] sm:$0xff]  ;;  %v2503_v63 = vadd.f32 %v7143_v10, %v7073_v44  ;;  %v2506_v44 = vadd.f32 %v7143_v10, %v7077_v53 }
 0x5e2   : > { %5536 = vmatprep.subr.bf16.mxu1 %v6188_v34  ;;  %v2527_v53 = vadd.f32 %v7079_v55, %v7143_v10 }
 0x5e3   : > { %5520 = vmatprep.mubr.bf16.mxu1 %v3001_v39 }
 0x5e4   : > { %5521 = vmatmul.mubr.bf16.gmra.mrb[60].mxu1 %v3002_v17 }
 0x5e5   : > { %5537 = vmatpush3.bf16.msra.mxu1 %v6188_v34  ;;  %5540 = vmatprep.mubr.bf16.mxu1 %v7106_v35  ;;  %v6198_v35 = vld [vmem:[#allocation6 + $0x198] sm:$0xff]  }
 0x5e6   : > { %5538 = vmatprep.subr.bf16.mxu1 %v6189_v41 }
 0x5e9   : > { %5539 = vmatpush3.bf16.msra.mxu1 %v6189_v41 }
 0x5ea   : > { %5588 = vmatprep.subr.bf16.mxu1 %v6192_v46 }
 0x5ec   : > { %5541 = vmatmul.mubr.bf16.vlgmr.msra.gmra.mrb[48].mxu1 %v7104_v6  ;;  %v6200_v6 = vld [vmem:[#allocation6 + $0x1a0] sm:$0xff]  }
 0x5ed   : > { %5544 = vmatprep.mubr.bf16.mxu1 %v7114_v28  ;;  %5589 = vmatpush3.bf16.msra.mxu1 %v6192_v46  ;;  %v6202_v28 = vld [vmem:[#allocation6 + $0x1a8] sm:$0xff]  }
 0x5ee   : > { %5590 = vmatprep.subr.bf16.mxu1 %v6194_v48 }
 0x5f1   : > { %5591 = vmatpush3.bf16.msra.mxu1 %v6194_v48 }
 0x5f2   : > { %5592 = vmatprep.subr.bf16.mxu1 %v6196_v49 }
 0x5f4   : > { %5545 = vmatmul.mubr.bf16.gmra.mrb[52].mxu1 %v7112_v45  ;;  %v6204_v45 = vld [vmem:[#allocation6 + $0x1b0] sm:$0xff]  }
 0x5f5   : > { %5548 = vmatprep.mubr.bf16.mxu1 %v7123_v0  ;;  %5593 = vmatpush3.bf16.msra.mxu1 %v6196_v49  ;;  %v6207_v49 = vld [vmem:[#allocation6 + $0x1c8] sm:$0xff]  }
 0x5f6   : > { %5594 = vmatprep.subr.bf16.mxu1 %v6198_v35 }
 0x5f9   : > { %5595 = vmatpush3.bf16.msra.mxu1 %v6198_v35  ;;  %v2514_v35 = vadd.f32 %v7075_v47, %v7143_v10 }
 0x5fa   : > { %5596 = vmatprep.subr.bf16.mxu1 %v6200_v6 }
 0x5fc   : > { %5549 = vmatmul.mubr.bf16.gmra.mrb[56].mxu1 %v7121_v4  ;;  %v6203_v4 = vld [vmem:[#allocation9 + $0xf8] sm:$0xff]  }
 0x5fd   : > { %5552 = vmatprep.mubr.bf16.mxu1 %v2975_v12  ;;  %5597 = vmatpush3.bf16.msra.mxu1 %v6200_v6 }
 0x5fe   : > { %5598 = vmatprep.subr.bf16.mxu1 %v6202_v28  ;;  %5570 = vmatprep.subr.bf16.mxu0 %v6203_v4 }
 0x5ff   : > { %5571 = vmatpush3.bf16.msra.mxu0 %v6203_v4 }
 0x601   : > { %5599 = vmatpush3.bf16.msra.mxu1 %v6202_v28 }
 0x602   : > { %5600 = vmatprep.subr.bf16.mxu1 %v6204_v45 }
 0x604   : > { %5553 = vmatmul.mubr.bf16.gmra.mrb[60].mxu1 %v2976_v18 }
 0x605   : > { %5601 = vmatpush3.bf16.msra.mxu1 %v6204_v45 }
 0x606   : > { %5602 = vmatprep.subr.bf16.mxu1 %v6205_v26 }
 0x609   : > { %5603 = vmatpush3.bf16.msra.mxu1 %v6205_v26 }
 0x60a   : > { %5620 = vmatprep.subr.bf16.mxu1 %v6206_v8 }
 0x6bf   : > { %v5542_v0 = vpop.f32.mrb[48].mxu1 }
 0x6c0   : > { %v5812_v13 = vadd.f32 %v5542_v0, %v7138_v25  ;;  %v3286_v16 = vpop.f32.mrb[49].mxu1 }
 0x6c1   : > { %v5813_v40 = vadd.f32 %v7138_v25, %v3286_v16  ;;  %v5543_v5 = vpop.f32.mrb[50].mxu1 }
 0x6c2   : > { %v3367_v11 = vmax.f32 %v5812_v13, 0.0  ;;  %v5814_v38 = vadd.f32 %v5543_v5, %v7138_v25  ;;  %v3289_v33 = vpop.f32.mrb[51].mxu1  ;;  %v6208_v13 = vld [vmem:[#allocation6 + $0x1d0] sm:$0xff]  }
 0x6c3   : > { %v3365_v14 = vmax.f32 %v5813_v40, 0.0  ;;  %v5815_v20 = vadd.f32 %v7138_v25, %v3289_v33 }
 0x6c4   : > { %v3383_v9 = vadd.f32 %v3367_v11, %v2495_v27  ;;  %v3368_v60 = vmax.f32 %v5814_v38, 0.0 }
 0x6c5   : > { %v3381_v15 = vadd.f32 %v3365_v14, %v2487_v19  ;;  %v3366_v51 = vmax.f32 %v5815_v20, 0.0 }
 0x6c6   : > { %v3384_v3 = vadd.f32 %v3368_v60, %v2498_v37  ;;  %v3399_v29 = vmax.f32 %v3383_v9, 0.0 }
 0x6c7   : > { %v3397_v18 = vmax.f32 %v3381_v15, 0.0  ;;  %v3382_v61 = vadd.f32 %v3366_v51, %v2490_v54  ;;  %v5546_v43 = vpop.f32.mrb[52].mxu1  ;;  %v6209_v15 = vld [vmem:[#allocation6 + $0x1d8] sm:$0xff]   ;;  %v2530_v51 = vadd.f32 %v7083_v7, %v7143_v10 }
 0x6c8   : > { %v3400_v12 = vmax.f32 %v3384_v3, 0.0  ;;  %v5816_v58 = vadd.f32 %v5546_v43, %v7138_v25  ;;  %v3302_v31 = vpop.f32.mrb[53].mxu1 }
 0x6c9   : > { %v3398_v22 = vmax.f32 %v3382_v61, 0.0  ;;  %v5817_v62 = vadd.f32 %v7138_v25, %v3302_v31  ;;  %v5547_v34 = vpop.f32.mrb[54].mxu1  ;;  %v3625_v52 = vpack.c.bf16 %v3397_v18, %v7161_v50 }
 0x6ca   : > { %v7166_v30 = vpack.c.bf16 %v3400_v12, %v3399_v29  ;;  %v3371_v32 = vmax.f32 %v5816_v58, 0.0  ;;  %v5818_v39 = vadd.f32 %v5547_v34, %v7138_v25  ;;  %v3305_v17 = vpop.f32.mrb[55].mxu1 }
 0x6cb   : > { %v3369_v41 = vmax.f32 %v5817_v62, 0.0  ;;  %v5819_v42 = vadd.f32 %v7138_v25, %v3305_v17  ;;  %v7170_v46 = vpack.c.bf16 %v3398_v22, %v3397_v18  ;;  %5604 = vmatprep.mubr.bf16.mxu1 %v3625_v52  ;;  %v3626_v48 = vpack.c.bf16 %v3399_v29, %v3398_v22 }
 0x6cc   : > { %v3387_v6 = vadd.f32 %v3371_v32, %v2511_v36  ;;  %v3372_v28 = vmax.f32 %v5818_v39, 0.0  ;;  %v2522_v18 = vadd.f32 %v7143_v10, %v7085_v21  ;;  %v6210_v36 = vld [vmem:[#allocation6 + $0x1e0] sm:$0xff]   ;;  %v2543_v21 = vadd.f32 %v7087_v57, %v7143_v10 }
 0x6cd   : > { %v3385_v24 = vadd.f32 %v3369_v41, %v2503_v63  ;;  %v3370_v45 = vmax.f32 %v5819_v42, 0.0  ;;  %5572 = vmatprep.mubr.bf16.mxu0 %v7170_v46  ;;  %5605 = vmatmul.mubr.bf16.vlgmr.msra.gmra.mrb[64].mxu1 %v3626_v48  ;;  %v2535_v17 = vadd.f32 %v7143_v10, %v7089_v2  ;;  %v2538_v2 = vadd.f32 %v7143_v10, %v7093_v59 }
 0x6ce   : > { %v3388_v1 = vadd.f32 %v3372_v28, %v2514_v35  ;;  %5573 = vmatmul.mubr.bf16.vlgmr.msra.gmra.mrb[64].mxu0 %v7166_v30  ;;  %5621 = vmatpush3.bf16.msra.mxu1 %v6206_v8  ;;  %v3403_v47 = vmax.f32 %v3387_v6, 0.0  ;;  %v2519_v8 = vadd.f32 %v7143_v10, %v7081_v56 }
 0x6cf   : > { %v3401_v26 = vmax.f32 %v3385_v24, 0.0  ;;  %v3386_v4 = vadd.f32 %v3370_v45, %v2506_v44  ;;  %v5550_v0 = vpop.f32.mrb[56].mxu1  ;;  %5622 = vmatprep.subr.bf16.mxu1 %v6207_v49  ;;  %v6211_v44 = vld [vmem:[#allocation6 + $0x1e8] sm:$0xff]   ;;  %v2546_v24 = vadd.f32 %v7091_v23, %v7143_v10  ;;  %v6213_v10 = vld [vmem:[#allocation6 + $0x1f8] sm:$0xff]  }
 0x6d0   : > { %v3404_v16 = vmax.f32 %v3388_v1, 0.0  ;;  %v5820_v40 = vadd.f32 %v5550_v0, %v7138_v25  ;;  %v3318_v5 = vpop.f32.mrb[57].mxu1 }
 0x6d1   : > { %v3402_v27 = vmax.f32 %v3386_v4, 0.0  ;;  %v5821_v11 = vadd.f32 %v7138_v25, %v3318_v5  ;;  %v5551_v38 = vpop.f32.mrb[58].mxu1  ;;  %v3627_v33 = vpack.c.bf16 %v3401_v26, %v3400_v12 }
 0x6d2   : > { %v3375_v19 = vmax.f32 %v5820_v40, 0.0  ;;  %v5822_v14 = vadd.f32 %v5551_v38, %v7138_v25  ;;  %v3321_v20 = vpop.f32.mrb[59].mxu1  ;;  %v7185_v37 = vpack.c.bf16 %v3404_v16, %v3403_v47  ;;  %5623 = vmatpush3.bf16.msra.mxu1 %v6207_v49  ;;  %v6215_v38 = vld [vmem:[#allocation8 + $0x188] sm:$0xff]  }
 0x6d3   : > { %v3373_v9 = vmax.f32 %v5821_v11, 0.0  ;;  %v5823_v60 = vadd.f32 %v7138_v25, %v3321_v20  ;;  %v7188_v54 = vpack.c.bf16 %v3402_v27, %v3401_v26  ;;  %5608 = vmatprep.mubr.bf16.mxu1 %v3627_v33  ;;  %v3628_v55 = vpack.c.bf16 %v3403_v47, %v3402_v27  ;;  %5624 = vmatprep.subr.bf16.mxu1 %v6208_v13  ;;  %v6212_v47 = vld [vmem:[#allocation6 + $0x1f0] sm:$0xff]   ;;  %v6214_v11 = vld [vmem:[#allocation8 + $0x180] sm:$0xff]  }
 0x6d4   : > { %v3391_v56 = vadd.f32 %v3375_v19, %v2527_v53  ;;  %v3376_v3 = vmax.f32 %v5822_v14, 0.0  ;;  %5652 = vmatprep.subr.bf16.mxu0 %v6214_v11  ;;  %v6216_v33 = vld [vmem:[#allocation8 + $0x190] sm:$0xff]   ;;  %v7216_v19 = vld [vmem:[#allocation8 + $0x1c8] sm:$0xff]  }
 0x6d5   : > { %v3389_v61 = vadd.f32 %v3373_v9, %v2519_v8  ;;  %v3374_v43 = vmax.f32 %v5823_v60, 0.0  ;;  %5576 = vmatprep.mubr.bf16.mxu0 %v7188_v54  ;;  %5609 = vmatmul.mubr.bf16.gmra.mrb[68].mxu1 %v3628_v55  ;;  %v7212_v8 = vld [vmem:[#allocation8 + $0x1c0] sm:$0xff]   ;;  %v6222_v14 = vld [vmem:[#allocation8 + $0x1a8] sm:$0xff]   ;;  %v6224_v20 = vld [vmem:[#allocation8 + $0x1b0] sm:$0xff]  }
 0x6d6   : > { %v3392_v29 = vadd.f32 %v3376_v3, %v2530_v51  ;;  %5577 = vmatmul.mubr.bf16.gmra.mrb[68].mxu0 %v7185_v37  ;;  %5625 = vmatpush3.bf16.msra.mxu1 %v6208_v13  ;;  %v3407_v7 = vmax.f32 %v3391_v56, 0.0  ;;  %v6226_v9 = vld [vmem:[#allocation8 + $0x1b8] sm:$0xff]   ;;  %v7233_v55 = vld [vmem:[#allocation8 + $0x1e8] sm:$0xff]  }
 0x6d7   : > { %v3405_v12 = vmax.f32 %v3389_v61, 0.0  ;;  %v3390_v58 = vadd.f32 %v3374_v43, %v2522_v18  ;;  %v5554_v31 = vpop.f32.mrb[60].mxu1  ;;  %5626 = vmatprep.subr.bf16.mxu1 %v6209_v15  ;;  %5653 = vmatpush3.bf16.msra.mxu0 %v6214_v11  ;;  %v7224_v60 = vld [vmem:[#allocation8 + $0x1d8] sm:$0xff]  }
 0x6d8   : > { %v3408_v22 = vmax.f32 %v3392_v29, 0.0  ;;  %v5824_v62 = vadd.f32 %v5554_v31, %v7138_v25  ;;  %v3334_v34 = vpop.f32.mrb[61].mxu1  ;;  %5654 = vmatprep.subr.bf16.mxu0 %v6215_v38  ;;  %v7241_v51 = vld [vmem:[#allocation8 + $0x1f8] sm:$0xff]  }
 0x6d9   : > { %v3406_v52 = vmax.f32 %v3390_v58, 0.0  ;;  %v5825_v63 = vadd.f32 %v7138_v25, %v3334_v34  ;;  %v5555_v32 = vpop.f32.mrb[62].mxu1  ;;  %v3629_v39 = vpack.c.bf16 %v3405_v12, %v3404_v16 }
 0x6da   : > { %v3379_v41 = vmax.f32 %v5824_v62, 0.0  ;;  %v5826_v42 = vadd.f32 %v5555_v32, %v7138_v25  ;;  %v3337_v48 = vpop.f32.mrb[63].mxu1  ;;  %v3434_v49 = vpack.c.bf16 %v3408_v22, %v3407_v7  ;;  %5627 = vmatpush3.bf16.msra.mxu1 %v6209_v15  ;;  %v7237_v15 = vld [vmem:[#allocation8 + $0x1f0] sm:$0xff]  }
 0x6db   : > { %v3377_v35 = vmax.f32 %v5825_v63, 0.0  ;;  %v5827_v6 = vadd.f32 %v7138_v25, %v3337_v48  ;;  %v3433_v28 = vpack.c.bf16 %v3406_v52, %v3405_v12  ;;  %5612 = vmatprep.mubr.bf16.mxu1 %v3629_v39  ;;  %v3630_v57 = vpack.c.bf16 %v3407_v7, %v3406_v52  ;;  %5628 = vmatprep.subr.bf16.mxu1 %v6210_v36  ;;  %v7280_v63 = vld [vmem:[%s7496_s2 + $0x3] ss:$0 sm:$0xff] }
 0x6dc   : > { %v3395_v45 = vadd.f32 %v3379_v41, %v2543_v21  ;;  %v3380_v1 = vmax.f32 %v5826_v42, 0.0  ;;  %5655 = vmatpush3.bf16.msra.mxu0 %v6215_v38 }
 0x6dd   : > { %v3393_v26 = vadd.f32 %v3377_v35, %v2535_v17  ;;  %v3378_v4 = vmax.f32 %v5827_v6, 0.0  ;;  %5580 = vmatprep.mubr.bf16.mxu0 %v3433_v28  ;;  %5613 = vmatmul.mubr.bf16.gmra.mrb[72].mxu1 %v3630_v57 }
 0x6de   : > { %v3396_v0 = vadd.f32 %v3380_v1, %v2546_v24  ;;  %5581 = vmatmul.mubr.bf16.gmra.mrb[72].mxu0 %v3434_v49  ;;  %5629 = vmatpush3.bf16.msra.mxu1 %v6210_v36  ;;  %v3411_v16 = vmax.f32 %v3395_v45, 0.0 }
 0x6df   : > { %v3409_v25 = vmax.f32 %v3393_v26, 0.0  ;;  %v3394_v13 = vadd.f32 %v3378_v4, %v2538_v2  ;;  %5630 = vmatprep.subr.bf16.mxu1 %v6211_v44  ;;  %5656 = vmatprep.subr.bf16.mxu0 %v6216_v33 }
 0x6e0   : > { %v3412_v40 = vmax.f32 %v3396_v0, 0.0  ;;  %5657 = vmatpush3.bf16.msra.mxu0 %v6216_v33 }
 0x6e1   : > { %v3410_v5 = vmax.f32 %v3394_v13, 0.0  ;;  %v3631_v23 = vpack.c.bf16 %v3409_v25, %v3408_v22 }
 0x6e2   : > { %v3436_v53 = vpack.c.bf16 %v3412_v40, %v3411_v16  ;;  %5631 = vmatpush3.bf16.msra.mxu1 %v6211_v44 }
 0x6e3   : > { %v3435_v27 = vpack.c.bf16 %v3410_v5, %v3409_v25  ;;  %5616 = vmatprep.mubr.bf16.mxu1 %v3631_v23  ;;  %v3632_v59 = vpack.c.bf16 %v3411_v16, %v3410_v5  ;;  %5632 = vmatprep.subr.bf16.mxu1 %v6212_v47 }
 0x6e5   : > { %5584 = vmatprep.mubr.bf16.mxu0 %v3435_v27  ;;  %5617 = vmatmul.mubr.bf16.gmra.mrb[76].mxu1 %v3632_v59 }
 0x6e6   : > { %5585 = vmatmul.mubr.bf16.gmra.mrb[76].mxu0 %v3436_v53  ;;  %5633 = vmatpush3.bf16.msra.mxu1 %v6212_v47 }
 0x6e7   : > { %5636 = vmatprep.mubr.bf16.mxu1 %v7170_v46  ;;  %5634 = vmatprep.subr.bf16.mxu1 %v6213_v10  ;;  %v6218_v46 = vld [vmem:[#allocation8 + $0x198] sm:$0xff]  }
 0x6e8   : > { %5658 = vmatprep.subr.bf16.mxu0 %v6218_v46 }
 0x6e9   : > { %5659 = vmatpush3.bf16.msra.mxu0 %v6218_v46 }
 0x6ea   : > { %5635 = vmatpush3.bf16.msra.mxu1 %v6213_v10 }
 0x6eb   : > { %5716 = vmatprep.subr.bf16.mxu1 %v7212_v8 }
 0x6ed   : > { %5637 = vmatmul.mubr.bf16.vlgmr.msra.gmra.mrb[64].mxu1 %v7166_v30  ;;  %v6220_v30 = vld [vmem:[#allocation8 + $0x1a0] sm:$0xff]  }
 0x6ee   : > { %5640 = vmatprep.mubr.bf16.mxu1 %v7188_v54  ;;  %5660 = vmatprep.subr.bf16.mxu0 %v6220_v30  ;;  %v7229_v54 = vld [vmem:[#allocation8 + $0x1e0] sm:$0xff]  }
 0x6ef   : > { %5661 = vmatpush3.bf16.msra.mxu0 %v6220_v30  ;;  %5724 = vmatpush3.bf16.msra.mxu1 %v7212_v8 }
 0x6f0   : > { %5717 = vmatprep.subr.bf16.mxu1 %v7216_v19  ;;  %5662 = vmatprep.subr.bf16.mxu0 %v6222_v14 }
 0x6f3   : > { %5663 = vmatpush3.bf16.msra.mxu0 %v6222_v14  ;;  %5725 = vmatpush3.bf16.msra.mxu1 %v7216_v19 }
 0x6f4   : > { %5664 = vmatprep.subr.bf16.mxu0 %v6224_v20 }
 0x6f5   : > { %5641 = vmatmul.mubr.bf16.gmra.mrb[68].mxu1 %v7185_v37  ;;  %v7220_v37 = vld [vmem:[#allocation8 + $0x1d0] sm:$0xff]  }
 0x6f6   : > { %5644 = vmatprep.mubr.bf16.mxu1 %v3433_v28  ;;  %5718 = vmatprep.subr.bf16.mxu1 %v7220_v37 }
 0x6f7   : > { %5665 = vmatpush3.bf16.msra.mxu0 %v6224_v20  ;;  %5726 = vmatpush3.bf16.msra.mxu1 %v7220_v37 }
 0x6f8   : > { %5666 = vmatprep.subr.bf16.mxu0 %v6226_v9  ;;  %5719 = vmatprep.subr.bf16.mxu1 %v7224_v60 }
 0x6fb   : > { %5667 = vmatpush3.bf16.msra.mxu0 %v6226_v9  ;;  %5727 = vmatpush3.bf16.msra.mxu1 %v7224_v60 }
 0x6fc   : > { %5684 = vmatprep.subr.bf16.mxu0 %v7212_v8  ;;  %5720 = vmatprep.subr.bf16.mxu1 %v7229_v54 }
 0x6fd   : > { %5645 = vmatmul.mubr.bf16.gmra.mrb[72].mxu1 %v3434_v49 }
 0x6fe   : > { %5648 = vmatprep.mubr.bf16.mxu1 %v3435_v27 }
 0x6ff   : > { %5728 = vmatpush3.bf16.msra.mxu1 %v7229_v54 }
 0x700   : > { %5721 = vmatprep.subr.bf16.mxu1 %v7233_v55 }
 0x703   : > { %5729 = vmatpush3.bf16.msra.mxu1 %v7233_v55 }
 0x704   : > { %5722 = vmatprep.subr.bf16.mxu1 %v7237_v15 }
 0x705   : > { %5649 = vmatmul.mubr.bf16.gmra.mrb[76].mxu1 %v3436_v53 }
 0x707   : > { %5730 = vmatpush3.bf16.msra.mxu1 %v7237_v15 }
 0x708   : > { %5723 = vmatprep.subr.bf16.mxu1 %v7241_v51 }
 0x70b   : > { %5731 = vmatpush3.bf16.msra.mxu1 %v7241_v51 }
 0x7a1   : > { %v7245_v56 = vpop.f32.mrb[64].mxu0 }
 0x7a2   : > { %v7247_v3 = vpop.f32.mrb[65].mxu0 }
 0x7a3   : > { %v7249_v18 = vpop.f32.mrb[66].mxu0 }
 0x7a4   : > { %v7251_v61 = vpop.f32.mrb[67].mxu0 }
 0x7a9   : > { %v7253_v43 = vpop.f32.mrb[68].mxu0 }
 0x7aa   : > { %v7255_v29 = vpop.f32.mrb[69].mxu0 }
 0x7ab   : > { %v7257_v12 = vpop.f32.mrb[70].mxu0 }
 0x7ac   : > { %v7259_v58 = vpop.f32.mrb[71].mxu0 }
 0x7b1   : > { %v7261_v31 = vpop.f32.mrb[72].mxu0 }
 0x7b2   : > { %v7263_v36 = vpop.f32.mrb[73].mxu0 }
 0x7b3   : > { %v7265_v7 = vpop.f32.mrb[74].mxu0 }
 0x7b4   : > { %v7267_v22 = vpop.f32.mrb[75].mxu0 }
 0x7b9   : > { %v7269_v62 = vpop.f32.mrb[76].mxu0 }
 0x7ba   : > { %v7271_v34 = vpop.f32.mrb[77].mxu0 }
 0x7bb   : > { %v7273_v21 = vpop.f32.mrb[78].mxu0 }
 0x7bc   : > { %v7275_v52 = vpop.f32.mrb[79].mxu0 }
 0x7c0   : > { %v5638_v32 = vpop.f32.mrb[64].mxu1 }
 0x7c1   : > { %v5828_v39 = vadd.f32 %v5638_v32, %v7280_v63  ;;  %v3916_v17 = vpop.f32.mrb[65].mxu1 }
 0x7c2   : > { %v5829_v41 = vadd.f32 %v7280_v63, %v3916_v17  ;;  %v5639_v42 = vpop.f32.mrb[66].mxu1 }
 0x7c3   : > { %v7284_v48 = vmax.f32 %v5828_v39, 0.0  ;;  %v5830_v49 = vadd.f32 %v5639_v42, %v7280_v63  ;;  %v3919_v35 = vpop.f32.mrb[67].mxu1 }
 0x7c4   : > { %v7287_v6 = vmax.f32 %v5829_v41, 0.0  ;;  %v5831_v28 = vadd.f32 %v7280_v63, %v3919_v35 }
 0x7c5   : > { %4013 = vst [vmem:[#allocation2 + $0x18] sm:$0xff] %v7284_v48  ;;  %v7291_v57 = vmax.f32 %v5830_v49, 0.0 }
 0x7c6   : > { %4011 = vst [vmem:[#allocation2 + $0x8] sm:$0xff] %v7287_v6  ;;  %v7294_v44 = vmax.f32 %v5831_v28, 0.0  ;;  %v4053_v24 = vpack.c.bf16 %v7287_v6, %v7161_v50 }
 0x7c7   : > { %v4028_v45 = vpack.c.bf16 %v7291_v57, %v7284_v48  ;;  %4014 = vst [vmem:[#allocation2 + $0x20] sm:$0xff] %v7291_v57 }
 0x7c8   : > { %v4027_v1 = vpack.c.bf16 %v7294_v44, %v7287_v6  ;;  %4012 = vst [vmem:[#allocation2 + $0x10] sm:$0xff] %v7294_v44  ;;  %v5642_v2 = vpop.f32.mrb[68].mxu1  ;;  %5668 = vmatprep.mubr.bf16.mxu0 %v4053_v24  ;;  %v4054_v26 = vpack.c.bf16 %v7284_v48, %v7294_v44 }
 0x7c9   : > { %v5832_v4 = vadd.f32 %v5642_v2, %v7280_v63  ;;  %v3932_v0 = vpop.f32.mrb[69].mxu1 }
 0x7ca   : > { %v5833_v50 = vadd.f32 %v7280_v63, %v3932_v0  ;;  %v5643_v25 = vpop.f32.mrb[70].mxu1  ;;  %5669 = vmatmul.mubr.bf16.vlgmr.msra.gmra.mrb[80].mxu0 %v4054_v26 }
 0x7cb   : > { %v7308_v13 = vmax.f32 %v5832_v4, 0.0  ;;  %v5834_v47 = vadd.f32 %v5643_v25, %v7280_v63  ;;  %v3935_v16 = vpop.f32.mrb[71].mxu1  ;;  %5685 = vmatpush3.bf16.msra.mxu0 %v7212_v8 }
 0x7cc   : > { %v7312_v40 = vmax.f32 %v5833_v50, 0.0  ;;  %v5835_v5 = vadd.f32 %v7280_v63, %v3935_v16  ;;  %5686 = vmatprep.subr.bf16.mxu0 %v7216_v19 }
 0x7cd   : > { %4017 = vst [vmem:[#allocation2 + $0x38] sm:$0xff] %v7308_v13  ;;  %v7317_v23 = vmax.f32 %v5834_v47, 0.0 }
 0x7ce   : > { %4015 = vst [vmem:[#allocation2 + $0x28] sm:$0xff] %v7312_v40  ;;  %v7320_v53 = vmax.f32 %v5835_v5, 0.0  ;;  %v4055_v27 = vpack.c.bf16 %v7312_v40, %v7291_v57 }
 0x7cf   : > { %v4030_v59 = vpack.c.bf16 %v7317_v23, %v7308_v13  ;;  %4018 = vst [vmem:[#allocation2 + $0x40] sm:$0xff] %v7317_v23  ;;  %5687 = vmatpush3.bf16.msra.mxu0 %v7216_v19 }
 0x7d0   : > { %v4029_v10 = vpack.c.bf16 %v7320_v53, %v7312_v40  ;;  %4016 = vst [vmem:[#allocation2 + $0x30] sm:$0xff] %v7320_v53  ;;  %v5646_v11 = vpop.f32.mrb[72].mxu1  ;;  %5672 = vmatprep.mubr.bf16.mxu0 %v4055_v27  ;;  %v4056_v38 = vpack.c.bf16 %v7308_v13, %v7320_v53  ;;  %5688 = vmatprep.subr.bf16.mxu0 %v7220_v37  ;;  %v7377_v40 = vld [vmem:[%s7500_s6 + $0x3] ss:$0 sm:$0xff] }
 0x7d1   : > { %v5836_v33 = vadd.f32 %v5646_v11, %v7280_v63  ;;  %v3948_v46 = vpop.f32.mrb[73].mxu1 }
 0x7d2   : > { %v5837_v30 = vadd.f32 %v7280_v63, %v3948_v46  ;;  %v5647_v8 = vpop.f32.mrb[74].mxu1  ;;  %5673 = vmatmul.mubr.bf16.gmra.mrb[84].mxu0 %v4056_v38 }
 0x7d3   : > { %v4005_v19 = vmax.f32 %v5836_v33, 0.0  ;;  %v5838_v14 = vadd.f32 %v5647_v8, %v7280_v63  ;;  %v3951_v20 = vpop.f32.mrb[75].mxu1  ;;  %5689 = vmatpush3.bf16.msra.mxu0 %v7220_v37 }
 0x7d4   : > { %v4003_v9 = vmax.f32 %v5837_v30, 0.0  ;;  %v5839_v32 = vadd.f32 %v7280_v63, %v3951_v20  ;;  %5690 = vmatprep.subr.bf16.mxu0 %v7224_v60  ;;  %v3577_v30 = vadd.f32 %v7377_v40, %v7263_v36 }
 0x7d5   : > { %4021 = vst [vmem:[#allocation2 + $0x58] sm:$0xff] %v4005_v19  ;;  %v4006_v39 = vmax.f32 %v5838_v14, 0.0  ;;  %v3588_v14 = vadd.f32 %v7265_v7, %v7377_v40 }
 0x7d6   : > { %4019 = vst [vmem:[#allocation2 + $0x48] sm:$0xff] %v4003_v9  ;;  %v4004_v17 = vmax.f32 %v5839_v32, 0.0  ;;  %v4057_v41 = vpack.c.bf16 %v4003_v9, %v7317_v23  ;;  %v3580_v32 = vadd.f32 %v7377_v40, %v7267_v22 }
 0x7d7   : > { %v4032_v42 = vpack.c.bf16 %v4006_v39, %v4005_v19  ;;  %4022 = vst [vmem:[#allocation2 + $0x60] sm:$0xff] %v4006_v39  ;;  %5691 = vmatpush3.bf16.msra.mxu0 %v7224_v60 }
 0x7d8   : > { %v4031_v49 = vpack.c.bf16 %v4004_v17, %v4003_v9  ;;  %4020 = vst [vmem:[#allocation2 + $0x50] sm:$0xff] %v4004_v17  ;;  %v5650_v35 = vpop.f32.mrb[76].mxu1  ;;  %5676 = vmatprep.mubr.bf16.mxu0 %v4057_v41  ;;  %v4058_v37 = vpack.c.bf16 %v4005_v19, %v4004_v17  ;;  %5692 = vmatprep.subr.bf16.mxu0 %v7229_v54 }
 0x7d9   : > { %v5840_v28 = vadd.f32 %v5650_v35, %v7280_v63  ;;  %v3964_v24 = vpop.f32.mrb[77].mxu1 }
 0x7da   : > { %v5841_v2 = vadd.f32 %v7280_v63, %v3964_v24  ;;  %v5651_v26 = vpop.f32.mrb[78].mxu1  ;;  %5708 = vmatprep.mubr.bf16.mxu1 %v4031_v49  ;;  %5677 = vmatmul.mubr.bf16.gmra.mrb[88].mxu0 %v4058_v37 }
 0x7db   : > { %v4009_v4 = vmax.f32 %v5840_v28, 0.0  ;;  %v5842_v0 = vadd.f32 %v5651_v26, %v7280_v63  ;;  %v3967_v50 = vpop.f32.mrb[79].mxu1  ;;  %5709 = vmatmul.mubr.bf16.vlgmr.msra.gmra.mrb[80].mxu1 %v4032_v42  ;;  %5693 = vmatpush3.bf16.msra.mxu0 %v7229_v54  ;;  %v7369_v54 = vld [vmem:[%s7498_s4 + $0x3] ss:$0 sm:$0xff] }
 0x7dc   : > { %v4007_v60 = vmax.f32 %v5841_v2, 0.0  ;;  %v5843_v25 = vadd.f32 %v7280_v63, %v3967_v50  ;;  %5694 = vmatprep.subr.bf16.mxu0 %v7233_v55 }
 0x7dd   : > { %4025 = vst [vmem:[#allocation2 + $0x78] sm:$0xff] %v4009_v4  ;;  %v4010_v47 = vmax.f32 %v5842_v0, 0.0 }
 0x7de   : > { %4023 = vst [vmem:[#allocation2 + $0x68] sm:$0xff] %v4007_v60  ;;  %v4008_v16 = vmax.f32 %v5843_v25, 0.0  ;;  %v4059_v5 = vpack.c.bf16 %v4007_v60, %v4006_v39 }
 0x7df   : > { %4026 = vst [vmem:[#allocation2 + $0x80] sm:$0xff] %v4010_v47  ;;  %v4034_v27 = vpack.c.bf16 %v4010_v47, %v4009_v4  ;;  %5695 = vmatpush3.bf16.msra.mxu0 %v7233_v55 }
 0x7e0   : > { %v4033_v11 = vpack.c.bf16 %v4008_v16, %v4007_v60  ;;  %4024 = vst [vmem:[#allocation2 + $0x70] sm:$0xff] %v4008_v16  ;;  %5680 = vmatprep.mubr.bf16.mxu0 %v4059_v5  ;;  %v4060_v38 = vpack.c.bf16 %v4009_v4, %v4008_v16  ;;  %5696 = vmatprep.subr.bf16.mxu0 %v7237_v15 }
 0x7e1   : > { %v3601_v5 = vadd.f32 %v7269_v62, %v7377_v40 }
 0x7e2   : > { %5712 = vmatprep.mubr.bf16.mxu1 %v4033_v11  ;;  %5681 = vmatmul.mubr.bf16.gmra.mrb[92].mxu0 %v4060_v38  ;;  %v3593_v38 = vadd.f32 %v7377_v40, %v7271_v34 }
 0x7e3   : > { %5713 = vmatmul.mubr.bf16.gmra.mrb[84].mxu1 %v4034_v27  ;;  %5697 = vmatpush3.bf16.msra.mxu0 %v7237_v15 }
 0x7e4   : > { %5700 = vmatprep.mubr.bf16.mxu0 %v4027_v1  ;;  %5698 = vmatprep.subr.bf16.mxu0 %v7241_v51 }
 0x7e7   : > { %5699 = vmatpush3.bf16.msra.mxu0 %v7241_v51 }
 0x7ea   : > { %5701 = vmatmul.mubr.bf16.vlgmr.msra.gmra.mrb[80].mxu0 %v4028_v45 }
 0x7eb   : > { %5704 = vmatprep.mubr.bf16.mxu0 %v4029_v10  ;;  %v3585_v10 = vadd.f32 %v7261_v31, %v7377_v40 }
 0x7f2   : > { %5705 = vmatmul.mubr.bf16.gmra.mrb[84].mxu0 %v4030_v59 }
 0x8ad   : > { %v5678_v55 = vpop.f32.mrb[88].mxu0 }
 0x8ae   : > { %v5710_v15 = vpop.f32.mrb[80].mxu1  ;;  %v4239_v51 = vadd.f32 %v5678_v55, %v7369_v54  ;;  %v4192_v63 = vpop.f32.mrb[89].mxu0 }
 0x8af   : > { %v4376_v48 = vpop.f32.mrb[81].mxu1  ;;  %v4237_v6 = vadd.f32 %v7369_v54, %v4192_v63  ;;  %v5679_v57 = vpop.f32.mrb[90].mxu0 }
 0x8b0   : > { %v5711_v44 = vpop.f32.mrb[82].mxu1  ;;  %v4417_v45 = vadd.f32 %v5710_v15, %v4239_v51  ;;  %v4240_v1 = vadd.f32 %v5679_v57, %v7369_v54  ;;  %v4195_v13 = vpop.f32.mrb[91].mxu0  ;;  %v3604_v51 = vadd.f32 %v7273_v21, %v7377_v40 }
 0x8b1   : > { %v4379_v23 = vpop.f32.mrb[83].mxu1  ;;  %v4415_v53 = vadd.f32 %v4376_v48, %v4237_v6  ;;  %v4238_v59 = vadd.f32 %v7369_v54, %v4195_v13  ;;  %v3596_v6 = vadd.f32 %v7377_v40, %v7275_v52 }
 0x8b2   : > { %v4433_v33 = vmax.f32 %v4417_v45, 0.0  ;;  %v4418_v46 = vadd.f32 %v5711_v44, %v4240_v1 }
 0x8b3   : > { %v4431_v8 = vmax.f32 %v4415_v53, 0.0  ;;  %v4416_v19 = vadd.f32 %v4379_v23, %v4238_v59 }
 0x8b4   : > { %v4449_v20 = vadd.f32 %v4433_v33, %v3585_v10  ;;  %v4434_v9 = vmax.f32 %v4418_v46, 0.0  ;;  %v3553_v10 = vadd.f32 %v7245_v56, %v7377_v40 }
 0x8b5   : > { %v4447_v39 = vadd.f32 %v4431_v8, %v3577_v30  ;;  %v4432_v17 = vmax.f32 %v4416_v19, 0.0  ;;  %v5682_v41 = vpop.f32.mrb[92].mxu0  ;;  %v3545_v8 = vadd.f32 %v7377_v40, %v7247_v3 }
 0x8b6   : > { %v4465_v31 = vmax.f32 %v4449_v20, 0.0  ;;  %v5714_v42 = vpop.f32.mrb[84].mxu1  ;;  %v4450_v49 = vadd.f32 %v4434_v9, %v3588_v14  ;;  %v4243_v35 = vadd.f32 %v5682_v41, %v7369_v54  ;;  %v4208_v37 = vpop.f32.mrb[93].mxu0  ;;  %v3556_v9 = vadd.f32 %v7249_v18, %v7377_v40 }
 0x8b7   : > { %v4463_v36 = vmax.f32 %v4447_v39, 0.0  ;;  %v4392_v28 = vpop.f32.mrb[85].mxu1  ;;  %v4448_v24 = vadd.f32 %v4432_v17, %v3580_v32  ;;  %v4241_v2 = vadd.f32 %v7369_v54, %v4208_v37  ;;  %v5683_v7 = vpop.f32.mrb[94].mxu0  ;;  %v3548_v39 = vadd.f32 %v7377_v40, %v7251_v61 }
 0x8b8   : > { %4481 = vst [vmem:[%s7391_s16 + $0x50] sm:$0xff] %v4465_v31  ;;  %v4466_v22 = vmax.f32 %v4450_v49, 0.0  ;;  %v5715_v26 = vpop.f32.mrb[86].mxu1  ;;  %v4421_v4 = vadd.f32 %v5714_v42, %v4243_v35  ;;  %v4244_v0 = vadd.f32 %v5683_v7, %v7369_v54  ;;  %v4211_v50 = vpop.f32.mrb[95].mxu0 }
 0x8b9   : > { %4479 = vst [vmem:[%s7391_s16 + $0x40] sm:$0xff] %v4463_v36  ;;  %v4464_v60 = vmax.f32 %v4448_v24, 0.0  ;;  %v4395_v25 = vpop.f32.mrb[87].mxu1  ;;  %v4419_v47 = vadd.f32 %v4392_v28, %v4241_v2  ;;  %v4242_v16 = vadd.f32 %v7369_v54, %v4211_v50  ;;  %v3569_v2 = vadd.f32 %v7253_v43, %v7377_v40 }
 0x8ba   : > { %4482 = vst [vmem:[%s7391_s16 + $0x58] sm:$0xff] %v4466_v22  ;;  %v4437_v27 = vmax.f32 %v4421_v4, 0.0  ;;  %v4422_v11 = vadd.f32 %v5715_v26, %v4244_v0  ;;  %v3561_v4 = vadd.f32 %v7377_v40, %v7255_v29 }
 0x8bb   : > { %4480 = vst [vmem:[%s7391_s16 + $0x48] sm:$0xff] %v4464_v60  ;;  %v4435_v55 = vmax.f32 %v4419_v47, 0.0  ;;  %v4420_v15 = vadd.f32 %v4395_v25, %v4242_v16  ;;  %v3572_v60 = vadd.f32 %v7257_v12, %v7377_v40  ;;  %v3564_v47 = vadd.f32 %v7377_v40, %v7259_v58 }
 0x8bc   : > { %v4453_v63 = vadd.f32 %v4437_v27, %v3601_v5  ;;  %v4438_v48 = vmax.f32 %v4422_v11, 0.0 }
 0x8bd   : > { %v4451_v57 = vadd.f32 %v4435_v55, %v3593_v38  ;;  %v4436_v62 = vmax.f32 %v4420_v15, 0.0  ;;  %v5702_v44 = vpop.f32.mrb[80].mxu0 }
 0x8be   : > { %v4469_v45 = vmax.f32 %v4453_v63, 0.0  ;;  %v4454_v1 = vadd.f32 %v4438_v48, %v3604_v51  ;;  %v5844_v34 = vadd.f32 %v5702_v44, %v7369_v54  ;;  %v4344_v13 = vpop.f32.mrb[81].mxu0 }
 0x8bf   : > { %v4467_v23 = vmax.f32 %v4451_v57, 0.0  ;;  %v4452_v53 = vadd.f32 %v4436_v62, %v3596_v6  ;;  %v5845_v21 = vadd.f32 %v7369_v54, %v4344_v13  ;;  %v5703_v59 = vpop.f32.mrb[82].mxu0 }
 0x8c0   : > { %4485 = vst [vmem:[%s7391_s16 + $0x70] sm:$0xff] %v4469_v45  ;;  %v4470_v52 = vmax.f32 %v4454_v1, 0.0  ;;  %v4425_v33 = vmax.f32 %v5844_v34, 0.0  ;;  %v5846_v46 = vadd.f32 %v5703_v59, %v7369_v54  ;;  %v4347_v30 = vpop.f32.mrb[83].mxu0 }
 0x8c1   : > { %4483 = vst [vmem:[%s7391_s16 + $0x60] sm:$0xff] %v4467_v23  ;;  %v4468_v19 = vmax.f32 %v4452_v53, 0.0  ;;  %v4423_v14 = vmax.f32 %v5845_v21, 0.0  ;;  %v5847_v20 = vadd.f32 %v7369_v54, %v4347_v30 }
 0x8c2   : > { %4486 = vst [vmem:[%s7391_s16 + $0x78] sm:$0xff] %v4470_v52  ;;  %v4441_v56 = vadd.f32 %v4425_v33, %v3553_v10  ;;  %v4426_v32 = vmax.f32 %v5846_v46, 0.0 }
 0x8c3   : > { %4484 = vst [vmem:[%s7391_s16 + $0x68] sm:$0xff] %v4468_v19  ;;  %v4439_v17 = vadd.f32 %v4423_v14, %v3545_v8  ;;  %v4424_v3 = vmax.f32 %v5847_v20, 0.0 }
 0x8c4   : > { %v4457_v41 = vmax.f32 %v4441_v56, 0.0  ;;  %v4442_v31 = vadd.f32 %v4426_v32, %v3556_v9 }
 0x8c5   : > { %v4455_v42 = vmax.f32 %v4439_v17, 0.0  ;;  %v4440_v49 = vadd.f32 %v4424_v3, %v3548_v39  ;;  %v5706_v35 = vpop.f32.mrb[84].mxu0 }
 0x8c6   : > { %4473 = vst [vmem:[%s7391_s16 + $0x10] sm:$0xff] %v4457_v41  ;;  %v4458_v37 = vmax.f32 %v4442_v31, 0.0  ;;  %v5848_v18 = vadd.f32 %v5706_v35, %v7369_v54  ;;  %v4360_v36 = vpop.f32.mrb[85].mxu0 }
 0x8c7   : > { %4471 = vst [vmem:[%s7391_s16] sm:$0xff] %v4455_v42  ;;  %v4456_v28 = vmax.f32 %v4440_v49, 0.0  ;;  %v5849_v24 = vadd.f32 %v7369_v54, %v4360_v36  ;;  %v5707_v61 = vpop.f32.mrb[86].mxu0 }
 0x8c8   : > { %4474 = vst [vmem:[%s7391_s16 + $0x18] sm:$0xff] %v4458_v37  ;;  %v4429_v7 = vmax.f32 %v5848_v18, 0.0  ;;  %v5850_v22 = vadd.f32 %v5707_v61, %v7369_v54  ;;  %v4363_v26 = vpop.f32.mrb[87].mxu0 }
 0x8c9   : > { %4472 = vst [vmem:[%s7391_s16 + $0x8] sm:$0xff] %v4456_v28  ;;  %v4427_v0 = vmax.f32 %v5849_v24, 0.0  ;;  %v5851_v50 = vadd.f32 %v7369_v54, %v4363_v26 }
 0x8ca   : > { %v4445_v25 = vadd.f32 %v4429_v7, %v3569_v2  ;;  %v4430_v43 = vmax.f32 %v5850_v22, 0.0 }
 0x8cb   : > { %v4443_v16 = vadd.f32 %v4427_v0, %v3561_v4  ;;  %v4428_v5 = vmax.f32 %v5851_v50, 0.0 }
 0x8cc   : > { %v4461_v29 = vmax.f32 %v4445_v25, 0.0  ;;  %v4446_v27 = vadd.f32 %v4430_v43, %v3572_v60 }
 0x8cd   : > { %v4459_v54 = vmax.f32 %v4443_v16, 0.0  ;;  %v4444_v11 = vadd.f32 %v4428_v5, %v3564_v47 }
 0x8ce   : > { %4477 = vst [vmem:[%s7391_s16 + $0x30] sm:$0xff] %v4461_v29  ;;  %v4462_v12 = vmax.f32 %v4446_v27, 0.0 }
 0x8cf   : > { %4475 = vst [vmem:[%s7391_s16 + $0x20] sm:$0xff] %v4459_v54  ;;  %v4460_v58 = vmax.f32 %v4444_v11, 0.0 }
 0x8d0   : > { %4478 = vst [vmem:[%s7391_s16 + $0x38] sm:$0xff] %v4462_v12 }
 0x8d1   : > { %4476 = vst [vmem:[%s7391_s16 + $0x28] sm:$0xff] %v4460_v58 }
 0x8d2   : > { %6366 = shalt.err (!%p6363_p4)
}
 0x8d3   : > { %s6367_s14 = scalar_lea.hbm %s7445_s30, 2048  ;;  %s6371_s21 = scalar_lea.hbm %s7501_s7, 4096 }
 0x8d4   : > { %p6368_p9 = scmp.ne.s32.totalorder %s7445_s30, %s6367_s14  ;;  %p6372_p8 = scmp.lt.u32.totalorder %s7445_s30, %s7501_s7 }
 0x8d5   : > { %p6373_p13 = scmp.lt.u32.totalorder %s6371_s21, %s6367_s14  ;;  %p6375_p10 = scmp.lt.u32.totalorder %s6367_s14, %s7445_s30 }
 0x8d6   : > { %p6369_p0 = pnand %p6368_p9, %p6633_p5 }
 0x8d7   : > { %p6374_p6 = por %p6373_p13, %p6372_p8 }
 0x8d8   : > { %p6370_p11 = pneg %p6369_p0 }
 0x8d9   : > { %p6376_p3 = por %p6375_p10, %p6374_p6 }
 0x8db   : > { %p6377_p7 = pnand %p6376_p3, %p6370_p11 }
 0x8dd   : > { %6380 = shalt.err (!%p6377_p7)
}
 0x8de   : > { %s6437_s11 = smov 128   ;;  %s6438_s20 = smov 8  }
 0x8df   : > { %6002 = dma.vmem_to_hbm [thread:$0]  (%p6633_p5), %s7447_s23, 2048, %s7445_s30, %s4488_s28, %s6437_s11, %s6437_s11, %s6438_s20  }
 0x8e0 PF: > { %s7521_s9 = sld [smem:[#allocation16_spill]]  ;;  %s4516_s13 = sand.u32 1, %s6415_s24  }
 0x8e1   : > { %p7523_p1 = scmp.ge.s32.totalorder %s6427_s27, 2  ;;  %s4517_s15 = scalar_lea.sflag [#allocation5], %s4516_s13 }
 0x8e6   : > { %p7522_p12 = scmp.ne.s32.totalorder %s7521_s9, 0 }
 0x8e8   : > { %p6019_p2 = pnand %p7523_p1, %p7522_p12 }
 0x8ea   : > { %6410 = dma.done.wait (!%p6019_p2), %s4517_s15, 2048  }
 0x8eb   : > { %6412 = vsyncadd (!%p6019_p2), %s4517_s15, 4294965248  ;;  %p22_p4 = scmp.ge.s32.totalorder %s6619_s22, 4   ;;  %s7524_s24 = smov %s6419_s25 }
 0x8ec   : > { %s7525_s25 = smov %s6423_s26  ;;  %s7526_s26 = smov %s6629_s18 }
 0x8ed   : > { %s7527_s27 = smov %s6619_s22  ;;  %24 = sbr.rel (!%p22_p4) target bundleno = 7 (0x7), region = 129 }
 0x8f4   :  { %4522 = vsyncpa [#allocation4], 1 }
 0x8f5   :  { %4524 = vsyncpa [#allocation4 + $0x1], 1 }
 0x8f6   :  { %4525 = vsyncpa [#allocation7], 1 }
 0x8f7   :  { %4526 = vsyncpa [#allocation10], 1 }
 0x8f8   :  { %4527 = vsyncpa [#allocation5], 1 }
 0x8f9   :  { %4529 = vsyncpa [#allocation5 + $0x1], 1 }

</bundles_post_ra>
